<compile_context>
chip_gen: v6e
topology: v6e:2x2x1
jax: 0.10.0
libtpu: 0.0.40
codegen_flags: <defaults>
</compile_context>

<pallas_src>
import functools

import jax
import jax.numpy as jnp
from jax.experimental import pallas as pl
from jax.experimental.pallas import tpu as pltpu


def _round_up(x, m):
    return (x + m - 1) // m * m


# ----------------------------------------------------------------------------
# Pallas kernels
# ----------------------------------------------------------------------------
def _mask_kernel(img_ref, mask_ref, o_ref):
    # img block (1,H,W,C) * mask block (1,H,W,1): broadcasts over the lane dim.
    o_ref[...] = img_ref[...] * mask_ref[...]


def _mask_image_nhwc(img, mask):
    """img: (N,H,W,C) f32, mask: (N,H,W,1) f32 -> img * mask (no HBM broadcast)."""
    n, h, w, c = img.shape
    return pl.pallas_call(
        _mask_kernel,
        out_shape=jax.ShapeDtypeStruct(img.shape, img.dtype),
        grid_spec=pltpu.PrefetchScalarGridSpec(
            num_scalar_prefetch=0,
            grid=(n,),
            in_specs=[
                pl.BlockSpec((1, h, w, c), lambda i: (i, 0, 0, 0)),
                pl.BlockSpec((1, h, w, 1), lambda i: (i, 0, 0, 0)),
            ],
            out_specs=pl.BlockSpec((1, h, w, c), lambda i: (i, 0, 0, 0)),
        ),
        compiler_params=pltpu.CompilerParams(dimension_semantics=("parallel",)),
    )(img, mask)


def _mm_bias_act_kernel(x_ref, w_ref, b_ref, o_ref, *, activation):
    # bf16 operands -> MXU, f32 accumulate.
    acc = jnp.dot(x_ref[...], w_ref[...], preferred_element_type=jnp.float32)
    acc = acc + b_ref[...]  # f32 epilogue (v5e VPU/EUP have no bf16)
    if activation == "relu":
        acc = jnp.maximum(acc, 0.0)
    elif activation == "sigmoid":
        acc = jax.nn.sigmoid(acc)
    o_ref[...] = acc.astype(o_ref.dtype)


_LANE = 128      # lane width: output channels padded to a multiple of this
_K_ALIGN = 32    # contraction-dim alignment (covers bf16 sublane packing of 16)
_TM_MAX = 512    # M tile: ~85% HBM roofline, double-buffered footprint v7x-safe


def _matmul_bias_act(x, w, b, activation):
    """x: (M,K) f32, w: (K,N) f32, b: (N,) f32 -> (M,N) f32.

    Tiled over M (parallel, pipelined grid axis). Operands are cast to bf16 for
    the MXU; accumulation and epilogue are f32. K/N are zero-padded to
    lane/sublane-friendly sizes so all stores are lane-dense; padding is sliced
    off on return.
    """
    M, K = x.shape
    K2, N = w.shape
    assert K == K2

    tm = _TM_MAX if M >= _TM_MAX else max(16, _round_up(M, 16))
    mp = _round_up(M, tm)
    kp = _round_up(K, _K_ALIGN)
    np_ = _round_up(N, _LANE)

    x_p = jnp.pad(x, ((0, mp - M), (0, kp - K))).astype(jnp.bfloat16)
    w_p = jnp.pad(w, ((0, kp - K), (0, np_ - N))).astype(jnp.bfloat16)
    b_p = jnp.pad(b, (0, np_ - N)).astype(jnp.float32).reshape(1, np_)

    kernel = functools.partial(_mm_bias_act_kernel, activation=activation)
    out = pl.pallas_call(
        kernel,
        out_shape=jax.ShapeDtypeStruct((mp, np_), jnp.float32),
        grid_spec=pltpu.PrefetchScalarGridSpec(
            num_scalar_prefetch=0,
            grid=(mp // tm,),
            in_specs=[
                pl.BlockSpec((tm, kp), lambda i: (i, 0)),     # patches tile
                pl.BlockSpec((kp, np_), lambda i: (0, 0)),    # resident weights
                pl.BlockSpec((1, np_), lambda i: (0, 0)),     # resident bias
            ],
            out_specs=pl.BlockSpec((tm, np_), lambda i: (i, 0)),
        ),
        compiler_params=pltpu.CompilerParams(
            dimension_semantics=("parallel",),   # shards M-tiles across v7x's 2 TCs
            vmem_limit_bytes=32 * 1024 * 1024,
        ),
    )(x_p, w_p, b_p)
    return out[:M, :N]


# ----------------------------------------------------------------------------
# Conv layers built on the Pallas matmul kernel
# ----------------------------------------------------------------------------
def _im2col(x, k, stride, pad_lo, pad_hi):
    """x: (N,H,W,C) -> patches (N*H_out*W_out, k*k*C), ordering (dy, dx, C)."""
    n, h, w, c = x.shape
    xp = jnp.pad(x, ((0, 0), (pad_lo, pad_hi), (pad_lo, pad_hi), (0, 0)))
    hp = h + pad_lo + pad_hi
    wp = w + pad_lo + pad_hi
    h_out = (hp - k) // stride + 1
    w_out = (wp - k) // stride + 1
    chunks = []
    for dy in range(k):
        for dx in range(k):
            chunks.append(
                xp[:, dy:dy + (h_out - 1) * stride + 1:stride,
                      dx:dx + (w_out - 1) * stride + 1:stride, :]
            )
    patches = jnp.concatenate(chunks, axis=-1)
    return patches.reshape(n * h_out * w_out, k * k * c), (n, h_out, w_out)


def conv2d(x_nhwc, w_oihw, b, stride, padding, activation):
    """PyTorch-semantics Conv2d. w_oihw: (C_out, C_in, k, k)."""
    c_out, c_in, k, _ = w_oihw.shape
    w_hwio = jnp.transpose(w_oihw, (2, 3, 1, 0))  # (k, k, C_in, C_out)
    patches, (n, ho, wo) = _im2col(x_nhwc, k, stride, padding, padding)
    out = _matmul_bias_act(patches, w_hwio.reshape(k * k * c_in, c_out), b, activation)
    return out.reshape(n, ho, wo, c_out)


def _phase_taps(r, k, stride, pad_lo):
    """Taps (d, input_row_offset) contributing to output phase r of a ConvT."""
    taps = []
    for d in range(k):
        q = r + d - pad_lo
        if q % stride == 0:
            taps.append((d, q // stride))
    return taps


def conv_transpose2d(x_nhwc, w_iohw, b, stride, padding, output_padding, activation):
    """PyTorch-semantics ConvTranspose2d. w_iohw: (C_in, C_out, k, k)."""
    c_in, c_out, k, _ = w_iohw.shape
    n, h, w, _ = x_nhwc.shape
    h_out = (h - 1) * stride - 2 * padding + k + output_padding
    w_out = (w - 1) * stride - 2 * padding + k + output_padding
    # Equivalent direct-conv weight: flip spatially, swap in/out channels -> HWIO.
    w_hwio = jnp.transpose(jnp.flip(w_iohw, axis=(2, 3)), (2, 3, 0, 1))
    pad_lo = k - 1 - padding

    taps = [_phase_taps(r, k, stride, pad_lo) for r in range(stride)]
    clean = (h_out == stride * h and w_out == stride * w
             and all(len(t) > 0 for t in taps))

    if not clean:
        # Fallback (non-default configs): zero-dilate + stride-1 conv.
        xd = jnp.zeros((n, (h - 1) * stride + 1, (w - 1) * stride + 1, c_in),
                       x_nhwc.dtype)
        xd = xd.at[:, ::stride, ::stride, :].set(x_nhwc)
        pad_hi = k - 1 - padding + output_padding
        patches, (_, ho, wo) = _im2col(xd, k, 1, pad_lo, pad_hi)
        out = _matmul_bias_act(patches, w_hwio.reshape(k * k * c_in, c_out), b,
                               activation)
        return out.reshape(n, ho, wo, c_out)

    # Sub-pixel (stride-phase) decomposition: each output phase (ry, rx) is a
    # small stride-1 conv over the UN-dilated input; phases are interleaved to
    # form the output.  No structural zeros are ever multiplied or moved.
    all_o = [o for tl in taps for (_, o) in tl]
    lp = max(0, -min(all_o))
    hp = max(0, max(all_o))
    xp = jnp.pad(x_nhwc, ((0, 0), (lp, hp), (lp, hp), (0, 0)))

    phase_rows = []
    for ry in range(stride):
        row = []
        for rx in range(stride):
            cols, wts = [], []
            for (dy, oy) in taps[ry]:
                for (dx, ox) in taps[rx]:
                    cols.append(xp[:, oy + lp:oy + lp + h, ox + lp:ox + lp + w, :])
                    wts.append(w_hwio[dy, dx])              # (C_in, C_out)
            patch = jnp.concatenate(cols, axis=-1).reshape(n * h * w,
                                                           len(cols) * c_in)
            wmat = jnp.concatenate(wts, axis=0)             # (T*C_in, C_out)
            out = _matmul_bias_act(patch, wmat, b, activation)
            row.append(out.reshape(n, h, w, c_out))
        phase_rows.append(row)

    # Interleave phases: out[n, s*y+ry, s*x+rx, c] = phase[ry][rx][n, y, x, c].
    stacked = jnp.stack([jnp.stack(r, axis=3) for r in phase_rows], axis=2)
    return stacked.reshape(n, h * stride, w * stride, c_out)


# ----------------------------------------------------------------------------
# Model: deterministic parameter init + forward
# ----------------------------------------------------------------------------
def _init_conv(key, c_in, c_out, k):
    kw, kb = jax.random.split(key)
    bound = 1.0 / (c_in * k * k) ** 0.5
    w = jax.random.uniform(kw, (c_out, c_in, k, k), jnp.float32, -bound, bound)
    b = jax.random.uniform(kb, (c_out,), jnp.float32, -bound, bound)
    return w, b


def _init_conv_t(key, c_in, c_out, k):
    kw, kb = jax.random.split(key)
    bound = 1.0 / (c_out * k * k) ** 0.5  # PyTorch fan_in for ConvTranspose2d
    w = jax.random.uniform(kw, (c_in, c_out, k, k), jnp.float32, -bound, bound)
    b = jax.random.uniform(kb, (c_out,), jnp.float32, -bound, bound)
    return w, b


def init_simple_conv_params(key, in_channels=3, middle_channels=(64, 128, 256), k=3):
    ks = jax.random.split(key, 6)
    m0, m1, m2 = middle_channels
    return {
        "enc0": _init_conv(ks[0], in_channels, m0, k),
        "enc1": _init_conv(ks[1], m0, m1, k),
        "enc2": _init_conv(ks[2], m1, m2, k),
        "dec0": _init_conv_t(ks[3], m2, m1, k),
        "dec1": _init_conv_t(ks[4], m1, m0, k),
        "dec2": _init_conv_t(ks[5], m0, in_channels, k),
    }


def simple_conv_forward(params, image_nchw, mask_nchw):
    """image: (N, C, H, W), mask: (N, 1, H, W). Returns (N, C, H, W)."""
    # TODO(synk): `mask_image` is not defined in the source module; assumed to be
    # elementwise image * mask broadcast over channels.
    x = jnp.transpose(image_nchw, (0, 2, 3, 1)).astype(jnp.float32)  # NHWC
    m = jnp.transpose(mask_nchw, (0, 2, 3, 1)).astype(jnp.float32)   # (N,H,W,1)
    x = _mask_image_nhwc(x, m)

    # Encoder: Conv(s=2,p=1,k=3) + ReLU, three times.
    x = conv2d(x, *params["enc0"], stride=2, padding=1, activation="relu")
    x = conv2d(x, *params["enc1"], stride=2, padding=1, activation="relu")
    x = conv2d(x, *params["enc2"], stride=2, padding=1, activation="relu")

    # Decoder: ConvT(s=2,p=1,op=1,k=3) + ReLU, ReLU, Sigmoid.
    x = conv_transpose2d(x, *params["dec0"], stride=2, padding=1,
                         output_padding=1, activation="relu")
    x = conv_transpose2d(x, *params["dec1"], stride=2, padding=1,
                         output_padding=1, activation="relu")
    x = conv_transpose2d(x, *params["dec2"], stride=2, padding=1,
                         output_padding=1, activation="sigmoid")

    return jnp.transpose(x, (0, 3, 1, 2))  # back to NCHW


if __name__ == "__main__":
    key = jax.random.PRNGKey(0)
    k_params, k_img, k_mask = jax.random.split(key, 3)

    N, C, H, W = 2, 3, 16, 16
    params = init_simple_conv_params(k_params, in_channels=C)

    image = jax.random.normal(k_img, (N, C, H, W), jnp.float32)
    mask = jax.random.bernoulli(k_mask, 0.7, (N, 1, H, W)).astype(jnp.float32)

    fwd = jax.jit(simple_conv_forward)
    out = fwd(params, image, mask)
    out = jax.block_until_ready(out)
    assert out.shape == (N, C, H, W)
    print("KERNEL_OK")
</pallas_src>

<mosaic_0001>
module attributes {stable_mosaic.version = 11 : i64} {
  func.func @_mask_kernel(%arg0: i32, %arg1: memref<1x16x16x3xf32, #tpu.memory_space<vmem>>, %arg2: memref<1x16x16x1xf32, #tpu.memory_space<vmem>>, %arg3: memref<1x16x16x3xf32, #tpu.memory_space<vmem>>) attributes {dimension_semantics = [#tpu.dimension_semantics<parallel>], iteration_bounds = array<i64: 2>, scalar_prefetch = 0 : i64, scratch_operands = 0 : i64, tpu.core_type = #tpu.core_type<tc>, window_params = [{transform_indices = @transform_0, window_bounds = array<i64: 1, 16, 16, 3>}, {transform_indices = @transform_1, window_bounds = array<i64: 1, 16, 16, 1>}, {transform_indices = @transform_2, window_bounds = array<i64: 1, 16, 16, 3>}]} {
    %c0 = arith.constant 0 : index
    %c0_0 = arith.constant 0 : index
    %c0_1 = arith.constant 0 : index
    %c0_2 = arith.constant 0 : index
    %0 = vector.load %arg1[%c0, %c0_0, %c0_1, %c0_2] : memref<1x16x16x3xf32, #tpu.memory_space<vmem>>, vector<1x16x16x3xf32>
    %c0_3 = arith.constant 0 : index
    %c0_4 = arith.constant 0 : index
    %c0_5 = arith.constant 0 : index
    %c0_6 = arith.constant 0 : index
    %1 = vector.load %arg2[%c0_3, %c0_4, %c0_5, %c0_6] : memref<1x16x16x1xf32, #tpu.memory_space<vmem>>, vector<1x16x16x1xf32>
    %2 = vector.broadcast %1 : vector<1x16x16x1xf32> to vector<1x16x16x3xf32>
    %3 = arith.mulf %0, %2 : vector<1x16x16x3xf32>
    %c0_7 = arith.constant 0 : index
    %c0_8 = arith.constant 0 : index
    %c0_9 = arith.constant 0 : index
    %c0_10 = arith.constant 0 : index
    %4 = vector.load %arg3[%c0_7, %c0_8, %c0_9, %c0_10] : memref<1x16x16x3xf32, #tpu.memory_space<vmem>>, vector<1x16x16x3xf32>
    tpu.vector_store %arg3[%c0_7, %c0_8, %c0_9, %c0_10], %3 {strides = array<i32>} : memref<1x16x16x3xf32, #tpu.memory_space<vmem>>, vector<1x16x16x3xf32>,
    return
  }
  func.func @transform_0(%arg0: i32) -> (i32, i32, i32, i32) {
    %c0_i32 = arith.constant 0 : i32
    %c0_i32_0 = arith.constant 0 : i32
    %c0_i32_1 = arith.constant 0 : i32
    %c0_i32_2 = arith.constant 0 : i32
    return %arg0, %c0_i32, %c0_i32_0, %c0_i32_1 : i32, i32, i32, i32
  }
  func.func @transform_1(%arg0: i32) -> (i32, i32, i32, i32) {
    %c0_i32 = arith.constant 0 : i32
    %c0_i32_0 = arith.constant 0 : i32
    %c0_i32_1 = arith.constant 0 : i32
    %c0_i32_2 = arith.constant 0 : i32
    return %arg0, %c0_i32, %c0_i32_0, %c0_i32_1 : i32, i32, i32, i32
  }
  func.func @transform_2(%arg0: i32) -> (i32, i32, i32, i32) {
    %c0_i32 = arith.constant 0 : i32
    %c0_i32_0 = arith.constant 0 : i32
    %c0_i32_1 = arith.constant 0 : i32
    %c0_i32_2 = arith.constant 0 : i32
    return %arg0, %c0_i32, %c0_i32_0, %c0_i32_1 : i32, i32, i32, i32
  }
}

module attributes {stable_mosaic.version = 11 : i64} {
  func.func @_mm_bias_act_kernel(%arg0: i32, %arg1: memref<128x32xbf16, #tpu.memory_space<vmem>>, %arg2: memref<32x128xbf16, #tpu.memory_space<vmem>>, %arg3: memref<1x128xf32, #tpu.memory_space<vmem>>, %arg4: memref<128x128xf32, #tpu.memory_space<vmem>>) attributes {dimension_semantics = [#tpu.dimension_semantics<parallel>], iteration_bounds = array<i64: 1>, scalar_prefetch = 0 : i64, scratch_operands = 0 : i64, tpu.core_type = #tpu.core_type<tc>, window_params = [{transform_indices = @transform_0, window_bounds = array<i64: 128, 32>}, {pipeline_mode = #tpu.pipeline_mode<synchronous>, transform_indices = @transform_1, window_bounds = array<i64: 32, 128>}, {pipeline_mode = #tpu.pipeline_mode<synchronous>, transform_indices = @transform_2, window_bounds = array<i64: 1, 128>}, {transform_indices = @transform_3, window_bounds = array<i64: 128, 128>}]} {
    %c0 = arith.constant 0 : index
    %c0_0 = arith.constant 0 : index
    %0 = vector.load %arg1[%c0, %c0_0] : memref<128x32xbf16, #tpu.memory_space<vmem>>, vector<128x32xbf16>
    %c0_1 = arith.constant 0 : index
    %c0_2 = arith.constant 0 : index
    %1 = vector.load %arg2[%c0_1, %c0_2] : memref<32x128xbf16, #tpu.memory_space<vmem>>, vector<32x128xbf16>
    %cst = arith.constant dense<0.000000e+00> : vector<128x128xf32>
    %2 = tpu.matmul %0, %1, %cst {dimension_numbers = #tpu.dot_dimension_numbers<[1], [0], [0], [1], [0, 0, 1, 1], [], []>} : vector<128x32xbf16>, vector<32x128xbf16>, vector<128x128xf32> -> vector<128x128xf32>
    %c0_3 = arith.constant 0 : index
    %c0_4 = arith.constant 0 : index
    %3 = vector.load %arg3[%c0_3, %c0_4] : memref<1x128xf32, #tpu.memory_space<vmem>>, vector<1x128xf32>
    %4 = vector.broadcast %3 : vector<1x128xf32> to vector<128x128xf32>
    %5 = arith.addf %2, %4 : vector<128x128xf32>
    %cst_5 = arith.constant 0.000000e+00 : f32
    %6 = vector.broadcast %cst_5 : f32 to vector<128x128xf32>
    %7 = arith.maximumf %5, %6 : vector<128x128xf32>
    %c0_6 = arith.constant 0 : index
    %c0_7 = arith.constant 0 : index
    %8 = vector.load %arg4[%c0_6, %c0_7] : memref<128x128xf32, #tpu.memory_space<vmem>>, vector<128x128xf32>
    tpu.vector_store %arg4[%c0_6, %c0_7], %7 {strides = array<i32>} : memref<128x128xf32, #tpu.memory_space<vmem>>, vector<128x128xf32>,
    return
  }
  func.func @transform_0(%arg0: i32) -> (i32, i32) {
    %c0_i32 = arith.constant 0 : i32
    %c0_i32_0 = arith.constant 0 : i32
    return %arg0, %c0_i32 : i32, i32
  }
  func.func @transform_1(%arg0: i32) -> (i32, i32) {
    %c0_i32 = arith.constant 0 : i32
    %c0_i32_0 = arith.constant 0 : i32
    %c0_i32_1 = arith.constant 0 : i32
    return %c0_i32, %c0_i32_0 : i32, i32
  }
  func.func @transform_2(%arg0: i32) -> (i32, i32) {
    %c0_i32 = arith.constant 0 : i32
    %c0_i32_0 = arith.constant 0 : i32
    %c0_i32_1 = arith.constant 0 : i32
    return %c0_i32, %c0_i32_0 : i32, i32
  }
  func.func @transform_3(%arg0: i32) -> (i32, i32) {
    %c0_i32 = arith.constant 0 : i32
    %c0_i32_0 = arith.constant 0 : i32
    return %arg0, %c0_i32 : i32, i32
  }
}

module attributes {stable_mosaic.version = 11 : i64} {
  func.func @_mm_bias_act_kernel(%arg0: i32, %arg1: memref<32x576xbf16, #tpu.memory_space<vmem>>, %arg2: memref<576x128xbf16, #tpu.memory_space<vmem>>, %arg3: memref<1x128xf32, #tpu.memory_space<vmem>>, %arg4: memref<32x128xf32, #tpu.memory_space<vmem>>) attributes {dimension_semantics = [#tpu.dimension_semantics<parallel>], iteration_bounds = array<i64: 1>, scalar_prefetch = 0 : i64, scratch_operands = 0 : i64, tpu.core_type = #tpu.core_type<tc>, window_params = [{transform_indices = @transform_0, window_bounds = array<i64: 32, 576>}, {pipeline_mode = #tpu.pipeline_mode<synchronous>, transform_indices = @transform_1, window_bounds = array<i64: 576, 128>}, {pipeline_mode = #tpu.pipeline_mode<synchronous>, transform_indices = @transform_2, window_bounds = array<i64: 1, 128>}, {transform_indices = @transform_3, window_bounds = array<i64: 32, 128>}]} {
    %c0 = arith.constant 0 : index
    %c0_0 = arith.constant 0 : index
    %0 = vector.load %arg1[%c0, %c0_0] : memref<32x576xbf16, #tpu.memory_space<vmem>>, vector<32x576xbf16>
    %c0_1 = arith.constant 0 : index
    %c0_2 = arith.constant 0 : index
    %1 = vector.load %arg2[%c0_1, %c0_2] : memref<576x128xbf16, #tpu.memory_space<vmem>>, vector<576x128xbf16>
    %cst = arith.constant dense<0.000000e+00> : vector<32x128xf32>
    %2 = tpu.matmul %0, %1, %cst {dimension_numbers = #tpu.dot_dimension_numbers<[1], [0], [0], [1], [0, 0, 1, 1], [], []>} : vector<32x576xbf16>, vector<576x128xbf16>, vector<32x128xf32> -> vector<32x128xf32>
    %c0_3 = arith.constant 0 : index
    %c0_4 = arith.constant 0 : index
    %3 = vector.load %arg3[%c0_3, %c0_4] : memref<1x128xf32, #tpu.memory_space<vmem>>, vector<1x128xf32>
    %4 = vector.broadcast %3 : vector<1x128xf32> to vector<32x128xf32>
    %5 = arith.addf %2, %4 : vector<32x128xf32>
    %cst_5 = arith.constant 0.000000e+00 : f32
    %6 = vector.broadcast %cst_5 : f32 to vector<32x128xf32>
    %7 = arith.maximumf %5, %6 : vector<32x128xf32>
    %c0_6 = arith.constant 0 : index
    %c0_7 = arith.constant 0 : index
    %8 = vector.load %arg4[%c0_6, %c0_7] : memref<32x128xf32, #tpu.memory_space<vmem>>, vector<32x128xf32>
    tpu.vector_store %arg4[%c0_6, %c0_7], %7 {strides = array<i32>} : memref<32x128xf32, #tpu.memory_space<vmem>>, vector<32x128xf32>,
    return
  }
  func.func @transform_0(%arg0: i32) -> (i32, i32) {
    %c0_i32 = arith.constant 0 : i32
    %c0_i32_0 = arith.constant 0 : i32
    return %arg0, %c0_i32 : i32, i32
  }
  func.func @transform_1(%arg0: i32) -> (i32, i32) {
    %c0_i32 = arith.constant 0 : i32
    %c0_i32_0 = arith.constant 0 : i32
    %c0_i32_1 = arith.constant 0 : i32
    return %c0_i32, %c0_i32_0 : i32, i32
  }
  func.func @transform_2(%arg0: i32) -> (i32, i32) {
    %c0_i32 = arith.constant 0 : i32
    %c0_i32_0 = arith.constant 0 : i32
    %c0_i32_1 = arith.constant 0 : i32
    return %c0_i32, %c0_i32_0 : i32, i32
  }
  func.func @transform_3(%arg0: i32) -> (i32, i32) {
    %c0_i32 = arith.constant 0 : i32
    %c0_i32_0 = arith.constant 0 : i32
    return %arg0, %c0_i32 : i32, i32
  }
}

module attributes {stable_mosaic.version = 11 : i64} {
  func.func @_mm_bias_act_kernel(%arg0: i32, %arg1: memref<16x1152xbf16, #tpu.memory_space<vmem>>, %arg2: memref<1152x256xbf16, #tpu.memory_space<vmem>>, %arg3: memref<1x256xf32, #tpu.memory_space<vmem>>, %arg4: memref<16x256xf32, #tpu.memory_space<vmem>>) attributes {dimension_semantics = [#tpu.dimension_semantics<parallel>], iteration_bounds = array<i64: 1>, scalar_prefetch = 0 : i64, scratch_operands = 0 : i64, tpu.core_type = #tpu.core_type<tc>, window_params = [{transform_indices = @transform_0, window_bounds = array<i64: 16, 1152>}, {pipeline_mode = #tpu.pipeline_mode<synchronous>, transform_indices = @transform_1, window_bounds = array<i64: 1152, 256>}, {pipeline_mode = #tpu.pipeline_mode<synchronous>, transform_indices = @transform_2, window_bounds = array<i64: 1, 256>}, {transform_indices = @transform_3, window_bounds = array<i64: 16, 256>}]} {
    %c0 = arith.constant 0 : index
    %c0_0 = arith.constant 0 : index
    %0 = vector.load %arg1[%c0, %c0_0] : memref<16x1152xbf16, #tpu.memory_space<vmem>>, vector<16x1152xbf16>
    %c0_1 = arith.constant 0 : index
    %c0_2 = arith.constant 0 : index
    %1 = vector.load %arg2[%c0_1, %c0_2] : memref<1152x256xbf16, #tpu.memory_space<vmem>>, vector<1152x256xbf16>
    %cst = arith.constant dense<0.000000e+00> : vector<16x256xf32>
    %2 = tpu.matmul %0, %1, %cst {dimension_numbers = #tpu.dot_dimension_numbers<[1], [0], [0], [1], [0, 0, 1, 1], [], []>} : vector<16x1152xbf16>, vector<1152x256xbf16>, vector<16x256xf32> -> vector<16x256xf32>
    %c0_3 = arith.constant 0 : index
    %c0_4 = arith.constant 0 : index
    %3 = vector.load %arg3[%c0_3, %c0_4] : memref<1x256xf32, #tpu.memory_space<vmem>>, vector<1x256xf32>
    %4 = vector.broadcast %3 : vector<1x256xf32> to vector<16x256xf32>
    %5 = arith.addf %2, %4 : vector<16x256xf32>
    %cst_5 = arith.constant 0.000000e+00 : f32
    %6 = vector.broadcast %cst_5 : f32 to vector<16x256xf32>
    %7 = arith.maximumf %5, %6 : vector<16x256xf32>
    %c0_6 = arith.constant 0 : index
    %c0_7 = arith.constant 0 : index
    %8 = vector.load %arg4[%c0_6, %c0_7] : memref<16x256xf32, #tpu.memory_space<vmem>>, vector<16x256xf32>
    tpu.vector_store %arg4[%c0_6, %c0_7], %7 {strides = array<i32>} : memref<16x256xf32, #tpu.memory_space<vmem>>, vector<16x256xf32>,
    return
  }
  func.func @transform_0(%arg0: i32) -> (i32, i32) {
    %c0_i32 = arith.constant 0 : i32
    %c0_i32_0 = arith.constant 0 : i32
    return %arg0, %c0_i32 : i32, i32
  }
  func.func @transform_1(%arg0: i32) -> (i32, i32) {
    %c0_i32 = arith.constant 0 : i32
    %c0_i32_0 = arith.constant 0 : i32
    %c0_i32_1 = arith.constant 0 : i32
    return %c0_i32, %c0_i32_0 : i32, i32
  }
  func.func @transform_2(%arg0: i32) -> (i32, i32) {
    %c0_i32 = arith.constant 0 : i32
    %c0_i32_0 = arith.constant 0 : i32
    %c0_i32_1 = arith.constant 0 : i32
    return %c0_i32, %c0_i32_0 : i32, i32
  }
  func.func @transform_3(%arg0: i32) -> (i32, i32) {
    %c0_i32 = arith.constant 0 : i32
    %c0_i32_0 = arith.constant 0 : i32
    return %arg0, %c0_i32 : i32, i32
  }
}

module attributes {stable_mosaic.version = 11 : i64} {
  func.func @_mm_bias_act_kernel(%arg0: i32, %arg1: memref<16x512xbf16, #tpu.memory_space<vmem>>, %arg2: memref<512x128xbf16, #tpu.memory_space<vmem>>, %arg3: memref<1x128xf32, #tpu.memory_space<vmem>>, %arg4: memref<16x128xf32, #tpu.memory_space<vmem>>) attributes {dimension_semantics = [#tpu.dimension_semantics<parallel>], iteration_bounds = array<i64: 1>, scalar_prefetch = 0 : i64, scratch_operands = 0 : i64, tpu.core_type = #tpu.core_type<tc>, window_params = [{transform_indices = @transform_0, window_bounds = array<i64: 16, 512>}, {pipeline_mode = #tpu.pipeline_mode<synchronous>, transform_indices = @transform_1, window_bounds = array<i64: 512, 128>}, {pipeline_mode = #tpu.pipeline_mode<synchronous>, transform_indices = @transform_2, window_bounds = array<i64: 1, 128>}, {transform_indices = @transform_3, window_bounds = array<i64: 16, 128>}]} {
    %c0 = arith.constant 0 : index
    %c0_0 = arith.constant 0 : index
    %0 = vector.load %arg1[%c0, %c0_0] : memref<16x512xbf16, #tpu.memory_space<vmem>>, vector<16x512xbf16>
    %c0_1 = arith.constant 0 : index
    %c0_2 = arith.constant 0 : index
    %1 = vector.load %arg2[%c0_1, %c0_2] : memref<512x128xbf16, #tpu.memory_space<vmem>>, vector<512x128xbf16>
    %cst = arith.constant dense<0.000000e+00> : vector<16x128xf32>
    %2 = tpu.matmul %0, %1, %cst {dimension_numbers = #tpu.dot_dimension_numbers<[1], [0], [0], [1], [0, 0, 1, 1], [], []>} : vector<16x512xbf16>, vector<512x128xbf16>, vector<16x128xf32> -> vector<16x128xf32>
    %c0_3 = arith.constant 0 : index
    %c0_4 = arith.constant 0 : index
    %3 = vector.load %arg3[%c0_3, %c0_4] : memref<1x128xf32, #tpu.memory_space<vmem>>, vector<1x128xf32>
    %4 = vector.broadcast %3 : vector<1x128xf32> to vector<16x128xf32>
    %5 = arith.addf %2, %4 : vector<16x128xf32>
    %cst_5 = arith.constant 0.000000e+00 : f32
    %6 = vector.broadcast %cst_5 : f32 to vector<16x128xf32>
    %7 = arith.maximumf %5, %6 : vector<16x128xf32>
    %c0_6 = arith.constant 0 : index
    %c0_7 = arith.constant 0 : index
    %8 = vector.load %arg4[%c0_6, %c0_7] : memref<16x128xf32, #tpu.memory_space<vmem>>, vector<16x128xf32>
    tpu.vector_store %arg4[%c0_6, %c0_7], %7 {strides = array<i32>} : memref<16x128xf32, #tpu.memory_space<vmem>>, vector<16x128xf32>,
    return
  }
  func.func @transform_0(%arg0: i32) -> (i32, i32) {
    %c0_i32 = arith.constant 0 : i32
    %c0_i32_0 = arith.constant 0 : i32
    return %arg0, %c0_i32 : i32, i32
  }
  func.func @transform_1(%arg0: i32) -> (i32, i32) {
    %c0_i32 = arith.constant 0 : i32
    %c0_i32_0 = arith.constant 0 : i32
    %c0_i32_1 = arith.constant 0 : i32
    return %c0_i32, %c0_i32_0 : i32, i32
  }
  func.func @transform_2(%arg0: i32) -> (i32, i32) {
    %c0_i32 = arith.constant 0 : i32
    %c0_i32_0 = arith.constant 0 : i32
    %c0_i32_1 = arith.constant 0 : i32
    return %c0_i32, %c0_i32_0 : i32, i32
  }
  func.func @transform_3(%arg0: i32) -> (i32, i32) {
    %c0_i32 = arith.constant 0 : i32
    %c0_i32_0 = arith.constant 0 : i32
    return %arg0, %c0_i32 : i32, i32
  }
}

module attributes {stable_mosaic.version = 11 : i64} {
  func.func @_mm_bias_act_kernel(%arg0: i32, %arg1: memref<16x256xbf16, #tpu.memory_space<vmem>>, %arg2: memref<256x128xbf16, #tpu.memory_space<vmem>>, %arg3: memref<1x128xf32, #tpu.memory_space<vmem>>, %arg4: memref<16x128xf32, #tpu.memory_space<vmem>>) attributes {dimension_semantics = [#tpu.dimension_semantics<parallel>], iteration_bounds = array<i64: 1>, scalar_prefetch = 0 : i64, scratch_operands = 0 : i64, tpu.core_type = #tpu.core_type<tc>, window_params = [{transform_indices = @transform_0, window_bounds = array<i64: 16, 256>}, {pipeline_mode = #tpu.pipeline_mode<synchronous>, transform_indices = @transform_1, window_bounds = array<i64: 256, 128>}, {pipeline_mode = #tpu.pipeline_mode<synchronous>, transform_indices = @transform_2, window_bounds = array<i64: 1, 128>}, {transform_indices = @transform_3, window_bounds = array<i64: 16, 128>}]} {
    %c0 = arith.constant 0 : index
    %c0_0 = arith.constant 0 : index
    %0 = vector.load %arg1[%c0, %c0_0] : memref<16x256xbf16, #tpu.memory_space<vmem>>, vector<16x256xbf16>
    %c0_1 = arith.constant 0 : index
    %c0_2 = arith.constant 0 : index
    %1 = vector.load %arg2[%c0_1, %c0_2] : memref<256x128xbf16, #tpu.memory_space<vmem>>, vector<256x128xbf16>
    %cst = arith.constant dense<0.000000e+00> : vector<16x128xf32>
    %2 = tpu.matmul %0, %1, %cst {dimension_numbers = #tpu.dot_dimension_numbers<[1], [0], [0], [1], [0, 0, 1, 1], [], []>} : vector<16x256xbf16>, vector<256x128xbf16>, vector<16x128xf32> -> vector<16x128xf32>
    %c0_3 = arith.constant 0 : index
    %c0_4 = arith.constant 0 : index
    %3 = vector.load %arg3[%c0_3, %c0_4] : memref<1x128xf32, #tpu.memory_space<vmem>>, vector<1x128xf32>
    %4 = vector.broadcast %3 : vector<1x128xf32> to vector<16x128xf32>
    %5 = arith.addf %2, %4 : vector<16x128xf32>
    %cst_5 = arith.constant 0.000000e+00 : f32
    %6 = vector.broadcast %cst_5 : f32 to vector<16x128xf32>
    %7 = arith.maximumf %5, %6 : vector<16x128xf32>
    %c0_6 = arith.constant 0 : index
    %c0_7 = arith.constant 0 : index
    %8 = vector.load %arg4[%c0_6, %c0_7] : memref<16x128xf32, #tpu.memory_space<vmem>>, vector<16x128xf32>
    tpu.vector_store %arg4[%c0_6, %c0_7], %7 {strides = array<i32>} : memref<16x128xf32, #tpu.memory_space<vmem>>, vector<16x128xf32>,
    return
  }
  func.func @transform_0(%arg0: i32) -> (i32, i32) {
    %c0_i32 = arith.constant 0 : i32
    %c0_i32_0 = arith.constant 0 : i32
    return %arg0, %c0_i32 : i32, i32
  }
  func.func @transform_1(%arg0: i32) -> (i32, i32) {
    %c0_i32 = arith.constant 0 : i32
    %c0_i32_0 = arith.constant 0 : i32
    %c0_i32_1 = arith.constant 0 : i32
    return %c0_i32, %c0_i32_0 : i32, i32
  }
  func.func @transform_2(%arg0: i32) -> (i32, i32) {
    %c0_i32 = arith.constant 0 : i32
    %c0_i32_0 = arith.constant 0 : i32
    %c0_i32_1 = arith.constant 0 : i32
    return %c0_i32, %c0_i32_0 : i32, i32
  }
  func.func @transform_3(%arg0: i32) -> (i32, i32) {
    %c0_i32 = arith.constant 0 : i32
    %c0_i32_0 = arith.constant 0 : i32
    return %arg0, %c0_i32 : i32, i32
  }
}

module attributes {stable_mosaic.version = 11 : i64} {
  func.func @_mm_bias_act_kernel(%arg0: i32, %arg1: memref<16x1024xbf16, #tpu.memory_space<vmem>>, %arg2: memref<1024x128xbf16, #tpu.memory_space<vmem>>, %arg3: memref<1x128xf32, #tpu.memory_space<vmem>>, %arg4: memref<16x128xf32, #tpu.memory_space<vmem>>) attributes {dimension_semantics = [#tpu.dimension_semantics<parallel>], iteration_bounds = array<i64: 1>, scalar_prefetch = 0 : i64, scratch_operands = 0 : i64, tpu.core_type = #tpu.core_type<tc>, window_params = [{transform_indices = @transform_0, window_bounds = array<i64: 16, 1024>}, {pipeline_mode = #tpu.pipeline_mode<synchronous>, transform_indices = @transform_1, window_bounds = array<i64: 1024, 128>}, {pipeline_mode = #tpu.pipeline_mode<synchronous>, transform_indices = @transform_2, window_bounds = array<i64: 1, 128>}, {transform_indices = @transform_3, window_bounds = array<i64: 16, 128>}]} {
    %c0 = arith.constant 0 : index
    %c0_0 = arith.constant 0 : index
    %0 = vector.load %arg1[%c0, %c0_0] : memref<16x1024xbf16, #tpu.memory_space<vmem>>, vector<16x1024xbf16>
    %c0_1 = arith.constant 0 : index
    %c0_2 = arith.constant 0 : index
    %1 = vector.load %arg2[%c0_1, %c0_2] : memref<1024x128xbf16, #tpu.memory_space<vmem>>, vector<1024x128xbf16>
    %cst = arith.constant dense<0.000000e+00> : vector<16x128xf32>
    %2 = tpu.matmul %0, %1, %cst {dimension_numbers = #tpu.dot_dimension_numbers<[1], [0], [0], [1], [0, 0, 1, 1], [], []>} : vector<16x1024xbf16>, vector<1024x128xbf16>, vector<16x128xf32> -> vector<16x128xf32>
    %c0_3 = arith.constant 0 : index
    %c0_4 = arith.constant 0 : index
    %3 = vector.load %arg3[%c0_3, %c0_4] : memref<1x128xf32, #tpu.memory_space<vmem>>, vector<1x128xf32>
    %4 = vector.broadcast %3 : vector<1x128xf32> to vector<16x128xf32>
    %5 = arith.addf %2, %4 : vector<16x128xf32>
    %cst_5 = arith.constant 0.000000e+00 : f32
    %6 = vector.broadcast %cst_5 : f32 to vector<16x128xf32>
    %7 = arith.maximumf %5, %6 : vector<16x128xf32>
    %c0_6 = arith.constant 0 : index
    %c0_7 = arith.constant 0 : index
    %8 = vector.load %arg4[%c0_6, %c0_7] : memref<16x128xf32, #tpu.memory_space<vmem>>, vector<16x128xf32>
    tpu.vector_store %arg4[%c0_6, %c0_7], %7 {strides = array<i32>} : memref<16x128xf32, #tpu.memory_space<vmem>>, vector<16x128xf32>,
    return
  }
  func.func @transform_0(%arg0: i32) -> (i32, i32) {
    %c0_i32 = arith.constant 0 : i32
    %c0_i32_0 = arith.constant 0 : i32
    return %arg0, %c0_i32 : i32, i32
  }
  func.func @transform_1(%arg0: i32) -> (i32, i32) {
    %c0_i32 = arith.constant 0 : i32
    %c0_i32_0 = arith.constant 0 : i32
    %c0_i32_1 = arith.constant 0 : i32
    return %c0_i32, %c0_i32_0 : i32, i32
  }
  func.func @transform_2(%arg0: i32) -> (i32, i32) {
    %c0_i32 = arith.constant 0 : i32
    %c0_i32_0 = arith.constant 0 : i32
    %c0_i32_1 = arith.constant 0 : i32
    return %c0_i32, %c0_i32_0 : i32, i32
  }
  func.func @transform_3(%arg0: i32) -> (i32, i32) {
    %c0_i32 = arith.constant 0 : i32
    %c0_i32_0 = arith.constant 0 : i32
    return %arg0, %c0_i32 : i32, i32
  }
}

module attributes {stable_mosaic.version = 11 : i64} {
  func.func @_mm_bias_act_kernel(%arg0: i32, %arg1: memref<32x128xbf16, #tpu.memory_space<vmem>>, %arg2: memref<128x128xbf16, #tpu.memory_space<vmem>>, %arg3: memref<1x128xf32, #tpu.memory_space<vmem>>, %arg4: memref<32x128xf32, #tpu.memory_space<vmem>>) attributes {dimension_semantics = [#tpu.dimension_semantics<parallel>], iteration_bounds = array<i64: 1>, scalar_prefetch = 0 : i64, scratch_operands = 0 : i64, tpu.core_type = #tpu.core_type<tc>, window_params = [{transform_indices = @transform_0, window_bounds = array<i64: 32, 128>}, {pipeline_mode = #tpu.pipeline_mode<synchronous>, transform_indices = @transform_1, window_bounds = array<i64: 128, 128>}, {pipeline_mode = #tpu.pipeline_mode<synchronous>, transform_indices = @transform_2, window_bounds = array<i64: 1, 128>}, {transform_indices = @transform_3, window_bounds = array<i64: 32, 128>}]} {
    %c0 = arith.constant 0 : index
    %c0_0 = arith.constant 0 : index
    %0 = vector.load %arg1[%c0, %c0_0] : memref<32x128xbf16, #tpu.memory_space<vmem>>, vector<32x128xbf16>
    %c0_1 = arith.constant 0 : index
    %c0_2 = arith.constant 0 : index
    %1 = vector.load %arg2[%c0_1, %c0_2] : memref<128x128xbf16, #tpu.memory_space<vmem>>, vector<128x128xbf16>
    %cst = arith.constant dense<0.000000e+00> : vector<32x128xf32>
    %2 = tpu.matmul %0, %1, %cst {dimension_numbers = #tpu.dot_dimension_numbers<[1], [0], [0], [1], [0, 0, 1, 1], [], []>} : vector<32x128xbf16>, vector<128x128xbf16>, vector<32x128xf32> -> vector<32x128xf32>
    %c0_3 = arith.constant 0 : index
    %c0_4 = arith.constant 0 : index
    %3 = vector.load %arg3[%c0_3, %c0_4] : memref<1x128xf32, #tpu.memory_space<vmem>>, vector<1x128xf32>
    %4 = vector.broadcast %3 : vector<1x128xf32> to vector<32x128xf32>
    %5 = arith.addf %2, %4 : vector<32x128xf32>
    %cst_5 = arith.constant 0.000000e+00 : f32
    %6 = vector.broadcast %cst_5 : f32 to vector<32x128xf32>
    %7 = arith.maximumf %5, %6 : vector<32x128xf32>
    %c0_6 = arith.constant 0 : index
    %c0_7 = arith.constant 0 : index
    %8 = vector.load %arg4[%c0_6, %c0_7] : memref<32x128xf32, #tpu.memory_space<vmem>>, vector<32x128xf32>
    tpu.vector_store %arg4[%c0_6, %c0_7], %7 {strides = array<i32>} : memref<32x128xf32, #tpu.memory_space<vmem>>, vector<32x128xf32>,
    return
  }
  func.func @transform_0(%arg0: i32) -> (i32, i32) {
    %c0_i32 = arith.constant 0 : i32
    %c0_i32_0 = arith.constant 0 : i32
    return %arg0, %c0_i32 : i32, i32
  }
  func.func @transform_1(%arg0: i32) -> (i32, i32) {
    %c0_i32 = arith.constant 0 : i32
    %c0_i32_0 = arith.constant 0 : i32
    %c0_i32_1 = arith.constant 0 : i32
    return %c0_i32, %c0_i32_0 : i32, i32
  }
  func.func @transform_2(%arg0: i32) -> (i32, i32) {
    %c0_i32 = arith.constant 0 : i32
    %c0_i32_0 = arith.constant 0 : i32
    %c0_i32_1 = arith.constant 0 : i32
    return %c0_i32, %c0_i32_0 : i32, i32
  }
  func.func @transform_3(%arg0: i32) -> (i32, i32) {
    %c0_i32 = arith.constant 0 : i32
    %c0_i32_0 = arith.constant 0 : i32
    return %arg0, %c0_i32 : i32, i32
  }
}

module attributes {stable_mosaic.version = 11 : i64} {
  func.func @_mm_bias_act_kernel(%arg0: i32, %arg1: memref<32x256xbf16, #tpu.memory_space<vmem>>, %arg2: memref<256x128xbf16, #tpu.memory_space<vmem>>, %arg3: memref<1x128xf32, #tpu.memory_space<vmem>>, %arg4: memref<32x128xf32, #tpu.memory_space<vmem>>) attributes {dimension_semantics = [#tpu.dimension_semantics<parallel>], iteration_bounds = array<i64: 1>, scalar_prefetch = 0 : i64, scratch_operands = 0 : i64, tpu.core_type = #tpu.core_type<tc>, window_params = [{transform_indices = @transform_0, window_bounds = array<i64: 32, 256>}, {pipeline_mode = #tpu.pipeline_mode<synchronous>, transform_indices = @transform_1, window_bounds = array<i64: 256, 128>}, {pipeline_mode = #tpu.pipeline_mode<synchronous>, transform_indices = @transform_2, window_bounds = array<i64: 1, 128>}, {transform_indices = @transform_3, window_bounds = array<i64: 32, 128>}]} {
    %c0 = arith.constant 0 : index
    %c0_0 = arith.constant 0 : index
    %0 = vector.load %arg1[%c0, %c0_0] : memref<32x256xbf16, #tpu.memory_space<vmem>>, vector<32x256xbf16>
    %c0_1 = arith.constant 0 : index
    %c0_2 = arith.constant 0 : index
    %1 = vector.load %arg2[%c0_1, %c0_2] : memref<256x128xbf16, #tpu.memory_space<vmem>>, vector<256x128xbf16>
    %cst = arith.constant dense<0.000000e+00> : vector<32x128xf32>
    %2 = tpu.matmul %0, %1, %cst {dimension_numbers = #tpu.dot_dimension_numbers<[1], [0], [0], [1], [0, 0, 1, 1], [], []>} : vector<32x256xbf16>, vector<256x128xbf16>, vector<32x128xf32> -> vector<32x128xf32>
    %c0_3 = arith.constant 0 : index
    %c0_4 = arith.constant 0 : index
    %3 = vector.load %arg3[%c0_3, %c0_4] : memref<1x128xf32, #tpu.memory_space<vmem>>, vector<1x128xf32>
    %4 = vector.broadcast %3 : vector<1x128xf32> to vector<32x128xf32>
    %5 = arith.addf %2, %4 : vector<32x128xf32>
    %cst_5 = arith.constant 0.000000e+00 : f32
    %6 = vector.broadcast %cst_5 : f32 to vector<32x128xf32>
    %7 = arith.maximumf %5, %6 : vector<32x128xf32>
    %c0_6 = arith.constant 0 : index
    %c0_7 = arith.constant 0 : index
    %8 = vector.load %arg4[%c0_6, %c0_7] : memref<32x128xf32, #tpu.memory_space<vmem>>, vector<32x128xf32>
    tpu.vector_store %arg4[%c0_6, %c0_7], %7 {strides = array<i32>} : memref<32x128xf32, #tpu.memory_space<vmem>>, vector<32x128xf32>,
    return
  }
  func.func @transform_0(%arg0: i32) -> (i32, i32) {
    %c0_i32 = arith.constant 0 : i32
    %c0_i32_0 = arith.constant 0 : i32
    return %arg0, %c0_i32 : i32, i32
  }
  func.func @transform_1(%arg0: i32) -> (i32, i32) {
    %c0_i32 = arith.constant 0 : i32
    %c0_i32_0 = arith.constant 0 : i32
    %c0_i32_1 = arith.constant 0 : i32
    return %c0_i32, %c0_i32_0 : i32, i32
  }
  func.func @transform_2(%arg0: i32) -> (i32, i32) {
    %c0_i32 = arith.constant 0 : i32
    %c0_i32_0 = arith.constant 0 : i32
    %c0_i32_1 = arith.constant 0 : i32
    return %c0_i32, %c0_i32_0 : i32, i32
  }
  func.func @transform_3(%arg0: i32) -> (i32, i32) {
    %c0_i32 = arith.constant 0 : i32
    %c0_i32_0 = arith.constant 0 : i32
    return %arg0, %c0_i32 : i32, i32
  }
}

module attributes {stable_mosaic.version = 11 : i64} {
  func.func @_mm_bias_act_kernel(%arg0: i32, %arg1: memref<32x512xbf16, #tpu.memory_space<vmem>>, %arg2: memref<512x128xbf16, #tpu.memory_space<vmem>>, %arg3: memref<1x128xf32, #tpu.memory_space<vmem>>, %arg4: memref<32x128xf32, #tpu.memory_space<vmem>>) attributes {dimension_semantics = [#tpu.dimension_semantics<parallel>], iteration_bounds = array<i64: 1>, scalar_prefetch = 0 : i64, scratch_operands = 0 : i64, tpu.core_type = #tpu.core_type<tc>, window_params = [{transform_indices = @transform_0, window_bounds = array<i64: 32, 512>}, {pipeline_mode = #tpu.pipeline_mode<synchronous>, transform_indices = @transform_1, window_bounds = array<i64: 512, 128>}, {pipeline_mode = #tpu.pipeline_mode<synchronous>, transform_indices = @transform_2, window_bounds = array<i64: 1, 128>}, {transform_indices = @transform_3, window_bounds = array<i64: 32, 128>}]} {
    %c0 = arith.constant 0 : index
    %c0_0 = arith.constant 0 : index
    %0 = vector.load %arg1[%c0, %c0_0] : memref<32x512xbf16, #tpu.memory_space<vmem>>, vector<32x512xbf16>
    %c0_1 = arith.constant 0 : index
    %c0_2 = arith.constant 0 : index
    %1 = vector.load %arg2[%c0_1, %c0_2] : memref<512x128xbf16, #tpu.memory_space<vmem>>, vector<512x128xbf16>
    %cst = arith.constant dense<0.000000e+00> : vector<32x128xf32>
    %2 = tpu.matmul %0, %1, %cst {dimension_numbers = #tpu.dot_dimension_numbers<[1], [0], [0], [1], [0, 0, 1, 1], [], []>} : vector<32x512xbf16>, vector<512x128xbf16>, vector<32x128xf32> -> vector<32x128xf32>
    %c0_3 = arith.constant 0 : index
    %c0_4 = arith.constant 0 : index
    %3 = vector.load %arg3[%c0_3, %c0_4] : memref<1x128xf32, #tpu.memory_space<vmem>>, vector<1x128xf32>
    %4 = vector.broadcast %3 : vector<1x128xf32> to vector<32x128xf32>
    %5 = arith.addf %2, %4 : vector<32x128xf32>
    %cst_5 = arith.constant 0.000000e+00 : f32
    %6 = vector.broadcast %cst_5 : f32 to vector<32x128xf32>
    %7 = arith.maximumf %5, %6 : vector<32x128xf32>
    %c0_6 = arith.constant 0 : index
    %c0_7 = arith.constant 0 : index
    %8 = vector.load %arg4[%c0_6, %c0_7] : memref<32x128xf32, #tpu.memory_space<vmem>>, vector<32x128xf32>
    tpu.vector_store %arg4[%c0_6, %c0_7], %7 {strides = array<i32>} : memref<32x128xf32, #tpu.memory_space<vmem>>, vector<32x128xf32>,
    return
  }
  func.func @transform_0(%arg0: i32) -> (i32, i32) {
    %c0_i32 = arith.constant 0 : i32
    %c0_i32_0 = arith.constant 0 : i32
    return %arg0, %c0_i32 : i32, i32
  }
  func.func @transform_1(%arg0: i32) -> (i32, i32) {
    %c0_i32 = arith.constant 0 : i32
    %c0_i32_0 = arith.constant 0 : i32
    %c0_i32_1 = arith.constant 0 : i32
    return %c0_i32, %c0_i32_0 : i32, i32
  }
  func.func @transform_2(%arg0: i32) -> (i32, i32) {
    %c0_i32 = arith.constant 0 : i32
    %c0_i32_0 = arith.constant 0 : i32
    %c0_i32_1 = arith.constant 0 : i32
    return %c0_i32, %c0_i32_0 : i32, i32
  }
  func.func @transform_3(%arg0: i32) -> (i32, i32) {
    %c0_i32 = arith.constant 0 : i32
    %c0_i32_0 = arith.constant 0 : i32
    return %arg0, %c0_i32 : i32, i32
  }
}

module attributes {stable_mosaic.version = 11 : i64} {
  func.func @_mm_bias_act_kernel(%arg0: i32, %arg1: memref<128x128xbf16, #tpu.memory_space<vmem>>, %arg2: memref<128x128xbf16, #tpu.memory_space<vmem>>, %arg3: memref<1x128xf32, #tpu.memory_space<vmem>>, %arg4: memref<128x128xf32, #tpu.memory_space<vmem>>) attributes {dimension_semantics = [#tpu.dimension_semantics<parallel>], iteration_bounds = array<i64: 1>, scalar_prefetch = 0 : i64, scratch_operands = 0 : i64, tpu.core_type = #tpu.core_type<tc>, window_params = [{transform_indices = @transform_0, window_bounds = array<i64: 128, 128>}, {pipeline_mode = #tpu.pipeline_mode<synchronous>, transform_indices = @transform_1, window_bounds = array<i64: 128, 128>}, {pipeline_mode = #tpu.pipeline_mode<synchronous>, transform_indices = @transform_2, window_bounds = array<i64: 1, 128>}, {transform_indices = @transform_3, window_bounds = array<i64: 128, 128>}]} {
    %c0 = arith.constant 0 : index
    %c0_0 = arith.constant 0 : index
    %0 = vector.load %arg1[%c0, %c0_0] : memref<128x128xbf16, #tpu.memory_space<vmem>>, vector<128x128xbf16>
    %c0_1 = arith.constant 0 : index
    %c0_2 = arith.constant 0 : index
    %1 = vector.load %arg2[%c0_1, %c0_2] : memref<128x128xbf16, #tpu.memory_space<vmem>>, vector<128x128xbf16>
    %cst = arith.constant dense<0.000000e+00> : vector<128x128xf32>
    %2 = tpu.matmul %0, %1, %cst {dimension_numbers = #tpu.dot_dimension_numbers<[1], [0], [0], [1], [0, 0, 1, 1], [], []>} : vector<128x128xbf16>, vector<128x128xbf16>, vector<128x128xf32> -> vector<128x128xf32>
    %c0_3 = arith.constant 0 : index
    %c0_4 = arith.constant 0 : index
    %3 = vector.load %arg3[%c0_3, %c0_4] : memref<1x128xf32, #tpu.memory_space<vmem>>, vector<1x128xf32>
    %4 = vector.broadcast %3 : vector<1x128xf32> to vector<128x128xf32>
    %5 = arith.addf %2, %4 : vector<128x128xf32>
    %6 = arith.negf %5 : vector<128x128xf32>
    %7 = math.exp %6 : vector<128x128xf32>
    %cst_5 = arith.constant 1.000000e+00 : f32
    %8 = vector.broadcast %cst_5 : f32 to vector<128x128xf32>
    %9 = arith.addf %8, %7 : vector<128x128xf32>
    %10 = arith.divf %8, %9 : vector<128x128xf32>
    %c0_6 = arith.constant 0 : index
    %c0_7 = arith.constant 0 : index
    %11 = vector.load %arg4[%c0_6, %c0_7] : memref<128x128xf32, #tpu.memory_space<vmem>>, vector<128x128xf32>
    tpu.vector_store %arg4[%c0_6, %c0_7], %10 {strides = array<i32>} : memref<128x128xf32, #tpu.memory_space<vmem>>, vector<128x128xf32>,
    return
  }
  func.func @transform_0(%arg0: i32) -> (i32, i32) {
    %c0_i32 = arith.constant 0 : i32
    %c0_i32_0 = arith.constant 0 : i32
    return %arg0, %c0_i32 : i32, i32
  }
  func.func @transform_1(%arg0: i32) -> (i32, i32) {
    %c0_i32 = arith.constant 0 : i32
    %c0_i32_0 = arith.constant 0 : i32
    %c0_i32_1 = arith.constant 0 : i32
    return %c0_i32, %c0_i32_0 : i32, i32
  }
  func.func @transform_2(%arg0: i32) -> (i32, i32) {
    %c0_i32 = arith.constant 0 : i32
    %c0_i32_0 = arith.constant 0 : i32
    %c0_i32_1 = arith.constant 0 : i32
    return %c0_i32, %c0_i32_0 : i32, i32
  }
  func.func @transform_3(%arg0: i32) -> (i32, i32) {
    %c0_i32 = arith.constant 0 : i32
    %c0_i32_0 = arith.constant 0 : i32
    return %arg0, %c0_i32 : i32, i32
  }
}

module attributes {stable_mosaic.version = 11 : i64} {
  func.func @_mm_bias_act_kernel(%arg0: i32, %arg1: memref<128x64xbf16, #tpu.memory_space<vmem>>, %arg2: memref<64x128xbf16, #tpu.memory_space<vmem>>, %arg3: memref<1x128xf32, #tpu.memory_space<vmem>>, %arg4: memref<128x128xf32, #tpu.memory_space<vmem>>) attributes {dimension_semantics = [#tpu.dimension_semantics<parallel>], iteration_bounds = array<i64: 1>, scalar_prefetch = 0 : i64, scratch_operands = 0 : i64, tpu.core_type = #tpu.core_type<tc>, window_params = [{transform_indices = @transform_0, window_bounds = array<i64: 128, 64>}, {pipeline_mode = #tpu.pipeline_mode<synchronous>, transform_indices = @transform_1, window_bounds = array<i64: 64, 128>}, {pipeline_mode = #tpu.pipeline_mode<synchronous>, transform_indices = @transform_2, window_bounds = array<i64: 1, 128>}, {transform_indices = @transform_3, window_bounds = array<i64: 128, 128>}]} {
    %c0 = arith.constant 0 : index
    %c0_0 = arith.constant 0 : index
    %0 = vector.load %arg1[%c0, %c0_0] : memref<128x64xbf16, #tpu.memory_space<vmem>>, vector<128x64xbf16>
    %c0_1 = arith.constant 0 : index
    %c0_2 = arith.constant 0 : index
    %1 = vector.load %arg2[%c0_1, %c0_2] : memref<64x128xbf16, #tpu.memory_space<vmem>>, vector<64x128xbf16>
    %cst = arith.constant dense<0.000000e+00> : vector<128x128xf32>
    %2 = tpu.matmul %0, %1, %cst {dimension_numbers = #tpu.dot_dimension_numbers<[1], [0], [0], [1], [0, 0, 1, 1], [], []>} : vector<128x64xbf16>, vector<64x128xbf16>, vector<128x128xf32> -> vector<128x128xf32>
    %c0_3 = arith.constant 0 : index
    %c0_4 = arith.constant 0 : index
    %3 = vector.load %arg3[%c0_3, %c0_4] : memref<1x128xf32, #tpu.memory_space<vmem>>, vector<1x128xf32>
    %4 = vector.broadcast %3 : vector<1x128xf32> to vector<128x128xf32>
    %5 = arith.addf %2, %4 : vector<128x128xf32>
    %6 = arith.negf %5 : vector<128x128xf32>
    %7 = math.exp %6 : vector<128x128xf32>
    %cst_5 = arith.constant 1.000000e+00 : f32
    %8 = vector.broadcast %cst_5 : f32 to vector<128x128xf32>
    %9 = arith.addf %8, %7 : vector<128x128xf32>
    %10 = arith.divf %8, %9 : vector<128x128xf32>
    %c0_6 = arith.constant 0 : index
    %c0_7 = arith.constant 0 : index
    %11 = vector.load %arg4[%c0_6, %c0_7] : memref<128x128xf32, #tpu.memory_space<vmem>>, vector<128x128xf32>
    tpu.vector_store %arg4[%c0_6, %c0_7], %10 {strides = array<i32>} : memref<128x128xf32, #tpu.memory_space<vmem>>, vector<128x128xf32>,
    return
  }
  func.func @transform_0(%arg0: i32) -> (i32, i32) {
    %c0_i32 = arith.constant 0 : i32
    %c0_i32_0 = arith.constant 0 : i32
    return %arg0, %c0_i32 : i32, i32
  }
  func.func @transform_1(%arg0: i32) -> (i32, i32) {
    %c0_i32 = arith.constant 0 : i32
    %c0_i32_0 = arith.constant 0 : i32
    %c0_i32_1 = arith.constant 0 : i32
    return %c0_i32, %c0_i32_0 : i32, i32
  }
  func.func @transform_2(%arg0: i32) -> (i32, i32) {
    %c0_i32 = arith.constant 0 : i32
    %c0_i32_0 = arith.constant 0 : i32
    %c0_i32_1 = arith.constant 0 : i32
    return %c0_i32, %c0_i32_0 : i32, i32
  }
  func.func @transform_3(%arg0: i32) -> (i32, i32) {
    %c0_i32 = arith.constant 0 : i32
    %c0_i32_0 = arith.constant 0 : i32
    return %arg0, %c0_i32 : i32, i32
  }
}

module attributes {stable_mosaic.version = 11 : i64} {
  func.func @_mm_bias_act_kernel(%arg0: i32, %arg1: memref<128x256xbf16, #tpu.memory_space<vmem>>, %arg2: memref<256x128xbf16, #tpu.memory_space<vmem>>, %arg3: memref<1x128xf32, #tpu.memory_space<vmem>>, %arg4: memref<128x128xf32, #tpu.memory_space<vmem>>) attributes {dimension_semantics = [#tpu.dimension_semantics<parallel>], iteration_bounds = array<i64: 1>, scalar_prefetch = 0 : i64, scratch_operands = 0 : i64, tpu.core_type = #tpu.core_type<tc>, window_params = [{transform_indices = @transform_0, window_bounds = array<i64: 128, 256>}, {pipeline_mode = #tpu.pipeline_mode<synchronous>, transform_indices = @transform_1, window_bounds = array<i64: 256, 128>}, {pipeline_mode = #tpu.pipeline_mode<synchronous>, transform_indices = @transform_2, window_bounds = array<i64: 1, 128>}, {transform_indices = @transform_3, window_bounds = array<i64: 128, 128>}]} {
    %c0 = arith.constant 0 : index
    %c0_0 = arith.constant 0 : index
    %0 = vector.load %arg1[%c0, %c0_0] : memref<128x256xbf16, #tpu.memory_space<vmem>>, vector<128x256xbf16>
    %c0_1 = arith.constant 0 : index
    %c0_2 = arith.constant 0 : index
    %1 = vector.load %arg2[%c0_1, %c0_2] : memref<256x128xbf16, #tpu.memory_space<vmem>>, vector<256x128xbf16>
    %cst = arith.constant dense<0.000000e+00> : vector<128x128xf32>
    %2 = tpu.matmul %0, %1, %cst {dimension_numbers = #tpu.dot_dimension_numbers<[1], [0], [0], [1], [0, 0, 1, 1], [], []>} : vector<128x256xbf16>, vector<256x128xbf16>, vector<128x128xf32> -> vector<128x128xf32>
    %c0_3 = arith.constant 0 : index
    %c0_4 = arith.constant 0 : index
    %3 = vector.load %arg3[%c0_3, %c0_4] : memref<1x128xf32, #tpu.memory_space<vmem>>, vector<1x128xf32>
    %4 = vector.broadcast %3 : vector<1x128xf32> to vector<128x128xf32>
    %5 = arith.addf %2, %4 : vector<128x128xf32>
    %6 = arith.negf %5 : vector<128x128xf32>
    %7 = math.exp %6 : vector<128x128xf32>
    %cst_5 = arith.constant 1.000000e+00 : f32
    %8 = vector.broadcast %cst_5 : f32 to vector<128x128xf32>
    %9 = arith.addf %8, %7 : vector<128x128xf32>
    %10 = arith.divf %8, %9 : vector<128x128xf32>
    %c0_6 = arith.constant 0 : index
    %c0_7 = arith.constant 0 : index
    %11 = vector.load %arg4[%c0_6, %c0_7] : memref<128x128xf32, #tpu.memory_space<vmem>>, vector<128x128xf32>
    tpu.vector_store %arg4[%c0_6, %c0_7], %10 {strides = array<i32>} : memref<128x128xf32, #tpu.memory_space<vmem>>, vector<128x128xf32>,
    return
  }
  func.func @transform_0(%arg0: i32) -> (i32, i32) {
    %c0_i32 = arith.constant 0 : i32
    %c0_i32_0 = arith.constant 0 : i32
    return %arg0, %c0_i32 : i32, i32
  }
  func.func @transform_1(%arg0: i32) -> (i32, i32) {
    %c0_i32 = arith.constant 0 : i32
    %c0_i32_0 = arith.constant 0 : i32
    %c0_i32_1 = arith.constant 0 : i32
    return %c0_i32, %c0_i32_0 : i32, i32
  }
  func.func @transform_2(%arg0: i32) -> (i32, i32) {
    %c0_i32 = arith.constant 0 : i32
    %c0_i32_0 = arith.constant 0 : i32
    %c0_i32_1 = arith.constant 0 : i32
    return %c0_i32, %c0_i32_0 : i32, i32
  }
  func.func @transform_3(%arg0: i32) -> (i32, i32) {
    %c0_i32 = arith.constant 0 : i32
    %c0_i32_0 = arith.constant 0 : i32
    return %arg0, %c0_i32 : i32, i32
  }
}

</mosaic_0001>

<bundles_post_ra>
// kernel: simple_conv_forward.16
= control target key start
LH: loop header
LB: loop body
LE: loop exit
PB: predicated region body
PF: predicated region fallthrough
CT: control target
= control target key end

     0   :  { %s571_s9 = smov 0   ;;  %s730_s0 = inlined_call_operand.vmem [shape: f32[2,16,16,3], index: 0, kind: input, shape index: {}]   ;;  %s731_s1 = inlined_call_operand.vmem [shape: f32[2,16,16,1], index: 1, kind: input, shape index: {}]   ;;  %s732_s2 = inlined_call_operand.vmem [shape: f32[2,16,16,3], index: 2, kind: output, shape index: {}]  }
   0x1 LB: > { %s520_s10 = sadd.s32 4294967295, %s553_s9   ;;  %p524_p0 = scmp.ge.s32.totalorder %s553_s9, 1  ;;  %s553_s9 = sphi %s571_s9, %s12_s9  }
   0x2   : > { %p122_p1 = scmp.lt.s32.totalorder %s553_s9, 3 }
   0x4   : > { %p123_p2 = pnand %p524_p0, %p122_p1 }
   0x5   : > { %p149_p3 = scmp.lt.s32.totalorder (!%p123_p2), %s520_s10, 1 }
   0x6   : > { %126 = sbr.rel (%p123_p2) target bundleno = 202 (0xca), region = 28 }
   0xb   : > { %v555_v0 = vmov 0   ;;  %s734_s10 = smov (!%p149_p3, %s520_s10), 1  ;;  %vm420_vm0 = vcmask 23552  }
   0xc   : > { %546 = vset.pattern.permute.xlu1 %v555_v0  ;;  %545 = vset.pattern.permute.xlu0 %v555_v0  ;;  %s579_s11 = sshll.u32 %s734_s10, 8 }
   0xd   : > { %s585_s14 = scalar_lea.vmem %s731_s1, %s579_s11  ;;  %s623_s17 = scalar_lea.vmem %s730_s0, %s579_s11 }
   0xe   : > { %v198_v1 = vld [vmem:[%s585_s14 + $0x10] sm:$0xff]  ;;  %v196_v2 = vld [vmem:[%s585_s14] sm:$0xff]  ;;  %v199_v3 = vld [vmem:[%s585_s14 + $0x18] sm:$0xff]  ;;  %s631_s20 = scalar_lea.vmem %s732_s2, %s579_s11 }
   0xf   : > { %240 = vperm.xlu1 %546, %v198_v1   ;;  %230 = vperm.xlu0 %545, %v196_v2   ;;  %v197_v4 = vld [vmem:[%s585_s14 + $0x8] sm:$0xff]  ;;  %v200_v6 = vld [vmem:[%s585_s14 + $0x20] sm:$0xff]  ;;  %v203_v7 = vld [vmem:[%s585_s14 + $0x38] sm:$0xff] }
  0x10   : > { %v201_v5 = vld [vmem:[%s585_s14 + $0x28] sm:$0xff]  ;;  %v202_v8 = vld [vmem:[%s585_s14 + $0x30] sm:$0xff]  ;;  %v204_v10 = vld [vmem:[%s585_s14 + $0x40] sm:$0xff] }
  0x11   : > { %v205_v9 = vld [vmem:[%s585_s14 + $0x48] sm:$0xff]  ;;  %v207_v11 = vld [vmem:[%s585_s14 + $0x58] sm:$0xff]  ;;  %v206_v12 = vld [vmem:[%s585_s14 + $0x50] sm:$0xff] }
  0x12   : > { %v209_v13 = vld [vmem:[%s585_s14 + $0x68] sm:$0xff]  ;;  %v208_v14 = vld [vmem:[%s585_s14 + $0x60] sm:$0xff]  ;;  %v211_v15 = vld [vmem:[%s585_s14 + $0x78] sm:$0xff] }
  0x13   : > { %245 = vperm.xlu1 %546, %v199_v3   ;;  %235 = vperm.xlu0 %545, %v197_v4   ;;  %v210_v16 = vld [vmem:[%s585_s14 + $0x70] sm:$0xff]  ;;  %v213_v17 = vld [vmem:[%s585_s14 + $0x88] sm:$0xff]  ;;  %v212_v18 = vld [vmem:[%s585_s14 + $0x80] sm:$0xff] }
  0x14   : > { %v215_v19 = vld [vmem:[%s585_s14 + $0x98] sm:$0xff]  ;;  %v214_v20 = vld [vmem:[%s585_s14 + $0x90] sm:$0xff]  ;;  %v217_v21 = vld [vmem:[%s585_s14 + $0xa8] sm:$0xff] }
  0x15   : > { %v216_v22 = vld [vmem:[%s585_s14 + $0xa0] sm:$0xff]  ;;  %v219_v23 = vld [vmem:[%s585_s14 + $0xb8] sm:$0xff]  ;;  %v218_v24 = vld [vmem:[%s585_s14 + $0xb0] sm:$0xff] }
  0x16   : > { %v221_v25 = vld [vmem:[%s585_s14 + $0xc8] sm:$0xff]  ;;  %v220_v26 = vld [vmem:[%s585_s14 + $0xc0] sm:$0xff]  ;;  %v223_v27 = vld [vmem:[%s585_s14 + $0xd8] sm:$0xff] }
  0x17   : > { %255 = vperm.xlu1 %546, %v201_v5   ;;  %250 = vperm.xlu0 %545, %v200_v6   ;;  %v222_v28 = vld [vmem:[%s585_s14 + $0xd0] sm:$0xff]  ;;  %v225_v29 = vld [vmem:[%s585_s14 + $0xe8] sm:$0xff]  ;;  %v224_v30 = vld [vmem:[%s585_s14 + $0xe0] sm:$0xff] }
  0x18   : > { %v227_v31 = vld [vmem:[%s585_s14 + $0xf8] sm:$0xff]  ;;  %v226_v32 = vld [vmem:[%s585_s14 + $0xf0] sm:$0xff]  ;;  %v164_v34 = vld [vmem:[%s623_s17] sm:$0xff] }
  0x19   : > { %v166_v33 = vld [vmem:[%s623_s17 + $0x10] sm:$0xff]  ;;  %v167_v39 = vld [vmem:[%s623_s17 + $0x18] sm:$0xff]  ;;  %v165_v40 = vld [vmem:[%s623_s17 + $0x8] sm:$0xff] }
  0x1a   : > { %v169_v45 = vld [vmem:[%s623_s17 + $0x28] sm:$0xff]  ;;  %v168_v46 = vld [vmem:[%s623_s17 + $0x20] sm:$0xff]  ;;  %v171_v51 = vld [vmem:[%s623_s17 + $0x38] sm:$0xff] }
  0x1b   : > { %265 = vperm.xlu1 %546, %v203_v7   ;;  %260 = vperm.xlu0 %545, %v202_v8   ;;  %v170_v52 = vld [vmem:[%s623_s17 + $0x30] sm:$0xff]  ;;  %v173_v57 = vld [vmem:[%s623_s17 + $0x48] sm:$0xff]  ;;  %v172_v58 = vld [vmem:[%s623_s17 + $0x40] sm:$0xff] }
  0x1c   : > { %v175_v63 = vld [vmem:[%s623_s17 + $0x58] sm:$0xff]  ;;  %v174_v0 = vld [vmem:[%s623_s17 + $0x50] sm:$0xff]  ;;  %v177_v5 = vld [vmem:[%s623_s17 + $0x68] sm:$0xff] }
  0x1d   : > { %v176_v6 = vld [vmem:[%s623_s17 + $0x60] sm:$0xff] }
  0x1f   : > { %275 = vperm.xlu1 %546, %v205_v9   ;;  %270 = vperm.xlu0 %545, %v204_v10  }
  0x23   : > { %285 = vperm.xlu1 %546, %v207_v11   ;;  %280 = vperm.xlu0 %545, %v206_v12   ;;  %v179_v11 = vld [vmem:[%s623_s17 + $0x78] sm:$0xff]  ;;  %v178_v12 = vld [vmem:[%s623_s17 + $0x70] sm:$0xff] }
  0x27   : > { %295 = vperm.xlu1 %546, %v209_v13   ;;  %290 = vperm.xlu0 %545, %v208_v14  }
  0x2b   : > { %305 = vperm.xlu1 %546, %v211_v15   ;;  %300 = vperm.xlu0 %545, %v210_v16  }
  0x2f   : > { %315 = vperm.xlu1 %546, %v213_v17   ;;  %310 = vperm.xlu0 %545, %v212_v18   ;;  %v181_v17 = vld [vmem:[%s623_s17 + $0x88] sm:$0xff]  ;;  %v180_v18 = vld [vmem:[%s623_s17 + $0x80] sm:$0xff] }
  0x33   : > { %325 = vperm.xlu1 %546, %v215_v19   ;;  %320 = vperm.xlu0 %545, %v214_v20  }
  0x37   : > { %335 = vperm.xlu1 %546, %v217_v21   ;;  %330 = vperm.xlu0 %545, %v216_v22  }
  0x3b   : > { %345 = vperm.xlu1 %546, %v219_v23   ;;  %340 = vperm.xlu0 %545, %v218_v24   ;;  %v183_v23 = vld [vmem:[%s623_s17 + $0x98] sm:$0xff]  ;;  %v182_v24 = vld [vmem:[%s623_s17 + $0x90] sm:$0xff] }
  0x3f   : > { %355 = vperm.xlu1 %546, %v221_v25   ;;  %350 = vperm.xlu0 %545, %v220_v26  }
  0x43   : > { %365 = vperm.xlu1 %546, %v223_v27   ;;  %360 = vperm.xlu0 %545, %v222_v28  }
  0x47   : > { %375 = vperm.xlu1 %546, %v225_v29   ;;  %370 = vperm.xlu0 %545, %v224_v30   ;;  %v185_v29 = vld [vmem:[%s623_s17 + $0xa8] sm:$0xff]  ;;  %v184_v30 = vld [vmem:[%s623_s17 + $0xa0] sm:$0xff] }
  0x4b   : > { %385 = vperm.xlu1 %546, %v227_v31   ;;  %380 = vperm.xlu0 %545, %v226_v32  }
  0x8a   : > { %v241_v35 = vpop.permute.xlu1 %240  ;;  %v231_v36 = vpop.permute.xlu0 %230 }
  0x8b   : > { %v390_v37 = vmul.f32 %v241_v35, %v166_v33  ;;  %v388_v38 = vmul.f32 %v231_v36, %v164_v34  ;;  %v187_v35 = vld [vmem:[%s623_s17 + $0xb8] sm:$0xff]  ;;  %v186_v36 = vld [vmem:[%s623_s17 + $0xb0] sm:$0xff] }
  0x8d   : > { %423 = vst.msk [vmem:[%s631_s20 + $0x10] sm:$0xff] %vm420_vm0, %v390_v37  ;;  %421 = vst.msk [vmem:[%s631_s20] sm:$0xff] %vm420_vm0, %v388_v38 }
  0x8e   : > { %v246_v41 = vpop.permute.xlu1 %245  ;;  %v236_v42 = vpop.permute.xlu0 %235 }
  0x8f   : > { %v391_v43 = vmul.f32 %v246_v41, %v167_v39  ;;  %v389_v44 = vmul.f32 %v236_v42, %v165_v40  ;;  %v189_v41 = vld [vmem:[%s623_s17 + $0xc8] sm:$0xff]  ;;  %v188_v42 = vld [vmem:[%s623_s17 + $0xc0] sm:$0xff] }
  0x91   : > { %424 = vst.msk [vmem:[%s631_s20 + $0x18] sm:$0xff] %vm420_vm0, %v391_v43  ;;  %422 = vst.msk [vmem:[%s631_s20 + $0x8] sm:$0xff] %vm420_vm0, %v389_v44 }
  0x92   : > { %v256_v47 = vpop.permute.xlu1 %255  ;;  %v251_v48 = vpop.permute.xlu0 %250 }
  0x93   : > { %v393_v49 = vmul.f32 %v256_v47, %v169_v45  ;;  %v392_v50 = vmul.f32 %v251_v48, %v168_v46  ;;  %v191_v47 = vld [vmem:[%s623_s17 + $0xd8] sm:$0xff]  ;;  %v190_v48 = vld [vmem:[%s623_s17 + $0xd0] sm:$0xff] }
  0x95   : > { %426 = vst.msk [vmem:[%s631_s20 + $0x28] sm:$0xff] %vm420_vm0, %v393_v49  ;;  %425 = vst.msk [vmem:[%s631_s20 + $0x20] sm:$0xff] %vm420_vm0, %v392_v50 }
  0x96   : > { %v266_v53 = vpop.permute.xlu1 %265  ;;  %v261_v54 = vpop.permute.xlu0 %260 }
  0x97   : > { %v395_v55 = vmul.f32 %v266_v53, %v171_v51  ;;  %v394_v56 = vmul.f32 %v261_v54, %v170_v52  ;;  %v193_v53 = vld [vmem:[%s623_s17 + $0xe8] sm:$0xff]  ;;  %v192_v54 = vld [vmem:[%s623_s17 + $0xe0] sm:$0xff] }
  0x99   : > { %428 = vst.msk [vmem:[%s631_s20 + $0x38] sm:$0xff] %vm420_vm0, %v395_v55  ;;  %427 = vst.msk [vmem:[%s631_s20 + $0x30] sm:$0xff] %vm420_vm0, %v394_v56 }
  0x9a   : > { %v276_v59 = vpop.permute.xlu1 %275  ;;  %v271_v60 = vpop.permute.xlu0 %270 }
  0x9b   : > { %v397_v61 = vmul.f32 %v276_v59, %v173_v57  ;;  %v396_v62 = vmul.f32 %v271_v60, %v172_v58  ;;  %v195_v59 = vld [vmem:[%s623_s17 + $0xf8] sm:$0xff]  ;;  %v194_v60 = vld [vmem:[%s623_s17 + $0xf0] sm:$0xff] }
  0x9d   : > { %430 = vst.msk [vmem:[%s631_s20 + $0x48] sm:$0xff] %vm420_vm0, %v397_v61  ;;  %429 = vst.msk [vmem:[%s631_s20 + $0x40] sm:$0xff] %vm420_vm0, %v396_v62 }
  0x9e   : > { %v286_v1 = vpop.permute.xlu1 %285  ;;  %v281_v2 = vpop.permute.xlu0 %280 }
  0x9f   : > { %v399_v3 = vmul.f32 %v286_v1, %v175_v63  ;;  %v398_v4 = vmul.f32 %v281_v2, %v174_v0 }
  0xa1   : > { %432 = vst.msk [vmem:[%s631_s20 + $0x58] sm:$0xff] %vm420_vm0, %v399_v3  ;;  %431 = vst.msk [vmem:[%s631_s20 + $0x50] sm:$0xff] %vm420_vm0, %v398_v4 }
  0xa2   : > { %v296_v7 = vpop.permute.xlu1 %295  ;;  %v291_v8 = vpop.permute.xlu0 %290 }
  0xa3   : > { %v401_v9 = vmul.f32 %v296_v7, %v177_v5  ;;  %v400_v10 = vmul.f32 %v291_v8, %v176_v6 }
  0xa5   : > { %434 = vst.msk [vmem:[%s631_s20 + $0x68] sm:$0xff] %vm420_vm0, %v401_v9  ;;  %433 = vst.msk [vmem:[%s631_s20 + $0x60] sm:$0xff] %vm420_vm0, %v400_v10 }
  0xa6   : > { %v306_v13 = vpop.permute.xlu1 %305  ;;  %v301_v14 = vpop.permute.xlu0 %300 }
  0xa7   : > { %v403_v15 = vmul.f32 %v306_v13, %v179_v11  ;;  %v402_v16 = vmul.f32 %v301_v14, %v178_v12 }
  0xa9   : > { %436 = vst.msk [vmem:[%s631_s20 + $0x78] sm:$0xff] %vm420_vm0, %v403_v15  ;;  %435 = vst.msk [vmem:[%s631_s20 + $0x70] sm:$0xff] %vm420_vm0, %v402_v16 }
  0xaa   : > { %v316_v19 = vpop.permute.xlu1 %315  ;;  %v311_v20 = vpop.permute.xlu0 %310 }
  0xab   : > { %v405_v21 = vmul.f32 %v316_v19, %v181_v17  ;;  %v404_v22 = vmul.f32 %v311_v20, %v180_v18 }
  0xad   : > { %438 = vst.msk [vmem:[%s631_s20 + $0x88] sm:$0xff] %vm420_vm0, %v405_v21  ;;  %437 = vst.msk [vmem:[%s631_s20 + $0x80] sm:$0xff] %vm420_vm0, %v404_v22 }
  0xae   : > { %v326_v25 = vpop.permute.xlu1 %325  ;;  %v321_v26 = vpop.permute.xlu0 %320 }
  0xaf   : > { %v407_v27 = vmul.f32 %v326_v25, %v183_v23  ;;  %v406_v28 = vmul.f32 %v321_v26, %v182_v24 }
  0xb1   : > { %440 = vst.msk [vmem:[%s631_s20 + $0x98] sm:$0xff] %vm420_vm0, %v407_v27  ;;  %439 = vst.msk [vmem:[%s631_s20 + $0x90] sm:$0xff] %vm420_vm0, %v406_v28 }
  0xb2   : > { %v336_v31 = vpop.permute.xlu1 %335  ;;  %v331_v32 = vpop.permute.xlu0 %330 }
  0xb3   : > { %v409_v33 = vmul.f32 %v336_v31, %v185_v29  ;;  %v408_v34 = vmul.f32 %v331_v32, %v184_v30 }
  0xb5   : > { %442 = vst.msk [vmem:[%s631_s20 + $0xa8] sm:$0xff] %vm420_vm0, %v409_v33  ;;  %441 = vst.msk [vmem:[%s631_s20 + $0xa0] sm:$0xff] %vm420_vm0, %v408_v34 }
  0xb6   : > { %v346_v37 = vpop.permute.xlu1 %345  ;;  %v341_v38 = vpop.permute.xlu0 %340 }
  0xb7   : > { %v411_v39 = vmul.f32 %v346_v37, %v187_v35  ;;  %v410_v40 = vmul.f32 %v341_v38, %v186_v36 }
  0xb9   : > { %444 = vst.msk [vmem:[%s631_s20 + $0xb8] sm:$0xff] %vm420_vm0, %v411_v39  ;;  %443 = vst.msk [vmem:[%s631_s20 + $0xb0] sm:$0xff] %vm420_vm0, %v410_v40 }
  0xba   : > { %v356_v43 = vpop.permute.xlu1 %355  ;;  %v351_v44 = vpop.permute.xlu0 %350 }
  0xbb   : > { %v413_v45 = vmul.f32 %v356_v43, %v189_v41  ;;  %v412_v46 = vmul.f32 %v351_v44, %v188_v42 }
  0xbd   : > { %446 = vst.msk [vmem:[%s631_s20 + $0xc8] sm:$0xff] %vm420_vm0, %v413_v45  ;;  %445 = vst.msk [vmem:[%s631_s20 + $0xc0] sm:$0xff] %vm420_vm0, %v412_v46 }
  0xbe   : > { %v366_v49 = vpop.permute.xlu1 %365  ;;  %v361_v50 = vpop.permute.xlu0 %360 }
  0xbf   : > { %v415_v51 = vmul.f32 %v366_v49, %v191_v47  ;;  %v414_v52 = vmul.f32 %v361_v50, %v190_v48 }
  0xc1   : > { %448 = vst.msk [vmem:[%s631_s20 + $0xd8] sm:$0xff] %vm420_vm0, %v415_v51  ;;  %447 = vst.msk [vmem:[%s631_s20 + $0xd0] sm:$0xff] %vm420_vm0, %v414_v52 }
  0xc2   : > { %v376_v55 = vpop.permute.xlu1 %375  ;;  %v371_v56 = vpop.permute.xlu0 %370 }
  0xc3   : > { %v417_v57 = vmul.f32 %v376_v55, %v193_v53  ;;  %v416_v58 = vmul.f32 %v371_v56, %v192_v54 }
  0xc5   : > { %450 = vst.msk [vmem:[%s631_s20 + $0xe8] sm:$0xff] %vm420_vm0, %v417_v57  ;;  %449 = vst.msk [vmem:[%s631_s20 + $0xe0] sm:$0xff] %vm420_vm0, %v416_v58 }
  0xc6   : > { %v386_v61 = vpop.permute.xlu1 %385  ;;  %v381_v62 = vpop.permute.xlu0 %380 }
  0xc7   : > { %v419_v63 = vmul.f32 %v386_v61, %v195_v59  ;;  %v418_v0 = vmul.f32 %v381_v62, %v194_v60 }
  0xc9   : > { %452 = vst.msk [vmem:[%s631_s20 + $0xf8] sm:$0xff] %vm420_vm0, %v419_v63  ;;  %451 = vst.msk [vmem:[%s631_s20 + $0xf0] sm:$0xff] %vm420_vm0, %v418_v0 }
  0xca PF: > { %s12_s9 = sadd.s32 1, %s553_s9  }
  0xcb   : > { %p9_p4 = scmp.ge.s32.totalorder %s12_s9, 4  }
  0xcd   :  { %11 = sbr.rel (!%p9_p4) target bundleno = 1 (0x1), region = 61 }

// kernel: simple_conv_forward.17
= control target key start
LH: loop header
LB: loop body
LE: loop exit
PB: predicated region body
PF: predicated region fallthrough
CT: control target
= control target key end

     0   :  { %vm94_vm0 = vcmask 261120   ;;  %s424_s1 = inlined_call_operand.vmem [shape: bf16[32,128], index: 1, kind: input, shape index: {}]   ;;  %s425_s0 = inlined_call_operand.vmem [shape: bf16[128,32], index: 0, kind: input, shape index: {}]   ;;  %s426_s2 = inlined_call_operand.vmem [shape: f32[1,128], index: 2, kind: input, shape index: {}]   ;;  %s427_s3 = inlined_call_operand.vmem [shape: f32[128,128], index: 3, kind: output, shape index: {}]  }
   0x1   :  { %v305_v0 = vld [vmem:[%s424_s1 + $0x8] sm:$0xff]   ;;  %v306_v1 = vld [vmem:[%s424_s1] sm:$0xff]   ;;  %v311_v6 = vld [vmem:[%s425_s0 + $0x10] sm:$0xff]  }
   0x2   :  { %281 = vmatprep.subr.bf16.mxu0 %v305_v0  ;;  %301 = vmatprep.subr.bf16.mxu1 %v305_v0  ;;  %v307_v2 = vld [vmem:[%s425_s0] sm:$0xff]   ;;  %v309_v4 = vld [vmem:[%s425_s0 + $0x8] sm:$0xff]   ;;  %v312_v7 = vld [vmem:[%s425_s0 + $0x30] sm:$0xff]  }
   0x3   :  { %282 = vmatpush3.bf16.msra.mxu0 %v305_v0  ;;  %303 = vmatpush3.bf16.msra.mxu1 %v305_v0  ;;  %v308_v3 = vld [vmem:[%s425_s0 + $0x20] sm:$0xff]   ;;  %v310_v5 = vld [vmem:[%s425_s0 + $0x28] sm:$0xff]   ;;  %v313_v8 = vld [vmem:[%s425_s0 + $0x18] sm:$0xff]  }
   0x4   :  { %283 = vmatprep.subr.bf16.mxu0 %v306_v1  ;;  %302 = vmatprep.subr.bf16.mxu1 %v306_v1  ;;  %v314_v9 = vld [vmem:[%s425_s0 + $0x38] sm:$0xff]   ;;  %v252_v10 = vld [vmem:[%s426_s2] ss:$0 sm:$0xff] }
   0x5   :  { %285 = vmatprep.mubr.msk.bf16.mxu0 %vm94_vm0, %v307_v2  ;;  %293 = vmatprep.mubr.msk.bf16.mxu1 %vm94_vm0, %v308_v3 }
   0x7   :  { %284 = vmatpush3.bf16.msra.mxu0 %v306_v1  ;;  %304 = vmatpush3.bf16.msra.mxu1 %v306_v1 }
   0xa   :  { %286 = vmatmul.mubr.msk.bf16.vlgmr.msra.gmra.mxu0 %vm94_vm0, %v309_v4  ;;  %294 = vmatmul.mubr.msk.bf16.vlgmr.msra.gmra.mxu1 %vm94_vm0, %v310_v5 }
   0xb   :  { %289 = vmatprep.mubr.msk.bf16.mxu0 %vm94_vm0, %v311_v6  ;;  %297 = vmatprep.mubr.msk.bf16.mxu1 %vm94_vm0, %v312_v7 }
  0x12   :  { %290 = vmatmul.mubr.msk.bf16.gmra.mxu0 %vm94_vm0, %v313_v8  ;;  %298 = vmatmul.mubr.msk.bf16.gmra.mxu1 %vm94_vm0, %v314_v9 }
  0xca   :  { %v287_v11 = vpop.f32.mrf.mxu0  ;;  %v295_v12 = vpop.f32.mrf.mxu1 }
  0xcb   :  { %v162_v13 = vadd.f32 %v287_v11, %v252_v10  ;;  %v194_v14 = vadd.f32 %v295_v12, %v252_v10 }
  0xcc   :  { %v153_v15 = vpop.f32.mrf.mxu0  ;;  %v185_v16 = vpop.f32.mrf.mxu1 }
  0xcd   :  { %v218_v17 = vmax.f32 %v162_v13, 0.0  ;;  %v226_v18 = vmax.f32 %v194_v14, 0.0  ;;  %v154_v19 = vadd.f32 %v252_v10, %v153_v15  ;;  %v186_v20 = vadd.f32 %v252_v10, %v185_v16 }
  0xce   :  { %v288_v21 = vpop.f32.mrf.mxu0  ;;  %v296_v22 = vpop.f32.mrf.mxu1 }
  0xcf   :  { %234 = vst [vmem:[%s427_s3 + $0x10] sm:$0xff] %v218_v17  ;;  %242 = vst [vmem:[%s427_s3 + $0x50] sm:$0xff] %v226_v18  ;;  %v216_v23 = vmax.f32 %v154_v19, 0.0  ;;  %v224_v24 = vmax.f32 %v186_v20, 0.0  ;;  %v165_v25 = vadd.f32 %v288_v21, %v252_v10  ;;  %v197_v26 = vadd.f32 %v296_v22, %v252_v10 }
  0xd0   :  { %v156_v27 = vpop.f32.mrf.mxu0  ;;  %v188_v28 = vpop.f32.mrf.mxu1 }
  0xd1   :  { %232 = vst [vmem:[%s427_s3] sm:$0xff] %v216_v23  ;;  %240 = vst [vmem:[%s427_s3 + $0x40] sm:$0xff] %v224_v24  ;;  %v219_v29 = vmax.f32 %v165_v25, 0.0  ;;  %v227_v30 = vmax.f32 %v197_v26, 0.0  ;;  %v157_v31 = vadd.f32 %v252_v10, %v156_v27  ;;  %v189_v32 = vadd.f32 %v252_v10, %v188_v28 }
  0xd2   :  { %v291_v33 = vpop.f32.mrf.mxu0  ;;  %v299_v34 = vpop.f32.mrf.mxu1 }
  0xd3   :  { %235 = vst [vmem:[%s427_s3 + $0x18] sm:$0xff] %v219_v29  ;;  %243 = vst [vmem:[%s427_s3 + $0x58] sm:$0xff] %v227_v30  ;;  %v217_v35 = vmax.f32 %v157_v31, 0.0  ;;  %v225_v36 = vmax.f32 %v189_v32, 0.0  ;;  %v178_v37 = vadd.f32 %v291_v33, %v252_v10  ;;  %v210_v38 = vadd.f32 %v299_v34, %v252_v10 }
  0xd4   :  { %v169_v39 = vpop.f32.mrf.mxu0  ;;  %v201_v40 = vpop.f32.mrf.mxu1 }
  0xd5   :  { %233 = vst [vmem:[%s427_s3 + $0x8] sm:$0xff] %v217_v35  ;;  %241 = vst [vmem:[%s427_s3 + $0x48] sm:$0xff] %v225_v36  ;;  %v222_v41 = vmax.f32 %v178_v37, 0.0  ;;  %v230_v42 = vmax.f32 %v210_v38, 0.0  ;;  %v170_v43 = vadd.f32 %v252_v10, %v169_v39  ;;  %v202_v44 = vadd.f32 %v252_v10, %v201_v40 }
  0xd6   :  { %v292_v45 = vpop.f32.mrf.mxu0  ;;  %v300_v46 = vpop.f32.mrf.mxu1 }
  0xd7   :  { %238 = vst [vmem:[%s427_s3 + $0x30] sm:$0xff] %v222_v41  ;;  %246 = vst [vmem:[%s427_s3 + $0x70] sm:$0xff] %v230_v42  ;;  %v220_v47 = vmax.f32 %v170_v43, 0.0  ;;  %v228_v48 = vmax.f32 %v202_v44, 0.0  ;;  %v181_v49 = vadd.f32 %v292_v45, %v252_v10  ;;  %v213_v50 = vadd.f32 %v300_v46, %v252_v10 }
  0xd8   :  { %v172_v51 = vpop.f32.mrf.mxu0  ;;  %v204_v52 = vpop.f32.mrf.mxu1 }
  0xd9   :  { %236 = vst [vmem:[%s427_s3 + $0x20] sm:$0xff] %v220_v47  ;;  %244 = vst [vmem:[%s427_s3 + $0x60] sm:$0xff] %v228_v48  ;;  %v223_v53 = vmax.f32 %v181_v49, 0.0  ;;  %v231_v54 = vmax.f32 %v213_v50, 0.0  ;;  %v173_v55 = vadd.f32 %v252_v10, %v172_v51  ;;  %v205_v56 = vadd.f32 %v252_v10, %v204_v52 }
  0xdb   :  { %239 = vst [vmem:[%s427_s3 + $0x38] sm:$0xff] %v223_v53  ;;  %247 = vst [vmem:[%s427_s3 + $0x78] sm:$0xff] %v231_v54  ;;  %v221_v57 = vmax.f32 %v173_v55, 0.0  ;;  %v229_v58 = vmax.f32 %v205_v56, 0.0 }
  0xdd   :  { %237 = vst [vmem:[%s427_s3 + $0x28] sm:$0xff] %v221_v57  ;;  %245 = vst [vmem:[%s427_s3 + $0x68] sm:$0xff] %v229_v58 }

// kernel: simple_conv_forward.18
= control target key start
LH: loop header
LB: loop body
LE: loop exit
PB: predicated region body
PF: predicated region fallthrough
CT: control target
= control target key end

     0   :  { %vm372_vm0 = vcmask 523264   ;;  %s884_s1 = inlined_call_operand.vmem [shape: bf16[576,128], index: 1, kind: input, shape index: {}]   ;;  %s885_s0 = inlined_call_operand.vmem [shape: bf16[32,576], index: 0, kind: input, shape index: {}]   ;;  %s886_s2 = inlined_call_operand.vmem [shape: f32[1,128], index: 2, kind: input, shape index: {}]   ;;  %s887_s3 = inlined_call_operand.vmem [shape: f32[32,128], index: 3, kind: output, shape index: {}]  }
   0x1   :  { %v661_v0 = vld [vmem:[%s884_s1 + $0x78] sm:$0xff]   ;;  %v665_v4 = vld [vmem:[%s884_s1 + $0x70] sm:$0xff]   ;;  %v669_v8 = vld [vmem:[%s884_s1 + $0x68] sm:$0xff]  }
   0x2   :  { %v662_v1 = vld [vmem:[%s884_s1 + $0xf8] sm:$0xff]   ;;  %587 = vmatprep.subr.bf16.mxu0 %v661_v0  ;;  %v666_v5 = vld [vmem:[%s884_s1 + $0xf0] sm:$0xff]   ;;  %v670_v9 = vld [vmem:[%s884_s1 + $0xe8] sm:$0xff]  }
   0x3   :  { %v663_v2 = vld [vmem:[%s884_s1 + $0x38] sm:$0xff]   ;;  %615 = vmatprep.subr.bf16.mxu1 %v662_v1  ;;  %v667_v6 = vld [vmem:[%s884_s1 + $0x30] sm:$0xff]   ;;  %v671_v10 = vld [vmem:[%s884_s1 + $0x28] sm:$0xff]  }
   0x4   :  { %v664_v3 = vld [vmem:[%s884_s1 + $0xb8] sm:$0xff]   ;;  %588 = vmatpush3.bf16.msra.mxu0 %v663_v2  ;;  %v668_v7 = vld [vmem:[%s884_s1 + $0xb0] sm:$0xff]   ;;  %v672_v11 = vld [vmem:[%s884_s1 + $0xa8] sm:$0xff]  }
   0x5   :  { %616 = vmatpush3.bf16.msra.mxu1 %v664_v3  ;;  %589 = vmatprep.subr.bf16.mxu0 %v665_v4  ;;  %v673_v12 = vld [vmem:[%s884_s1 + $0x60] sm:$0xff]   ;;  %v677_v16 = vld [vmem:[%s884_s1 + $0x58] sm:$0xff]   ;;  %v681_v20 = vld [vmem:[%s884_s1 + $0x50] sm:$0xff]  }
   0x6   :  { %617 = vmatprep.subr.bf16.mxu1 %v666_v5  ;;  %v674_v13 = vld [vmem:[%s884_s1 + $0xe0] sm:$0xff]   ;;  %v678_v17 = vld [vmem:[%s884_s1 + $0xd8] sm:$0xff]   ;;  %v682_v21 = vld [vmem:[%s884_s1 + $0xd0] sm:$0xff]  }
   0x7   :  { %v675_v14 = vld [vmem:[%s884_s1 + $0x20] sm:$0xff]   ;;  %v679_v18 = vld [vmem:[%s884_s1 + $0x18] sm:$0xff]   ;;  %v683_v22 = vld [vmem:[%s884_s1 + $0x10] sm:$0xff]  }
   0x8   :  { %590 = vmatpush3.bf16.msra.mxu0 %v667_v6  ;;  %v676_v15 = vld [vmem:[%s884_s1 + $0xa0] sm:$0xff]   ;;  %v680_v19 = vld [vmem:[%s884_s1 + $0x98] sm:$0xff]   ;;  %v684_v23 = vld [vmem:[%s884_s1 + $0x90] sm:$0xff]  }
   0x9   :  { %618 = vmatpush3.bf16.msra.mxu1 %v668_v7  ;;  %591 = vmatprep.subr.bf16.mxu0 %v669_v8  ;;  %v685_v24 = vld [vmem:[%s884_s1 + $0x48] sm:$0xff]   ;;  %v689_v28 = vld [vmem:[%s884_s1 + $0x40] sm:$0xff]   ;;  %v699_v36 = vld [vmem:[%s884_s1 + $0x118] sm:$0xff]  }
   0xa   :  { %619 = vmatprep.subr.bf16.mxu1 %v670_v9  ;;  %v686_v25 = vld [vmem:[%s884_s1 + $0xc8] sm:$0xff]   ;;  %v690_v29 = vld [vmem:[%s884_s1 + $0xc0] sm:$0xff]   ;;  %v700_v37 = vld [vmem:[%s884_s1 + $0x110] sm:$0xff]  }
   0xb   :  { %v687_v26 = vld [vmem:[%s884_s1 + $0x8] sm:$0xff]   ;;  %v691_v30 = vld [vmem:[%s884_s1] sm:$0xff]  }
   0xc   :  { %592 = vmatpush3.bf16.msra.mxu0 %v671_v10  ;;  %v688_v27 = vld [vmem:[%s884_s1 + $0x88] sm:$0xff]   ;;  %v692_v31 = vld [vmem:[%s884_s1 + $0x80] sm:$0xff]  }
   0xd   :  { %620 = vmatpush3.bf16.msra.mxu1 %v672_v11  ;;  %593 = vmatprep.subr.bf16.mxu0 %v673_v12  ;;  %v693_v32 = vld [vmem:[%s885_s0] ss:$20 sps:$4 sm:$0xff]   ;;  %v695_v33 = vld [vmem:[%s885_s0 + $0x4] ss:$20 sps:$4 sm:$0xff]   ;;  %v696_v34 = vld [vmem:[%s885_s0 + $0x8] ss:$20 sps:$4 sm:$0xff]  }
   0xe   :  { %621 = vmatprep.subr.bf16.mxu1 %v674_v13  ;;  %v698_v35 = vld [vmem:[%s885_s0 + $0xc] ss:$20 sps:$4 sm:$0xff]   ;;  %411 = vmatprep.mubr.bf16.mxu0 %v695_v33  ;;  %v703_v39 = vld [vmem:[%s885_s0 + $0x34] ss:$20 sps:$4 sm:$0xff]   ;;  %v706_v42 = vld [vmem:[%s885_s0 + $0x30] ss:$20 sps:$4 sm:$0xff]  }
   0xf   :  { %460 = vmatprep.mubr.bf16.mxu1 %v698_v35  ;;  %v701_v38 = vld [vmem:[%s885_s0 + $0x2c] ss:$20 sps:$4 sm:$0xff]   ;;  %v705_v40 = vld [vmem:[%s885_s0 + $0x28] ss:$20 sps:$4 sm:$0xff]   ;;  %v709_v43 = vld [vmem:[%s885_s0 + $0x10] ss:$20 sps:$4 sm:$0xff]  }
  0x10   :  { %594 = vmatpush3.bf16.msra.mxu0 %v675_v14  ;;  %v707_v41 = vld [vmem:[%s884_s1 + $0x108] sm:$0xff]   ;;  %v708_v44 = vld [vmem:[%s884_s1 + $0x100] sm:$0xff]  }
  0x11   :  { %622 = vmatpush3.bf16.msra.mxu1 %v676_v15  ;;  %595 = vmatprep.subr.bf16.mxu0 %v677_v16  ;;  %v710_v45 = vld [vmem:[%s885_s0 + $0x38] ss:$20 sps:$4 sm:$0xff]   ;;  %v538_v58 = vld [vmem:[%s886_s2] ss:$0 sm:$0xff] }
  0x12   :  { %623 = vmatprep.subr.bf16.mxu1 %v678_v17 }
  0x14   :  { %596 = vmatpush3.bf16.msra.mxu0 %v679_v18 }
  0x15   :  { %624 = vmatpush3.bf16.msra.mxu1 %v680_v19  ;;  %597 = vmatprep.subr.bf16.mxu0 %v681_v20 }
  0x16   :  { %625 = vmatprep.subr.bf16.mxu1 %v682_v21 }
  0x18   :  { %598 = vmatpush3.bf16.msra.mxu0 %v683_v22 }
  0x19   :  { %626 = vmatpush3.bf16.msra.mxu1 %v684_v23  ;;  %599 = vmatprep.subr.bf16.mxu0 %v685_v24 }
  0x1a   :  { %627 = vmatprep.subr.bf16.mxu1 %v686_v25 }
  0x1c   :  { %600 = vmatpush3.bf16.msra.mxu0 %v687_v26 }
  0x1d   :  { %628 = vmatpush3.bf16.msra.mxu1 %v688_v27  ;;  %601 = vmatprep.subr.bf16.mxu0 %v689_v28 }
  0x1e   :  { %629 = vmatprep.subr.bf16.mxu1 %v690_v29 }
  0x20   :  { %602 = vmatpush3.bf16.msra.mxu0 %v691_v30 }
  0x21   :  { %630 = vmatpush3.bf16.msra.mxu1 %v692_v31  ;;  %649 = vmatprep.subr.bf16.mxu0 %v699_v36 }
  0x23   :  { %412 = vmatmul.mubr.bf16.vlgmr.msra.gmra.mxu0 %v693_v32 }
  0x24   :  { %461 = vmatmul.mubr.bf16.vlgmr.msra.gmra.mxu1 %v696_v34  ;;  %650 = vmatpush3.bf16.msra.mxu0 %v699_v36 }
  0x25   :  { %651 = vmatprep.subr.bf16.mxu0 %v700_v37  ;;  %419 = vmatprep.mubr.bf16.mxu0 %v701_v38 }
  0x26   :  { %468 = vmatprep.mubr.bf16.mxu1 %v703_v39 }
  0x28   :  { %652 = vmatpush3.bf16.msra.mxu0 %v700_v37 }
  0x29   :  { %653 = vmatprep.subr.bf16.mxu0 %v707_v41 }
  0x2b   :  { %420 = vmatmul.mubr.bf16.gmra.mxu0 %v705_v40 }
  0x2c   :  { %469 = vmatmul.mubr.bf16.gmra.mxu1 %v706_v42  ;;  %657 = vmatprep.mubr.msk.bf16.mxu0 %vm372_vm0, %v709_v43 }
  0x2d   :  { %654 = vmatpush3.bf16.msra.mxu0 %v707_v41 }
  0x2e   :  { %655 = vmatprep.subr.bf16.mxu0 %v708_v44 }
  0x31   :  { %656 = vmatpush3.bf16.msra.mxu0 %v708_v44 }
  0x34   :  { %658 = vmatmul.mubr.msk.bf16.vlgmr.msra.gmra.mxu0 %vm372_vm0, %v710_v45 }
  0xe3   :  { %v603_v46 = vpop.f32.mrf.mxu0 }
  0xe4   :  { %v631_v47 = vpop.f32.mrf.mxu1 }
  0xe5   :  { %v604_v48 = vpop.f32.mrf.mxu0 }
  0xe6   :  { %v632_v49 = vpop.f32.mrf.mxu1  ;;  %v605_v56 = vadd.f32 %v604_v48, %v603_v46 }
  0xe7   :  { %v606_v50 = vpop.f32.mrf.mxu0  ;;  %v633_v2 = vadd.f32 %v632_v49, %v631_v47 }
  0xe8   :  { %v634_v51 = vpop.f32.mrf.mxu1  ;;  %v414_v1 = vadd.f32 %v605_v56, %v538_v58 }
  0xe9   :  { %v607_v52 = vpop.f32.mrf.mxu0 }
  0xea   :  { %v635_v53 = vpop.f32.mrf.mxu1  ;;  %v608_v3 = vadd.f32 %v607_v52, %v606_v50  ;;  %v463_v13 = vadd.f32 %v633_v2, %v414_v1 }
  0xeb   :  { %v609_v54 = vpop.f32.mrf.mxu0  ;;  %v636_v16 = vadd.f32 %v635_v53, %v634_v51 }
  0xec   :  { %v637_v55 = vpop.f32.mrf.mxu1  ;;  %v417_v11 = vadd.f32 %v608_v3, %v538_v58 }
  0xed   :  { %v610_v57 = vpop.f32.mrf.mxu0 }
  0xee   :  { %v611_v59 = vadd.f32 %v610_v57, %v609_v54  ;;  %v638_v60 = vpop.f32.mrf.mxu1  ;;  %v466_v22 = vadd.f32 %v636_v16, %v417_v11 }
  0xef   :  { %v639_v61 = vadd.f32 %v638_v60, %v637_v55  ;;  %v612_v62 = vpop.f32.mrf.mxu0 }
  0xf0   :  { %v422_v63 = vadd.f32 %v611_v59, %v538_v58  ;;  %v640_v0 = vpop.f32.mrf.mxu1 }
  0xf1   :  { %v613_v4 = vpop.f32.mrf.mxu0 }
  0xf2   :  { %v614_v5 = vadd.f32 %v613_v4, %v612_v62  ;;  %v641_v6 = vpop.f32.mrf.mxu1  ;;  %v471_v7 = vadd.f32 %v639_v61, %v422_v63 }
  0xf3   :  { %v642_v9 = vadd.f32 %v641_v6, %v640_v0 }
  0xf4   :  { %v425_v8 = vadd.f32 %v614_v5, %v538_v58  ;;  %v659_v10 = vpop.f32.mrf.mxu0 }
  0xf5   :  { %v520_v12 = vadd.f32 %v659_v10, %v471_v7 }
  0xf6   :  { %v511_v14 = vpop.f32.mrf.mxu0  ;;  %v474_v15 = vadd.f32 %v642_v9, %v425_v8 }
  0xf7   :  { %v528_v17 = vmax.f32 %v520_v12, 0.0  ;;  %v512_v18 = vadd.f32 %v511_v14, %v463_v13 }
  0xf8   :  { %v660_v19 = vpop.f32.mrf.mxu0 }
  0xf9   :  { %532 = vst [vmem:[%s887_s3 + $0x10] sm:$0xff] %v528_v17  ;;  %v526_v20 = vmax.f32 %v512_v18, 0.0  ;;  %v523_v21 = vadd.f32 %v660_v19, %v474_v15 }
  0xfa   :  { %v514_v23 = vpop.f32.mrf.mxu0 }
  0xfb   :  { %530 = vst [vmem:[%s887_s3] sm:$0xff] %v526_v20  ;;  %v529_v24 = vmax.f32 %v523_v21, 0.0  ;;  %v515_v25 = vadd.f32 %v514_v23, %v466_v22 }
  0xfd   :  { %533 = vst [vmem:[%s887_s3 + $0x18] sm:$0xff] %v529_v24  ;;  %v527_v26 = vmax.f32 %v515_v25, 0.0 }
  0xff   :  { %531 = vst [vmem:[%s887_s3 + $0x8] sm:$0xff] %v527_v26 }

// kernel: simple_conv_forward.19
= control target key start
LH: loop header
LB: loop body
LE: loop exit
PB: predicated region body
PF: predicated region fallthrough
CT: control target
= control target key end

     0   :  { %s2052_s1 = inlined_call_operand.vmem [shape: bf16[1152,256], index: 1, kind: input, shape index: {}]   ;;  %s2053_s0 = inlined_call_operand.vmem [shape: bf16[16,1152], index: 0, kind: input, shape index: {}]   ;;  %s2054_s2 = inlined_call_operand.vmem [shape: f32[1,256], index: 2, kind: input, shape index: {}]   ;;  %s2055_s3 = inlined_call_operand.vmem [shape: f32[16,256], index: 3, kind: output, shape index: {}]  }
   0x1   :  { %v1328_v0 = vld [vmem:[%s2052_s1 + $0x74] ss:$8 sps:$4 sm:$0xff]   ;;  %v1330_v1 = vld [vmem:[%s2052_s1 + $0x70] ss:$8 sps:$4 sm:$0xff]   ;;  %v1334_v4 = vld [vmem:[%s2052_s1 + $0x64] ss:$8 sps:$4 sm:$0xff]  }
   0x2   :  { %947 = vmatprep.subr.bf16.mxu0 %v1328_v0  ;;  %v1331_v2 = vld [vmem:[%s2052_s1 + $0x174] ss:$8 sps:$4 sm:$0xff]   ;;  %v1333_v3 = vld [vmem:[%s2052_s1 + $0x170] ss:$8 sps:$4 sm:$0xff]   ;;  %v1336_v5 = vld [vmem:[%s2052_s1 + $0x60] ss:$8 sps:$4 sm:$0xff]  }
   0x3   :  { %948 = vmatpush1.bf16.msra.mxu0 %v1330_v1  ;;  %990 = vmatprep.subr.bf16.mxu1 %v1331_v2  ;;  %v1337_v6 = vld [vmem:[%s2052_s1 + $0x164] ss:$8 sps:$4 sm:$0xff]   ;;  %v1339_v7 = vld [vmem:[%s2052_s1 + $0x160] ss:$8 sps:$4 sm:$0xff]   ;;  %v1340_v8 = vld [vmem:[%s2052_s1 + $0x54] ss:$8 sps:$4 sm:$0xff]  }
   0x4   :  { %991 = vmatpush1.bf16.msra.mxu1 %v1333_v3  ;;  %949 = vmatprep.subr.bf16.mxu0 %v1334_v4  ;;  %v1342_v9 = vld [vmem:[%s2052_s1 + $0x50] ss:$8 sps:$4 sm:$0xff]   ;;  %v1343_v10 = vld [vmem:[%s2052_s1 + $0x154] ss:$8 sps:$4 sm:$0xff]   ;;  %v1346_v11 = vld [vmem:[%s2052_s1 + $0x44] ss:$8 sps:$4 sm:$0xff]  }
   0x5   :  { %992 = vmatprep.subr.bf16.mxu1 %v1337_v6  ;;  %v1345_v12 = vld [vmem:[%s2052_s1 + $0x150] ss:$8 sps:$4 sm:$0xff]   ;;  %v1349_v13 = vld [vmem:[%s2052_s1 + $0x144] ss:$8 sps:$4 sm:$0xff]   ;;  %v1348_v14 = vld [vmem:[%s2052_s1 + $0x40] ss:$8 sps:$4 sm:$0xff]  }
   0x6   :  { %v1352_v15 = vld [vmem:[%s2052_s1 + $0x34] ss:$8 sps:$4 sm:$0xff]   ;;  %v1351_v16 = vld [vmem:[%s2052_s1 + $0x140] ss:$8 sps:$4 sm:$0xff]   ;;  %v1354_v18 = vld [vmem:[%s2052_s1 + $0x30] ss:$8 sps:$4 sm:$0xff]  }
   0x7   :  { %950 = vmatpush1.bf16.msra.mxu0 %v1336_v5  ;;  %v1355_v17 = vld [vmem:[%s2052_s1 + $0x134] ss:$8 sps:$4 sm:$0xff]   ;;  %v1358_v19 = vld [vmem:[%s2052_s1 + $0x24] ss:$8 sps:$4 sm:$0xff]   ;;  %v1357_v20 = vld [vmem:[%s2052_s1 + $0x130] ss:$8 sps:$4 sm:$0xff]  }
   0x8   :  { %951 = vmatprep.subr.bf16.mxu0 %v1340_v8  ;;  %993 = vmatpush1.bf16.msra.mxu1 %v1339_v7  ;;  %v1361_v21 = vld [vmem:[%s2052_s1 + $0x124] ss:$8 sps:$4 sm:$0xff]   ;;  %v1360_v22 = vld [vmem:[%s2052_s1 + $0x20] ss:$8 sps:$4 sm:$0xff]   ;;  %v1364_v23 = vld [vmem:[%s2052_s1 + $0x14] ss:$8 sps:$4 sm:$0xff]  }
   0x9   :  { %994 = vmatprep.subr.bf16.mxu1 %v1343_v10  ;;  %v1363_v24 = vld [vmem:[%s2052_s1 + $0x120] ss:$8 sps:$4 sm:$0xff]   ;;  %v1367_v25 = vld [vmem:[%s2052_s1 + $0x114] ss:$8 sps:$4 sm:$0xff]   ;;  %v1366_v26 = vld [vmem:[%s2052_s1 + $0x10] ss:$8 sps:$4 sm:$0xff]  }
   0xa   :  { %v1370_v27 = vld [vmem:[%s2052_s1 + $0x4] ss:$8 sps:$4 sm:$0xff]   ;;  %v1369_v28 = vld [vmem:[%s2052_s1 + $0x110] ss:$8 sps:$4 sm:$0xff]   ;;  %v1372_v30 = vld [vmem:[%s2052_s1] ss:$8 sps:$4 sm:$0xff]  }
   0xb   :  { %952 = vmatpush1.bf16.msra.mxu0 %v1342_v9  ;;  %v1373_v29 = vld [vmem:[%s2052_s1 + $0x104] ss:$8 sps:$4 sm:$0xff]   ;;  %v1376_v31 = vld [vmem:[%s2052_s1 + $0xf4] ss:$8 sps:$4 sm:$0xff]   ;;  %v1375_v32 = vld [vmem:[%s2052_s1 + $0x100] ss:$8 sps:$4 sm:$0xff]  }
   0xc   :  { %953 = vmatprep.subr.bf16.mxu0 %v1346_v11  ;;  %995 = vmatpush1.bf16.msra.mxu1 %v1345_v12  ;;  %v1379_v33 = vld [vmem:[%s2052_s1 + $0x1f4] ss:$8 sps:$4 sm:$0xff]   ;;  %v1378_v34 = vld [vmem:[%s2052_s1 + $0xf0] ss:$8 sps:$4 sm:$0xff]   ;;  %v1382_v35 = vld [vmem:[%s2052_s1 + $0xe4] ss:$8 sps:$4 sm:$0xff]  }
   0xd   :  { %996 = vmatprep.subr.bf16.mxu1 %v1349_v13  ;;  %v1381_v36 = vld [vmem:[%s2052_s1 + $0x1f0] ss:$8 sps:$4 sm:$0xff]   ;;  %v1385_v37 = vld [vmem:[%s2052_s1 + $0x1e4] ss:$8 sps:$4 sm:$0xff]   ;;  %v1384_v38 = vld [vmem:[%s2052_s1 + $0xe0] ss:$8 sps:$4 sm:$0xff]  }
   0xe   :  { %v1388_v39 = vld [vmem:[%s2052_s1 + $0xd4] ss:$8 sps:$4 sm:$0xff]   ;;  %v1387_v40 = vld [vmem:[%s2052_s1 + $0x1e0] ss:$8 sps:$4 sm:$0xff]   ;;  %v1390_v42 = vld [vmem:[%s2052_s1 + $0xd0] ss:$8 sps:$4 sm:$0xff]  }
   0xf   :  { %954 = vmatpush1.bf16.msra.mxu0 %v1348_v14  ;;  %v1391_v41 = vld [vmem:[%s2052_s1 + $0x1d4] ss:$8 sps:$4 sm:$0xff]   ;;  %v1394_v43 = vld [vmem:[%s2052_s1 + $0xc4] ss:$8 sps:$4 sm:$0xff]   ;;  %v1393_v44 = vld [vmem:[%s2052_s1 + $0x1d0] ss:$8 sps:$4 sm:$0xff]  }
  0x10   :  { %955 = vmatprep.subr.bf16.mxu0 %v1352_v15  ;;  %997 = vmatpush1.bf16.msra.mxu1 %v1351_v16  ;;  %v1397_v45 = vld [vmem:[%s2052_s1 + $0x1c4] ss:$8 sps:$4 sm:$0xff]   ;;  %v1396_v46 = vld [vmem:[%s2052_s1 + $0xc0] ss:$8 sps:$4 sm:$0xff]   ;;  %v1400_v48 = vld [vmem:[%s2052_s1 + $0xb4] ss:$8 sps:$4 sm:$0xff]  }
  0x11   :  { %998 = vmatprep.subr.bf16.mxu1 %v1355_v17  ;;  %v1425_v47 = vld [vmem:[%s2053_s0 + $0x4] ss:$36 sps:$4 sm:$0xff]   ;;  %v1403_v50 = vld [vmem:[%s2052_s1 + $0x1b4] ss:$8 sps:$4 sm:$0xff]   ;;  %v1432_v51 = vld [vmem:[%s2053_s0 + $0xc] ss:$36 sps:$4 sm:$0xff]  }
  0x12   :  { %v1399_v49 = vld [vmem:[%s2052_s1 + $0x1c0] ss:$8 sps:$4 sm:$0xff]   ;;  %979 = vmatprep.mubr.bf16.mxu0 %v1425_v47  ;;  %v1402_v52 = vld [vmem:[%s2052_s1 + $0xb0] ss:$8 sps:$4 sm:$0xff]   ;;  %v1406_v53 = vld [vmem:[%s2052_s1 + $0xa4] ss:$8 sps:$4 sm:$0xff]   ;;  %1022 = vmatprep.mubr.bf16.mxu1 %v1432_v51 }
  0x13   :  { %956 = vmatpush1.bf16.msra.mxu0 %v1354_v18  ;;  %v1405_v54 = vld [vmem:[%s2052_s1 + $0x1b0] ss:$8 sps:$4 sm:$0xff]   ;;  %v1409_v55 = vld [vmem:[%s2052_s1 + $0x1a4] ss:$8 sps:$4 sm:$0xff]   ;;  %v1408_v56 = vld [vmem:[%s2052_s1 + $0xa0] ss:$8 sps:$4 sm:$0xff]  }
  0x14   :  { %957 = vmatprep.subr.bf16.mxu0 %v1358_v19  ;;  %999 = vmatpush1.bf16.msra.mxu1 %v1357_v20  ;;  %v1412_v57 = vld [vmem:[%s2052_s1 + $0x94] ss:$8 sps:$4 sm:$0xff]   ;;  %v1411_v58 = vld [vmem:[%s2052_s1 + $0x1a0] ss:$8 sps:$4 sm:$0xff]   ;;  %v1414_v60 = vld [vmem:[%s2052_s1 + $0x90] ss:$8 sps:$4 sm:$0xff]  }
  0x15   :  { %1000 = vmatprep.subr.bf16.mxu1 %v1361_v21  ;;  %v1415_v59 = vld [vmem:[%s2052_s1 + $0x194] ss:$8 sps:$4 sm:$0xff]   ;;  %v1418_v61 = vld [vmem:[%s2052_s1 + $0x84] ss:$8 sps:$4 sm:$0xff]   ;;  %v1417_v62 = vld [vmem:[%s2052_s1 + $0x190] ss:$8 sps:$4 sm:$0xff]  }
  0x16   :  { %v1421_v63 = vld [vmem:[%s2052_s1 + $0x184] ss:$8 sps:$4 sm:$0xff]   ;;  %v1420_v0 = vld [vmem:[%s2052_s1 + $0x80] ss:$8 sps:$4 sm:$0xff]   ;;  %v1429_v1 = vld [vmem:[%s2052_s1 + $0x274] ss:$8 sps:$4 sm:$0xff]  }
  0x17   :  { %958 = vmatpush1.bf16.msra.mxu0 %v1360_v22  ;;  %v1426_v2 = vld [vmem:[%s2052_s1 + $0x180] ss:$8 sps:$4 sm:$0xff]   ;;  %v1435_v4 = vld [vmem:[%s2052_s1 + $0x374] ss:$8 sps:$4 sm:$0xff]   ;;  %v1427_v5 = vld [vmem:[%s2052_s1 + $0x270] ss:$8 sps:$4 sm:$0xff]  }
  0x18   :  { %959 = vmatprep.subr.bf16.mxu0 %v1364_v23  ;;  %1001 = vmatpush1.bf16.msra.mxu1 %v1363_v24  ;;  %v1423_v3 = vld [vmem:[%s2053_s0] ss:$36 sps:$4 sm:$0xff]   ;;  %v1430_v6 = vld [vmem:[%s2053_s0 + $0x8] ss:$36 sps:$4 sm:$0xff]   ;;  %v1433_v8 = vld [vmem:[%s2052_s1 + $0x370] ss:$8 sps:$4 sm:$0xff]  }
  0x19   :  { %1002 = vmatprep.subr.bf16.mxu1 %v1367_v25  ;;  %v1438_v7 = vld [vmem:[%s2052_s1 + $0x264] ss:$8 sps:$4 sm:$0xff]   ;;  %v1436_v10 = vld [vmem:[%s2052_s1 + $0x260] ss:$8 sps:$4 sm:$0xff]   ;;  %v1444_v11 = vld [vmem:[%s2052_s1 + $0x254] ss:$8 sps:$4 sm:$0xff]  }
  0x1a   :  { %v1441_v9 = vld [vmem:[%s2052_s1 + $0x364] ss:$8 sps:$4 sm:$0xff]   ;;  %v1439_v12 = vld [vmem:[%s2052_s1 + $0x360] ss:$8 sps:$4 sm:$0xff]   ;;  %v1447_v13 = vld [vmem:[%s2052_s1 + $0x354] ss:$8 sps:$4 sm:$0xff]  }
  0x1b   :  { %960 = vmatpush1.bf16.msra.mxu0 %v1366_v26  ;;  %v1442_v14 = vld [vmem:[%s2052_s1 + $0x250] ss:$8 sps:$4 sm:$0xff]   ;;  %v1450_v15 = vld [vmem:[%s2052_s1 + $0x244] ss:$8 sps:$4 sm:$0xff]   ;;  %v1448_v18 = vld [vmem:[%s2052_s1 + $0x240] ss:$8 sps:$4 sm:$0xff]  }
  0x1c   :  { %961 = vmatprep.subr.bf16.mxu0 %v1370_v27  ;;  %1003 = vmatpush1.bf16.msra.mxu1 %v1369_v28  ;;  %v1445_v16 = vld [vmem:[%s2052_s1 + $0x350] ss:$8 sps:$4 sm:$0xff]   ;;  %v1453_v17 = vld [vmem:[%s2052_s1 + $0x344] ss:$8 sps:$4 sm:$0xff]   ;;  %v1456_v19 = vld [vmem:[%s2052_s1 + $0x234] ss:$8 sps:$4 sm:$0xff]  }
  0x1d   :  { %1004 = vmatprep.subr.bf16.mxu1 %v1373_v29  ;;  %v1451_v20 = vld [vmem:[%s2052_s1 + $0x340] ss:$8 sps:$4 sm:$0xff]   ;;  %v1459_v21 = vld [vmem:[%s2052_s1 + $0x334] ss:$8 sps:$4 sm:$0xff]   ;;  %v1454_v22 = vld [vmem:[%s2052_s1 + $0x230] ss:$8 sps:$4 sm:$0xff]  }
  0x1e   :  { %v1462_v23 = vld [vmem:[%s2052_s1 + $0x224] ss:$8 sps:$4 sm:$0xff]   ;;  %v1457_v24 = vld [vmem:[%s2052_s1 + $0x330] ss:$8 sps:$4 sm:$0xff]   ;;  %v1460_v26 = vld [vmem:[%s2052_s1 + $0x220] ss:$8 sps:$4 sm:$0xff]  }
  0x1f   :  { %962 = vmatpush1.bf16.msra.mxu0 %v1372_v30  ;;  %v1465_v25 = vld [vmem:[%s2052_s1 + $0x324] ss:$8 sps:$4 sm:$0xff]   ;;  %v1468_v27 = vld [vmem:[%s2052_s1 + $0x214] ss:$8 sps:$4 sm:$0xff]   ;;  %v1463_v28 = vld [vmem:[%s2052_s1 + $0x320] ss:$8 sps:$4 sm:$0xff]  }
  0x20   :  { %963 = vmatprep.subr.bf16.mxu0 %v1376_v31  ;;  %1005 = vmatpush1.bf16.msra.mxu1 %v1375_v32  ;;  %v1471_v29 = vld [vmem:[%s2052_s1 + $0x314] ss:$8 sps:$4 sm:$0xff]   ;;  %v1466_v30 = vld [vmem:[%s2052_s1 + $0x210] ss:$8 sps:$4 sm:$0xff]   ;;  %v1474_v32 = vld [vmem:[%s2052_s1 + $0x204] ss:$8 sps:$4 sm:$0xff]  }
  0x21   :  { %1006 = vmatprep.subr.bf16.mxu1 %v1379_v33  ;;  %v1469_v31 = vld [vmem:[%s2052_s1 + $0x310] ss:$8 sps:$4 sm:$0xff]   ;;  %v1495_v47 = vld [vmem:[%s2052_s1 + $0x3d4] ss:$8 sps:$4 sm:$0xff]   ;;  %v1501_v51 = vld [vmem:[%s2052_s1 + $0x3c4] ss:$8 sps:$4 sm:$0xff]  }
  0x22   :  { %v1528_v33 = vld [vmem:[%s2053_s0 + $0x14] ss:$36 sps:$4 sm:$0xff]  }
  0x23   :  { %964 = vmatpush2.bf16.msra.mxu0 %v1378_v34  ;;  %v1477_v34 = vld [vmem:[%s2052_s1 + $0x304] ss:$8 sps:$4 sm:$0xff]  }
  0x24   :  { %965 = vmatprep.subr.bf16.mxu0 %v1382_v35  ;;  %1007 = vmatpush2.bf16.msra.mxu1 %v1381_v36  ;;  %v1472_v35 = vld [vmem:[%s2052_s1 + $0x200] ss:$8 sps:$4 sm:$0xff]  }
  0x25   :  { %1008 = vmatprep.subr.bf16.mxu1 %v1385_v37  ;;  %v1534_v36 = vld [vmem:[%s2053_s0 + $0x1c] ss:$36 sps:$4 sm:$0xff]  }
  0x26   :  { %v1480_v37 = vld [vmem:[%s2052_s1 + $0x2f4] ss:$8 sps:$4 sm:$0xff]  }
  0x27   :  { %966 = vmatpush2.bf16.msra.mxu0 %v1384_v38  ;;  %v1475_v38 = vld [vmem:[%s2052_s1 + $0x300] ss:$8 sps:$4 sm:$0xff]  }
  0x28   :  { %967 = vmatprep.subr.bf16.mxu0 %v1388_v39  ;;  %1009 = vmatpush2.bf16.msra.mxu1 %v1387_v40  ;;  %v1483_v39 = vld [vmem:[%s2052_s1 + $0x3f4] ss:$8 sps:$4 sm:$0xff]   ;;  %v1478_v40 = vld [vmem:[%s2052_s1 + $0x2f0] ss:$8 sps:$4 sm:$0xff]  }
  0x29   :  { %1010 = vmatprep.subr.bf16.mxu1 %v1391_v41  ;;  %v1486_v41 = vld [vmem:[%s2052_s1 + $0x2e4] ss:$8 sps:$4 sm:$0xff]  }
  0x2b   :  { %968 = vmatpush2.bf16.msra.mxu0 %v1390_v42  ;;  %v1481_v42 = vld [vmem:[%s2052_s1 + $0x3f0] ss:$8 sps:$4 sm:$0xff]  }
  0x2c   :  { %969 = vmatprep.subr.bf16.mxu0 %v1394_v43  ;;  %1011 = vmatpush2.bf16.msra.mxu1 %v1393_v44  ;;  %v1489_v43 = vld [vmem:[%s2052_s1 + $0x3e4] ss:$8 sps:$4 sm:$0xff]   ;;  %v1484_v44 = vld [vmem:[%s2052_s1 + $0x2e0] ss:$8 sps:$4 sm:$0xff]  }
  0x2d   :  { %1012 = vmatprep.subr.bf16.mxu1 %v1397_v45  ;;  %v1492_v45 = vld [vmem:[%s2052_s1 + $0x2d4] ss:$8 sps:$4 sm:$0xff]  }
  0x2f   :  { %970 = vmatpush2.bf16.msra.mxu0 %v1396_v46  ;;  %v1487_v46 = vld [vmem:[%s2052_s1 + $0x3e0] ss:$8 sps:$4 sm:$0xff]  }
  0x30   :  { %971 = vmatprep.subr.bf16.mxu0 %v1400_v48  ;;  %1013 = vmatpush2.bf16.msra.mxu1 %v1399_v49  ;;  %v1490_v48 = vld [vmem:[%s2052_s1 + $0x2d0] ss:$8 sps:$4 sm:$0xff]   ;;  %v1498_v49 = vld [vmem:[%s2052_s1 + $0x2c4] ss:$8 sps:$4 sm:$0xff]  }
  0x31   :  { %1014 = vmatprep.subr.bf16.mxu1 %v1403_v50  ;;  %v1493_v50 = vld [vmem:[%s2052_s1 + $0x3d0] ss:$8 sps:$4 sm:$0xff]  }
  0x33   :  { %972 = vmatpush2.bf16.msra.mxu0 %v1402_v52  ;;  %v1496_v52 = vld [vmem:[%s2052_s1 + $0x2c0] ss:$8 sps:$4 sm:$0xff]  }
  0x34   :  { %973 = vmatprep.subr.bf16.mxu0 %v1406_v53  ;;  %1015 = vmatpush2.bf16.msra.mxu1 %v1405_v54  ;;  %v1504_v53 = vld [vmem:[%s2052_s1 + $0x2b4] ss:$8 sps:$4 sm:$0xff]   ;;  %v1499_v54 = vld [vmem:[%s2052_s1 + $0x3c0] ss:$8 sps:$4 sm:$0xff]  }
  0x35   :  { %1016 = vmatprep.subr.bf16.mxu1 %v1409_v55  ;;  %v1507_v55 = vld [vmem:[%s2052_s1 + $0x3b4] ss:$8 sps:$4 sm:$0xff]  }
  0x37   :  { %974 = vmatpush2.bf16.msra.mxu0 %v1408_v56  ;;  %v1502_v56 = vld [vmem:[%s2052_s1 + $0x2b0] ss:$8 sps:$4 sm:$0xff]  }
  0x38   :  { %975 = vmatprep.subr.bf16.mxu0 %v1412_v57  ;;  %1017 = vmatpush2.bf16.msra.mxu1 %v1411_v58  ;;  %v1510_v57 = vld [vmem:[%s2052_s1 + $0x2a4] ss:$8 sps:$4 sm:$0xff]   ;;  %v1505_v58 = vld [vmem:[%s2052_s1 + $0x3b0] ss:$8 sps:$4 sm:$0xff]  }
  0x39   :  { %1018 = vmatprep.subr.bf16.mxu1 %v1415_v59  ;;  %v1513_v59 = vld [vmem:[%s2052_s1 + $0x3a4] ss:$8 sps:$4 sm:$0xff]  }
  0x3b   :  { %976 = vmatpush2.bf16.msra.mxu0 %v1414_v60  ;;  %v1508_v60 = vld [vmem:[%s2052_s1 + $0x2a0] ss:$8 sps:$4 sm:$0xff]  }
  0x3c   :  { %977 = vmatprep.subr.bf16.mxu0 %v1418_v61  ;;  %1019 = vmatpush2.bf16.msra.mxu1 %v1417_v62  ;;  %v1516_v61 = vld [vmem:[%s2052_s1 + $0x294] ss:$8 sps:$4 sm:$0xff]   ;;  %v1511_v62 = vld [vmem:[%s2052_s1 + $0x3a0] ss:$8 sps:$4 sm:$0xff]  }
  0x3d   :  { %1020 = vmatprep.subr.bf16.mxu1 %v1421_v63  ;;  %v1519_v63 = vld [vmem:[%s2052_s1 + $0x394] ss:$8 sps:$4 sm:$0xff]  }
  0x3f   :  { %978 = vmatpush2.bf16.msra.mxu0 %v1420_v0  ;;  %v1514_v0 = vld [vmem:[%s2052_s1 + $0x290] ss:$8 sps:$4 sm:$0xff]  }
  0x40   :  { %1033 = vmatprep.subr.bf16.mxu0 %v1429_v1  ;;  %1021 = vmatpush2.bf16.msra.mxu1 %v1426_v2  ;;  %v1522_v1 = vld [vmem:[%s2052_s1 + $0x284] ss:$8 sps:$4 sm:$0xff]   ;;  %v1517_v2 = vld [vmem:[%s2052_s1 + $0x390] ss:$8 sps:$4 sm:$0xff]  }
  0x41   :  { %1076 = vmatprep.subr.bf16.mxu1 %v1435_v4  ;;  %v1520_v4 = vld [vmem:[%s2052_s1 + $0x280] ss:$8 sps:$4 sm:$0xff]  }
  0x42   :  { %980 = vmatmul.mubr.bf16.vlgmr.msra.gmra.mxu0 %v1423_v3  ;;  %v1525_v3 = vld [vmem:[%s2052_s1 + $0x384] ss:$8 sps:$4 sm:$0xff]  }
  0x43   :  { %1034 = vmatpush1.bf16.msra.mxu0 %v1427_v5  ;;  %1023 = vmatmul.mubr.bf16.vlgmr.msra.gmra.mxu1 %v1430_v6  ;;  %v1531_v5 = vld [vmem:[%s2052_s1 + $0x474] ss:$8 sps:$4 sm:$0xff]   ;;  %v1523_v6 = vld [vmem:[%s2052_s1 + $0x380] ss:$8 sps:$4 sm:$0xff]  }
  0x44   :  { %1035 = vmatprep.subr.bf16.mxu0 %v1438_v7  ;;  %1077 = vmatpush1.bf16.msra.mxu1 %v1433_v8  ;;  %v1526_v7 = vld [vmem:[%s2053_s0 + $0x10] ss:$36 sps:$4 sm:$0xff]  }
  0x45   :  { %1078 = vmatprep.subr.bf16.mxu1 %v1441_v9  ;;  %1065 = vmatprep.mubr.bf16.mxu0 %v1528_v33  ;;  %v1529_v8 = vld [vmem:[%s2052_s1 + $0x470] ss:$8 sps:$4 sm:$0xff]  }
  0x46   :  { %1108 = vmatprep.mubr.bf16.mxu1 %v1534_v36  ;;  %v1532_v9 = vld [vmem:[%s2053_s0 + $0x18] ss:$36 sps:$4 sm:$0xff]  }
  0x47   :  { %1036 = vmatpush1.bf16.msra.mxu0 %v1436_v10  ;;  %v1537_v10 = vld [vmem:[%s2052_s1 + $0x464] ss:$8 sps:$4 sm:$0xff]  }
  0x48   :  { %1037 = vmatprep.subr.bf16.mxu0 %v1444_v11  ;;  %1079 = vmatpush1.bf16.msra.mxu1 %v1439_v12  ;;  %v1535_v11 = vld [vmem:[%s2052_s1 + $0x460] ss:$8 sps:$4 sm:$0xff]   ;;  %v1557_v12 = vmov 0  }
  0x49   :  { %1080 = vmatprep.subr.bf16.mxu1 %v1447_v13  ;;  %v1540_v13 = vld [vmem:[%s2052_s1 + $0x454] ss:$8 sps:$4 sm:$0xff]  }
  0x4b   :  { %1038 = vmatpush1.bf16.msra.mxu0 %v1442_v14  ;;  %v1538_v14 = vld [vmem:[%s2052_s1 + $0x450] ss:$8 sps:$4 sm:$0xff]  }
  0x4c   :  { %1039 = vmatprep.subr.bf16.mxu0 %v1450_v15  ;;  %1081 = vmatpush1.bf16.msra.mxu1 %v1445_v16  ;;  %v1543_v15 = vld [vmem:[%s2052_s1 + $0x444] ss:$8 sps:$4 sm:$0xff]   ;;  %v1541_v16 = vld [vmem:[%s2052_s1 + $0x440] ss:$8 sps:$4 sm:$0xff]  }
  0x4d   :  { %1082 = vmatprep.subr.bf16.mxu1 %v1453_v17  ;;  %v1546_v17 = vld [vmem:[%s2052_s1 + $0x434] ss:$8 sps:$4 sm:$0xff]  }
  0x4f   :  { %1040 = vmatpush1.bf16.msra.mxu0 %v1448_v18  ;;  %v1544_v18 = vld [vmem:[%s2052_s1 + $0x430] ss:$8 sps:$4 sm:$0xff]  }
  0x50   :  { %1041 = vmatprep.subr.bf16.mxu0 %v1456_v19  ;;  %1083 = vmatpush1.bf16.msra.mxu1 %v1451_v20  ;;  %v1549_v19 = vld [vmem:[%s2052_s1 + $0x424] ss:$8 sps:$4 sm:$0xff]   ;;  %v1547_v20 = vld [vmem:[%s2052_s1 + $0x420] ss:$8 sps:$4 sm:$0xff]  }
  0x51   :  { %1084 = vmatprep.subr.bf16.mxu1 %v1459_v21  ;;  %v1552_v21 = vld [vmem:[%s2052_s1 + $0x414] ss:$8 sps:$4 sm:$0xff]  }
  0x53   :  { %1042 = vmatpush1.bf16.msra.mxu0 %v1454_v22  ;;  %v1550_v22 = vld [vmem:[%s2052_s1 + $0x410] ss:$8 sps:$4 sm:$0xff]  }
  0x54   :  { %1043 = vmatprep.subr.bf16.mxu0 %v1462_v23  ;;  %1085 = vmatpush1.bf16.msra.mxu1 %v1457_v24  ;;  %v1555_v23 = vld [vmem:[%s2052_s1 + $0x404] ss:$8 sps:$4 sm:$0xff]   ;;  %v1553_v24 = vld [vmem:[%s2052_s1 + $0x400] ss:$8 sps:$4 sm:$0xff]  }
  0x55   :  { %1086 = vmatprep.subr.bf16.mxu1 %v1465_v25  ;;  %v1556_v25 = vld [vmem:[%s2053_s0 + $0x20] ss:$36 sps:$4 sm:$0xff]  }
  0x57   :  { %1044 = vmatpush1.bf16.msra.mxu0 %v1460_v26 }
  0x58   :  { %1045 = vmatprep.subr.bf16.mxu0 %v1468_v27  ;;  %1087 = vmatpush1.bf16.msra.mxu1 %v1463_v28  ;;  %v171_v27 = vlaneseq }
  0x59   :  { %1088 = vmatprep.subr.bf16.mxu1 %v1471_v29 }
  0x5b   :  { %1046 = vmatpush1.bf16.msra.mxu0 %v1466_v30  ;;  %v172_v30 = vshrl.u32 %v171_v27, 7 }
  0x5c   :  { %1047 = vmatprep.subr.bf16.mxu0 %v1474_v32  ;;  %1089 = vmatpush1.bf16.msra.mxu1 %v1469_v31 }
  0x5d   :  { %1090 = vmatprep.subr.bf16.mxu1 %v1477_v34  ;;  %v173_v33 = vsub.s32 0, %v172_v30  ;;  %v169_v34 = vld [vmem:[%s2054_s2] sm:$0x3] }
  0x5f   :  { %1048 = vmatpush1.bf16.msra.mxu0 %v1472_v35  ;;  %v177_v35 = vsub.s32 1, %v172_v30 }
  0x60   :  { %1049 = vmatprep.subr.bf16.mxu0 %v1480_v37  ;;  %1091 = vmatpush1.bf16.msra.mxu1 %v1475_v38  ;;  %v174_v38 = vrot.slane %v169_v34, %v173_v33 }
  0x61   :  { %1092 = vmatprep.subr.bf16.mxu1 %v1483_v39 }
  0x63   :  { %1050 = vmatpush2.bf16.msra.mxu0 %v1478_v40  ;;  %v178_v40 = vrot.slane %v169_v34, %v177_v35 }
  0x64   :  { %1051 = vmatprep.subr.bf16.mxu0 %v1486_v41  ;;  %1093 = vmatpush2.bf16.msra.mxu1 %v1481_v42 }
  0x65   :  { %1094 = vmatprep.subr.bf16.mxu1 %v1489_v43 }
  0x67   :  { %1052 = vmatpush2.bf16.msra.mxu0 %v1484_v44 }
  0x68   :  { %1053 = vmatprep.subr.bf16.mxu0 %v1492_v45  ;;  %1095 = vmatpush2.bf16.msra.mxu1 %v1487_v46 }
  0x69   :  { %1096 = vmatprep.subr.bf16.mxu1 %v1495_v47 }
  0x6b   :  { %1054 = vmatpush2.bf16.msra.mxu0 %v1490_v48 }
  0x6c   :  { %1055 = vmatprep.subr.bf16.mxu0 %v1498_v49  ;;  %1097 = vmatpush2.bf16.msra.mxu1 %v1493_v50 }
  0x6d   :  { %1098 = vmatprep.subr.bf16.mxu1 %v1501_v51 }
  0x6f   :  { %1056 = vmatpush2.bf16.msra.mxu0 %v1496_v52 }
  0x70   :  { %1057 = vmatprep.subr.bf16.mxu0 %v1504_v53  ;;  %1099 = vmatpush2.bf16.msra.mxu1 %v1499_v54 }
  0x71   :  { %1100 = vmatprep.subr.bf16.mxu1 %v1507_v55 }
  0x73   :  { %1058 = vmatpush2.bf16.msra.mxu0 %v1502_v56 }
  0x74   :  { %1059 = vmatprep.subr.bf16.mxu0 %v1510_v57  ;;  %1101 = vmatpush2.bf16.msra.mxu1 %v1505_v58 }
  0x75   :  { %1102 = vmatprep.subr.bf16.mxu1 %v1513_v59 }
  0x77   :  { %1060 = vmatpush2.bf16.msra.mxu0 %v1508_v60 }
  0x78   :  { %1061 = vmatprep.subr.bf16.mxu0 %v1516_v61  ;;  %1103 = vmatpush2.bf16.msra.mxu1 %v1511_v62 }
  0x79   :  { %1104 = vmatprep.subr.bf16.mxu1 %v1519_v63 }
  0x7b   :  { %1062 = vmatpush2.bf16.msra.mxu0 %v1514_v0 }
  0x7c   :  { %1063 = vmatprep.subr.bf16.mxu0 %v1522_v1  ;;  %1105 = vmatpush2.bf16.msra.mxu1 %v1517_v2 }
  0x7d   :  { %1106 = vmatprep.subr.bf16.mxu1 %v1525_v3 }
  0x7f   :  { %1064 = vmatpush2.bf16.msra.mxu0 %v1520_v4 }
  0x80   :  { %1119 = vmatprep.subr.bf16.mxu0 %v1531_v5  ;;  %1107 = vmatpush2.bf16.msra.mxu1 %v1523_v6 }
  0x82   :  { %1066 = vmatmul.mubr.bf16.vlgmr.msra.gmra.mxu0 %v1526_v7 }
  0x83   :  { %1120 = vmatpush1.bf16.msra.mxu0 %v1529_v8  ;;  %1151 = vmatprep.mubr.bf16.mxu0 %v1557_v12 }
  0x84   :  { %1109 = vmatmul.mubr.bf16.vlgmr.msra.gmra.mxu1 %v1532_v9  ;;  %1121 = vmatprep.subr.bf16.mxu0 %v1537_v10 }
  0x87   :  { %1122 = vmatpush1.bf16.msra.mxu0 %v1535_v11 }
  0x88   :  { %1123 = vmatprep.subr.bf16.mxu0 %v1540_v13 }
  0x8b   :  { %1124 = vmatpush1.bf16.msra.mxu0 %v1538_v14 }
  0x8c   :  { %1125 = vmatprep.subr.bf16.mxu0 %v1543_v15 }
  0x8f   :  { %1126 = vmatpush1.bf16.msra.mxu0 %v1541_v16 }
  0x90   :  { %1127 = vmatprep.subr.bf16.mxu0 %v1546_v17 }
  0x93   :  { %1128 = vmatpush1.bf16.msra.mxu0 %v1544_v18 }
  0x94   :  { %1129 = vmatprep.subr.bf16.mxu0 %v1549_v19 }
  0x97   :  { %1130 = vmatpush1.bf16.msra.mxu0 %v1547_v20 }
  0x98   :  { %1131 = vmatprep.subr.bf16.mxu0 %v1552_v21 }
  0x9b   :  { %1132 = vmatpush1.bf16.msra.mxu0 %v1550_v22 }
  0x9c   :  { %1133 = vmatprep.subr.bf16.mxu0 %v1555_v23 }
  0x9f   :  { %1134 = vmatpush1.bf16.msra.mxu0 %v1553_v24 }
  0xa2   :  { %1152 = vmatmul.mubr.bf16.vlgmr.msra.gmra.mxu0 %v1556_v25 }
 0x102   :  { %v981_v26 = vpop.f32.mrf.mxu0 }
 0x103   :  { %v1024_v29 = vpop.f32.mrf.mxu1  ;;  %v982_v42 = vadd.f32 %v981_v26, %v174_v38 }
 0x104   :  { %v983_v28 = vpop.f32.mrf.mxu0 }
 0x105   :  { %v1026_v32 = vpop.f32.mrf.mxu1  ;;  %v984_v45 = vadd.f32 %v983_v28, %v178_v40  ;;  %v1025_v46 = vadd.f32 %v1024_v29, %v982_v42 }
 0x106   :  { %v985_v31 = vpop.f32.mrf.mxu0 }
 0x107   :  { %v1028_v37 = vpop.f32.mrf.mxu1  ;;  %v986_v47 = vadd.f32 %v985_v31, %v174_v38  ;;  %v1027_v50 = vadd.f32 %v1026_v32, %v984_v45 }
 0x108   :  { %v987_v36 = vpop.f32.mrf.mxu0 }
 0x109   :  { %v1030_v41 = vpop.f32.mrf.mxu1  ;;  %v988_v51 = vadd.f32 %v987_v36, %v178_v40  ;;  %v1029_v53 = vadd.f32 %v1028_v37, %v986_v47 }
 0x10b   :  { %v1031_v57 = vadd.f32 %v1030_v41, %v988_v51 }
 0x142   :  { %v1067_v39 = vpop.f32.mrf.mxu0 }
 0x143   :  { %v1068_v52 = vadd.f32 %v1067_v39, %v1025_v46 }
 0x144   :  { %v1069_v43 = vpop.f32.mrf.mxu0  ;;  %v1110_v44 = vpop.f32.mrf.mxu1 }
 0x145   :  { %v1070_v54 = vadd.f32 %v1069_v43, %v1027_v50  ;;  %v1111_v58 = vadd.f32 %v1110_v44, %v1068_v52 }
 0x146   :  { %v1071_v48 = vpop.f32.mrf.mxu0  ;;  %v1112_v49 = vpop.f32.mrf.mxu1 }
 0x147   :  { %v1072_v59 = vadd.f32 %v1071_v48, %v1029_v53  ;;  %v1113_v61 = vadd.f32 %v1112_v49, %v1070_v54 }
 0x148   :  { %v1073_v55 = vpop.f32.mrf.mxu0  ;;  %v1114_v56 = vpop.f32.mrf.mxu1 }
 0x149   :  { %v1074_v62 = vadd.f32 %v1073_v55, %v1031_v57  ;;  %v1115_v2 = vadd.f32 %v1114_v56, %v1072_v59 }
 0x14a   :  { %v1116_v0 = vpop.f32.mrf.mxu1 }
 0x14b   :  { %v1117_v6 = vadd.f32 %v1116_v0, %v1074_v62 }
 0x162   :  { %v1153_v60 = vpop.f32.mrf.mxu0 }
 0x163   :  { %v1154_v63 = vadd.f32 %v1153_v60, %v1111_v58 }
 0x164   :  { %v1155_v1 = vpop.f32.mrf.mxu0 }
 0x165   :  { %v1162_v3 = vmax.f32 %v1154_v63, 0.0  ;;  %v1156_v4 = vadd.f32 %v1155_v1, %v1113_v61 }
 0x166   :  { %v1157_v5 = vpop.f32.mrf.mxu0 }
 0x167   :  { %1166 = vst [vmem:[%s2055_s3] sm:$0xff] %v1162_v3  ;;  %v1163_v7 = vmax.f32 %v1156_v4, 0.0  ;;  %v1158_v8 = vadd.f32 %v1157_v5, %v1115_v2 }
 0x168   :  { %v1159_v9 = vpop.f32.mrf.mxu0 }
 0x169   :  { %1167 = vst [vmem:[%s2055_s3 + $0x8] sm:$0xff] %v1163_v7  ;;  %v1164_v10 = vmax.f32 %v1158_v8, 0.0  ;;  %v1160_v11 = vadd.f32 %v1159_v9, %v1117_v6 }
 0x16b   :  { %1168 = vst [vmem:[%s2055_s3 + $0x10] sm:$0xff] %v1164_v10  ;;  %v1165_v12 = vmax.f32 %v1160_v11, 0.0 }
 0x16d   :  { %1169 = vst [vmem:[%s2055_s3 + $0x18] sm:$0xff] %v1165_v12 }

// kernel: simple_conv_forward.21
= control target key start
LH: loop header
LB: loop body
LE: loop exit
PB: predicated region body
PF: predicated region fallthrough
CT: control target
= control target key end

     0   :  { %s648_s1 = inlined_call_operand.vmem [shape: bf16[512,128], index: 1, kind: input, shape index: {}]   ;;  %s649_s0 = inlined_call_operand.vmem [shape: bf16[16,512], index: 0, kind: input, shape index: {}]   ;;  %s650_s2 = inlined_call_operand.vmem [shape: f32[1,128], index: 2, kind: input, shape index: {}]   ;;  %s651_s3 = inlined_call_operand.vmem [shape: f32[16,128], index: 3, kind: output, shape index: {}]  }
   0x1   :  { %v473_v0 = vld [vmem:[%s648_s1 + $0x78] sm:$0xff]   ;;  %v477_v4 = vld [vmem:[%s648_s1 + $0x70] sm:$0xff]   ;;  %v481_v8 = vld [vmem:[%s648_s1 + $0x68] sm:$0xff]  }
   0x2   :  { %v474_v1 = vld [vmem:[%s648_s1 + $0xf8] sm:$0xff]   ;;  %429 = vmatprep.subr.bf16.mxu0 %v473_v0  ;;  %v478_v5 = vld [vmem:[%s648_s1 + $0xf0] sm:$0xff]   ;;  %v482_v9 = vld [vmem:[%s648_s1 + $0xe8] sm:$0xff]  }
   0x3   :  { %v475_v2 = vld [vmem:[%s648_s1 + $0x38] sm:$0xff]   ;;  %451 = vmatprep.subr.bf16.mxu1 %v474_v1  ;;  %v479_v6 = vld [vmem:[%s648_s1 + $0x30] sm:$0xff]   ;;  %v483_v10 = vld [vmem:[%s648_s1 + $0x28] sm:$0xff]  }
   0x4   :  { %v476_v3 = vld [vmem:[%s648_s1 + $0xb8] sm:$0xff]   ;;  %430 = vmatpush3.bf16.msra.mxu0 %v475_v2  ;;  %v480_v7 = vld [vmem:[%s648_s1 + $0xb0] sm:$0xff]   ;;  %v484_v11 = vld [vmem:[%s648_s1 + $0xa8] sm:$0xff]  }
   0x5   :  { %452 = vmatpush3.bf16.msra.mxu1 %v476_v3  ;;  %431 = vmatprep.subr.bf16.mxu0 %v477_v4  ;;  %v485_v12 = vld [vmem:[%s648_s1 + $0x60] sm:$0xff]   ;;  %v489_v16 = vld [vmem:[%s648_s1 + $0x58] sm:$0xff]   ;;  %v493_v20 = vld [vmem:[%s648_s1 + $0x50] sm:$0xff]  }
   0x6   :  { %453 = vmatprep.subr.bf16.mxu1 %v478_v5  ;;  %v486_v13 = vld [vmem:[%s648_s1 + $0xe0] sm:$0xff]   ;;  %v490_v17 = vld [vmem:[%s648_s1 + $0xd8] sm:$0xff]   ;;  %v494_v21 = vld [vmem:[%s648_s1 + $0xd0] sm:$0xff]  }
   0x7   :  { %v487_v14 = vld [vmem:[%s648_s1 + $0x20] sm:$0xff]   ;;  %v491_v18 = vld [vmem:[%s648_s1 + $0x18] sm:$0xff]   ;;  %v495_v22 = vld [vmem:[%s648_s1 + $0x10] sm:$0xff]  }
   0x8   :  { %432 = vmatpush3.bf16.msra.mxu0 %v479_v6  ;;  %v488_v15 = vld [vmem:[%s648_s1 + $0xa0] sm:$0xff]   ;;  %v492_v19 = vld [vmem:[%s648_s1 + $0x98] sm:$0xff]   ;;  %v496_v23 = vld [vmem:[%s648_s1 + $0x90] sm:$0xff]  }
   0x9   :  { %454 = vmatpush3.bf16.msra.mxu1 %v480_v7  ;;  %433 = vmatprep.subr.bf16.mxu0 %v481_v8  ;;  %v497_v24 = vld [vmem:[%s648_s1 + $0x48] sm:$0xff]   ;;  %v501_v28 = vld [vmem:[%s648_s1 + $0x40] sm:$0xff]  }
   0xa   :  { %455 = vmatprep.subr.bf16.mxu1 %v482_v9  ;;  %v498_v25 = vld [vmem:[%s648_s1 + $0xc8] sm:$0xff]   ;;  %v502_v29 = vld [vmem:[%s648_s1 + $0xc0] sm:$0xff]  }
   0xb   :  { %v499_v26 = vld [vmem:[%s648_s1 + $0x8] sm:$0xff]   ;;  %v503_v30 = vld [vmem:[%s648_s1] sm:$0xff]  }
   0xc   :  { %434 = vmatpush3.bf16.msra.mxu0 %v483_v10  ;;  %v500_v27 = vld [vmem:[%s648_s1 + $0x88] sm:$0xff]   ;;  %v504_v31 = vld [vmem:[%s648_s1 + $0x80] sm:$0xff]  }
   0xd   :  { %456 = vmatpush3.bf16.msra.mxu1 %v484_v11  ;;  %435 = vmatprep.subr.bf16.mxu0 %v485_v12  ;;  %v505_v32 = vld [vmem:[%s649_s0] ss:$16 sps:$4 sm:$0xff]   ;;  %v507_v33 = vld [vmem:[%s649_s0 + $0x4] ss:$16 sps:$4 sm:$0xff]   ;;  %v508_v34 = vld [vmem:[%s649_s0 + $0x8] ss:$16 sps:$4 sm:$0xff]  }
   0xe   :  { %457 = vmatprep.subr.bf16.mxu1 %v486_v13  ;;  %v510_v35 = vld [vmem:[%s649_s0 + $0xc] ss:$16 sps:$4 sm:$0xff]   ;;  %334 = vmatprep.mubr.bf16.mxu0 %v507_v33  ;;  %v392_v38 = vld [vmem:[%s650_s2] ss:$0 sm:$0xff] }
   0xf   :  { %375 = vmatprep.mubr.bf16.mxu1 %v510_v35 }
  0x10   :  { %436 = vmatpush3.bf16.msra.mxu0 %v487_v14 }
  0x11   :  { %458 = vmatpush3.bf16.msra.mxu1 %v488_v15  ;;  %437 = vmatprep.subr.bf16.mxu0 %v489_v16 }
  0x12   :  { %459 = vmatprep.subr.bf16.mxu1 %v490_v17 }
  0x14   :  { %438 = vmatpush3.bf16.msra.mxu0 %v491_v18 }
  0x15   :  { %460 = vmatpush3.bf16.msra.mxu1 %v492_v19  ;;  %439 = vmatprep.subr.bf16.mxu0 %v493_v20 }
  0x16   :  { %461 = vmatprep.subr.bf16.mxu1 %v494_v21 }
  0x18   :  { %440 = vmatpush3.bf16.msra.mxu0 %v495_v22 }
  0x19   :  { %462 = vmatpush3.bf16.msra.mxu1 %v496_v23  ;;  %441 = vmatprep.subr.bf16.mxu0 %v497_v24 }
  0x1a   :  { %463 = vmatprep.subr.bf16.mxu1 %v498_v25 }
  0x1c   :  { %442 = vmatpush3.bf16.msra.mxu0 %v499_v26 }
  0x1d   :  { %464 = vmatpush3.bf16.msra.mxu1 %v500_v27  ;;  %443 = vmatprep.subr.bf16.mxu0 %v501_v28 }
  0x1e   :  { %465 = vmatprep.subr.bf16.mxu1 %v502_v29 }
  0x20   :  { %444 = vmatpush3.bf16.msra.mxu0 %v503_v30 }
  0x21   :  { %466 = vmatpush3.bf16.msra.mxu1 %v504_v31 }
  0x23   :  { %335 = vmatmul.mubr.bf16.vlgmr.msra.gmra.mxu0 %v505_v32 }
  0x24   :  { %376 = vmatmul.mubr.bf16.vlgmr.msra.gmra.mxu1 %v508_v34 }
  0xe3   :  { %v445_v36 = vpop.f32.mrf.mxu0 }
  0xe4   :  { %v467_v37 = vpop.f32.mrf.mxu1 }
  0xe5   :  { %v446_v39 = vpop.f32.mrf.mxu0 }
  0xe6   :  { %v447_v40 = vadd.f32 %v446_v39, %v445_v36  ;;  %v468_v41 = vpop.f32.mrf.mxu1 }
  0xe7   :  { %v448_v42 = vpop.f32.mrf.mxu0  ;;  %v469_v44 = vadd.f32 %v468_v41, %v467_v37 }
  0xe8   :  { %v337_v43 = vadd.f32 %v447_v40, %v392_v38  ;;  %v470_v45 = vpop.f32.mrf.mxu1 }
  0xe9   :  { %v449_v46 = vpop.f32.mrf.mxu0 }
  0xea   :  { %v378_v47 = vadd.f32 %v469_v44, %v337_v43  ;;  %v450_v48 = vadd.f32 %v449_v46, %v448_v42  ;;  %v471_v49 = vpop.f32.mrf.mxu1 }
  0xeb   :  { %v472_v52 = vadd.f32 %v471_v49, %v470_v45 }
  0xec   :  { %v384_v50 = vmax.f32 %v378_v47, 0.0  ;;  %v340_v51 = vadd.f32 %v450_v48, %v392_v38 }
  0xee   :  { %386 = vst [vmem:[%s651_s3] sm:$0xff] %v384_v50  ;;  %v381_v53 = vadd.f32 %v472_v52, %v340_v51 }
  0xf0   :  { %v385_v54 = vmax.f32 %v381_v53, 0.0 }
  0xf2   :  { %387 = vst [vmem:[%s651_s3 + $0x8] sm:$0xff] %v385_v54 }

// kernel: simple_conv_forward.20
= control target key start
LH: loop header
LB: loop body
LE: loop exit
PB: predicated region body
PF: predicated region fallthrough
CT: control target
= control target key end

     0   :  { %s354_s1 = inlined_call_operand.vmem [shape: bf16[256,128], index: 1, kind: input, shape index: {}]   ;;  %s355_s0 = inlined_call_operand.vmem [shape: bf16[16,256], index: 0, kind: input, shape index: {}]   ;;  %s356_s2 = inlined_call_operand.vmem [shape: f32[1,128], index: 2, kind: input, shape index: {}]   ;;  %s357_s3 = inlined_call_operand.vmem [shape: f32[16,128], index: 3, kind: output, shape index: {}]  }
   0x1   :  { %v252_v0 = vld [vmem:[%s354_s1 + $0x78] sm:$0xff]   ;;  %v254_v2 = vld [vmem:[%s354_s1 + $0x70] sm:$0xff]   ;;  %v256_v4 = vld [vmem:[%s354_s1 + $0x68] sm:$0xff]  }
   0x2   :  { %v253_v1 = vld [vmem:[%s354_s1 + $0x38] sm:$0xff]   ;;  %230 = vmatprep.subr.bf16.mxu0 %v252_v0  ;;  %v255_v3 = vld [vmem:[%s354_s1 + $0x30] sm:$0xff]   ;;  %v257_v5 = vld [vmem:[%s354_s1 + $0x28] sm:$0xff]  }
   0x3   :  { %231 = vmatpush3.bf16.msra.mxu0 %v253_v1  ;;  %v258_v6 = vld [vmem:[%s354_s1 + $0x60] sm:$0xff]   ;;  %v260_v8 = vld [vmem:[%s354_s1 + $0x58] sm:$0xff]   ;;  %v262_v10 = vld [vmem:[%s354_s1 + $0x50] sm:$0xff]  }
   0x4   :  { %232 = vmatprep.subr.bf16.mxu0 %v254_v2  ;;  %v259_v7 = vld [vmem:[%s354_s1 + $0x20] sm:$0xff]   ;;  %v261_v9 = vld [vmem:[%s354_s1 + $0x18] sm:$0xff]   ;;  %v263_v12 = vld [vmem:[%s354_s1 + $0x10] sm:$0xff]  }
   0x5   :  { %v270_v11 = vld [vmem:[%s355_s0 + $0x4] ss:$8 sps:$4 sm:$0xff]   ;;  %v268_v17 = vld [vmem:[%s355_s0] ss:$8 sps:$4 sm:$0xff]  }
   0x6   :  { %194 = vmatprep.mubr.bf16.mxu0 %v270_v11  ;;  %v264_v13 = vld [vmem:[%s354_s1 + $0x48] sm:$0xff]   ;;  %v266_v15 = vld [vmem:[%s354_s1 + $0x40] sm:$0xff]  }
   0x7   :  { %233 = vmatpush3.bf16.msra.mxu0 %v255_v3  ;;  %v265_v14 = vld [vmem:[%s354_s1 + $0x8] sm:$0xff]   ;;  %v267_v16 = vld [vmem:[%s354_s1] sm:$0xff]  }
   0x8   :  { %234 = vmatprep.subr.bf16.mxu0 %v256_v4  ;;  %v211_v19 = vld [vmem:[%s356_s2] ss:$0 sm:$0xff] }
   0xb   :  { %235 = vmatpush3.bf16.msra.mxu0 %v257_v5 }
   0xc   :  { %236 = vmatprep.subr.bf16.mxu0 %v258_v6 }
   0xf   :  { %237 = vmatpush3.bf16.msra.mxu0 %v259_v7 }
  0x10   :  { %238 = vmatprep.subr.bf16.mxu0 %v260_v8 }
  0x13   :  { %239 = vmatpush3.bf16.msra.mxu0 %v261_v9 }
  0x14   :  { %240 = vmatprep.subr.bf16.mxu0 %v262_v10 }
  0x17   :  { %241 = vmatpush3.bf16.msra.mxu0 %v263_v12 }
  0x18   :  { %242 = vmatprep.subr.bf16.mxu0 %v264_v13 }
  0x1b   :  { %243 = vmatpush3.bf16.msra.mxu0 %v265_v14 }
  0x1c   :  { %244 = vmatprep.subr.bf16.mxu0 %v266_v15 }
  0x1f   :  { %245 = vmatpush3.bf16.msra.mxu0 %v267_v16 }
  0x22   :  { %195 = vmatmul.mubr.bf16.vlgmr.msra.gmra.mxu0 %v268_v17 }
  0xe2   :  { %v246_v18 = vpop.f32.mrf.mxu0 }
  0xe4   :  { %v247_v20 = vpop.f32.mrf.mxu0 }
  0xe5   :  { %v248_v21 = vadd.f32 %v247_v20, %v246_v18 }
  0xe6   :  { %v249_v22 = vpop.f32.mrf.mxu0 }
  0xe7   :  { %v197_v23 = vadd.f32 %v248_v21, %v211_v19 }
  0xe8   :  { %v250_v24 = vpop.f32.mrf.mxu0 }
  0xe9   :  { %v203_v25 = vmax.f32 %v197_v23, 0.0  ;;  %v251_v26 = vadd.f32 %v250_v24, %v249_v22 }
  0xeb   :  { %205 = vst [vmem:[%s357_s3] sm:$0xff] %v203_v25  ;;  %v200_v27 = vadd.f32 %v251_v26, %v211_v19 }
  0xed   :  { %v204_v28 = vmax.f32 %v200_v27, 0.0 }
  0xef   :  { %206 = vst [vmem:[%s357_s3 + $0x8] sm:$0xff] %v204_v28 }

// kernel: simple_conv_forward.23
= control target key start
LH: loop header
LB: loop body
LE: loop exit
PB: predicated region body
PF: predicated region fallthrough
CT: control target
= control target key end

     0   :  { %s1224_s1 = inlined_call_operand.vmem [shape: bf16[1024,128], index: 1, kind: input, shape index: {}]   ;;  %s1225_s0 = inlined_call_operand.vmem [shape: bf16[16,1024], index: 0, kind: input, shape index: {}]   ;;  %s1226_s2 = inlined_call_operand.vmem [shape: f32[1,128], index: 2, kind: input, shape index: {}]   ;;  %s1227_s3 = inlined_call_operand.vmem [shape: f32[16,128], index: 3, kind: output, shape index: {}]  }
   0x1   :  { %v915_v0 = vld [vmem:[%s1224_s1 + $0x78] sm:$0xff]   ;;  %v919_v4 = vld [vmem:[%s1224_s1 + $0x70] sm:$0xff]   ;;  %v923_v8 = vld [vmem:[%s1224_s1 + $0x68] sm:$0xff]  }
   0x2   :  { %v916_v1 = vld [vmem:[%s1224_s1 + $0xf8] sm:$0xff]   ;;  %827 = vmatprep.subr.bf16.mxu0 %v915_v0  ;;  %v920_v5 = vld [vmem:[%s1224_s1 + $0xf0] sm:$0xff]   ;;  %v924_v9 = vld [vmem:[%s1224_s1 + $0xe8] sm:$0xff]  }
   0x3   :  { %v917_v2 = vld [vmem:[%s1224_s1 + $0x38] sm:$0xff]   ;;  %849 = vmatprep.subr.bf16.mxu1 %v916_v1  ;;  %v921_v6 = vld [vmem:[%s1224_s1 + $0x30] sm:$0xff]   ;;  %v925_v10 = vld [vmem:[%s1224_s1 + $0x28] sm:$0xff]  }
   0x4   :  { %v918_v3 = vld [vmem:[%s1224_s1 + $0xb8] sm:$0xff]   ;;  %828 = vmatpush3.bf16.msra.mxu0 %v917_v2  ;;  %v922_v7 = vld [vmem:[%s1224_s1 + $0xb0] sm:$0xff]   ;;  %v926_v11 = vld [vmem:[%s1224_s1 + $0xa8] sm:$0xff]  }
   0x5   :  { %850 = vmatpush3.bf16.msra.mxu1 %v918_v3  ;;  %829 = vmatprep.subr.bf16.mxu0 %v919_v4  ;;  %v927_v12 = vld [vmem:[%s1224_s1 + $0x60] sm:$0xff]   ;;  %v931_v16 = vld [vmem:[%s1224_s1 + $0x58] sm:$0xff]   ;;  %v935_v20 = vld [vmem:[%s1224_s1 + $0x50] sm:$0xff]  }
   0x6   :  { %851 = vmatprep.subr.bf16.mxu1 %v920_v5  ;;  %v928_v13 = vld [vmem:[%s1224_s1 + $0xe0] sm:$0xff]   ;;  %v932_v17 = vld [vmem:[%s1224_s1 + $0xd8] sm:$0xff]   ;;  %v936_v21 = vld [vmem:[%s1224_s1 + $0xd0] sm:$0xff]  }
   0x7   :  { %v929_v14 = vld [vmem:[%s1224_s1 + $0x20] sm:$0xff]   ;;  %v933_v18 = vld [vmem:[%s1224_s1 + $0x18] sm:$0xff]   ;;  %v937_v22 = vld [vmem:[%s1224_s1 + $0x10] sm:$0xff]  }
   0x8   :  { %830 = vmatpush3.bf16.msra.mxu0 %v921_v6  ;;  %v930_v15 = vld [vmem:[%s1224_s1 + $0xa0] sm:$0xff]   ;;  %v934_v19 = vld [vmem:[%s1224_s1 + $0x98] sm:$0xff]   ;;  %v938_v23 = vld [vmem:[%s1224_s1 + $0x90] sm:$0xff]  }
   0x9   :  { %852 = vmatpush3.bf16.msra.mxu1 %v922_v7  ;;  %831 = vmatprep.subr.bf16.mxu0 %v923_v8  ;;  %v939_v24 = vld [vmem:[%s1224_s1 + $0x48] sm:$0xff]   ;;  %v943_v28 = vld [vmem:[%s1224_s1 + $0x40] sm:$0xff]   ;;  %v947_v40 = vld [vmem:[%s1224_s1 + $0x178] sm:$0xff]  }
   0xa   :  { %853 = vmatprep.subr.bf16.mxu1 %v924_v9  ;;  %v940_v25 = vld [vmem:[%s1224_s1 + $0xc8] sm:$0xff]   ;;  %v944_v29 = vld [vmem:[%s1224_s1 + $0xc0] sm:$0xff]   ;;  %v948_v41 = vld [vmem:[%s1224_s1 + $0x1f8] sm:$0xff]  }
   0xb   :  { %v941_v26 = vld [vmem:[%s1224_s1 + $0x8] sm:$0xff]   ;;  %v945_v30 = vld [vmem:[%s1224_s1] sm:$0xff]   ;;  %v949_v42 = vld [vmem:[%s1224_s1 + $0x138] sm:$0xff]  }
   0xc   :  { %832 = vmatpush3.bf16.msra.mxu0 %v925_v10  ;;  %v942_v27 = vld [vmem:[%s1224_s1 + $0x88] sm:$0xff]   ;;  %v946_v31 = vld [vmem:[%s1224_s1 + $0x80] sm:$0xff]   ;;  %v950_v43 = vld [vmem:[%s1224_s1 + $0x1b8] sm:$0xff]  }
   0xd   :  { %854 = vmatpush3.bf16.msra.mxu1 %v926_v11  ;;  %833 = vmatprep.subr.bf16.mxu0 %v927_v12  ;;  %v15_v32 = vld [vmem:[%s1225_s0] sm:$0xff]  ;;  %v16_v34 = vld [vmem:[%s1225_s0 + $0x8] sm:$0xff]  ;;  %v951_v44 = vld [vmem:[%s1224_s1 + $0x170] sm:$0xff]  }
   0xe   :  { %855 = vmatprep.subr.bf16.mxu1 %v928_v13  ;;  %v19_v33 = vld [vmem:[%s1225_s0 + $0x20] sm:$0xff]  ;;  %v20_v37 = vld [vmem:[%s1225_s0 + $0x28] sm:$0xff]  ;;  %v952_v45 = vld [vmem:[%s1224_s1 + $0x1f0] sm:$0xff]  }
   0xf   :  { %v755_v35 = vcombine.low %v15_v32, %v19_v33  ;;  %v756_v36 = vcombine.high %v15_v32, %v19_v33  ;;  %v757_v38 = vcombine.low %v16_v34, %v20_v37  ;;  %v758_v39 = vcombine.high %v16_v34, %v20_v37  ;;  %v953_v46 = vld [vmem:[%s1224_s1 + $0x130] sm:$0xff]   ;;  %v955_v48 = vld [vmem:[%s1224_s1 + $0x168] sm:$0xff]   ;;  %v959_v52 = vld [vmem:[%s1224_s1 + $0x160] sm:$0xff]  }
  0x10   :  { %834 = vmatpush3.bf16.msra.mxu0 %v929_v14  ;;  %v954_v47 = vld [vmem:[%s1224_s1 + $0x1b0] sm:$0xff]   ;;  %v956_v49 = vld [vmem:[%s1224_s1 + $0x1e8] sm:$0xff]   ;;  %v960_v53 = vld [vmem:[%s1224_s1 + $0x1e0] sm:$0xff]  }
  0x11   :  { %856 = vmatpush3.bf16.msra.mxu1 %v930_v15  ;;  %835 = vmatprep.subr.bf16.mxu0 %v931_v16  ;;  %v957_v50 = vld [vmem:[%s1224_s1 + $0x128] sm:$0xff]   ;;  %v961_v54 = vld [vmem:[%s1224_s1 + $0x120] sm:$0xff]   ;;  %v963_v56 = vld [vmem:[%s1224_s1 + $0x158] sm:$0xff]  }
  0x12   :  { %857 = vmatprep.subr.bf16.mxu1 %v932_v17  ;;  %614 = vmatprep.mubr.bf16.mxu0 %v756_v36  ;;  %v958_v51 = vld [vmem:[%s1224_s1 + $0x1a8] sm:$0xff]   ;;  %v962_v55 = vld [vmem:[%s1224_s1 + $0x1a0] sm:$0xff]   ;;  %v964_v57 = vld [vmem:[%s1224_s1 + $0x1d8] sm:$0xff]  }
  0x13   :  { %655 = vmatprep.mubr.bf16.mxu1 %v758_v39  ;;  %v965_v58 = vld [vmem:[%s1224_s1 + $0x118] sm:$0xff]   ;;  %v967_v60 = vld [vmem:[%s1224_s1 + $0x150] sm:$0xff]   ;;  %v971_v0 = vld [vmem:[%s1224_s1 + $0x148] sm:$0xff]  }
  0x14   :  { %836 = vmatpush3.bf16.msra.mxu0 %v933_v18  ;;  %v966_v59 = vld [vmem:[%s1224_s1 + $0x198] sm:$0xff]   ;;  %v968_v61 = vld [vmem:[%s1224_s1 + $0x1d0] sm:$0xff]   ;;  %v972_v1 = vld [vmem:[%s1224_s1 + $0x1c8] sm:$0xff]  }
  0x15   :  { %858 = vmatpush3.bf16.msra.mxu1 %v934_v19  ;;  %837 = vmatprep.subr.bf16.mxu0 %v935_v20  ;;  %v969_v62 = vld [vmem:[%s1224_s1 + $0x110] sm:$0xff]   ;;  %v973_v2 = vld [vmem:[%s1224_s1 + $0x108] sm:$0xff]   ;;  %v975_v4 = vld [vmem:[%s1224_s1 + $0x140] sm:$0xff]  }
  0x16   :  { %859 = vmatprep.subr.bf16.mxu1 %v936_v21  ;;  %v970_v63 = vld [vmem:[%s1224_s1 + $0x190] sm:$0xff]   ;;  %v974_v3 = vld [vmem:[%s1224_s1 + $0x188] sm:$0xff]   ;;  %v976_v5 = vld [vmem:[%s1224_s1 + $0x1c0] sm:$0xff]  }
  0x17   :  { %v977_v6 = vld [vmem:[%s1224_s1 + $0x100] sm:$0xff]   ;;  %v17_v8 = vld [vmem:[%s1225_s0 + $0x10] sm:$0xff]  ;;  %v18_v12 = vld [vmem:[%s1225_s0 + $0x18] sm:$0xff] }
  0x18   :  { %838 = vmatpush3.bf16.msra.mxu0 %v937_v22  ;;  %v978_v7 = vld [vmem:[%s1224_s1 + $0x180] sm:$0xff]   ;;  %v21_v9 = vld [vmem:[%s1225_s0 + $0x30] sm:$0xff]  ;;  %v22_v13 = vld [vmem:[%s1225_s0 + $0x38] sm:$0xff] }
  0x19   :  { %860 = vmatpush3.bf16.msra.mxu1 %v938_v23  ;;  %839 = vmatprep.subr.bf16.mxu0 %v939_v24  ;;  %v759_v10 = vcombine.low %v17_v8, %v21_v9  ;;  %v760_v11 = vcombine.high %v17_v8, %v21_v9  ;;  %v761_v14 = vcombine.low %v18_v12, %v22_v13  ;;  %v754_v23 = vld [vmem:[%s1226_s2] ss:$0 sm:$0xff] }
  0x1a   :  { %861 = vmatprep.subr.bf16.mxu1 %v940_v25  ;;  %v762_v15 = vcombine.high %v18_v12, %v22_v13 }
  0x1c   :  { %840 = vmatpush3.bf16.msra.mxu0 %v941_v26 }
  0x1d   :  { %862 = vmatpush3.bf16.msra.mxu1 %v942_v27  ;;  %841 = vmatprep.subr.bf16.mxu0 %v943_v28 }
  0x1e   :  { %863 = vmatprep.subr.bf16.mxu1 %v944_v29 }
  0x20   :  { %842 = vmatpush3.bf16.msra.mxu0 %v945_v30 }
  0x21   :  { %864 = vmatpush3.bf16.msra.mxu1 %v946_v31  ;;  %871 = vmatprep.subr.bf16.mxu0 %v947_v40 }
  0x22   :  { %893 = vmatprep.subr.bf16.mxu1 %v948_v41 }
  0x23   :  { %615 = vmatmul.mubr.bf16.vlgmr.msra.gmra.mxu0 %v755_v35 }
  0x24   :  { %656 = vmatmul.mubr.bf16.vlgmr.msra.gmra.mxu1 %v757_v38  ;;  %872 = vmatpush3.bf16.msra.mxu0 %v949_v42 }
  0x25   :  { %894 = vmatpush3.bf16.msra.mxu1 %v950_v43  ;;  %873 = vmatprep.subr.bf16.mxu0 %v951_v44 }
  0x26   :  { %895 = vmatprep.subr.bf16.mxu1 %v952_v45  ;;  %696 = vmatprep.mubr.bf16.mxu0 %v760_v11 }
  0x27   :  { %737 = vmatprep.mubr.bf16.mxu1 %v762_v15 }
  0x28   :  { %874 = vmatpush3.bf16.msra.mxu0 %v953_v46 }
  0x29   :  { %896 = vmatpush3.bf16.msra.mxu1 %v954_v47  ;;  %875 = vmatprep.subr.bf16.mxu0 %v955_v48 }
  0x2a   :  { %897 = vmatprep.subr.bf16.mxu1 %v956_v49 }
  0x2c   :  { %876 = vmatpush3.bf16.msra.mxu0 %v957_v50 }
  0x2d   :  { %898 = vmatpush3.bf16.msra.mxu1 %v958_v51  ;;  %877 = vmatprep.subr.bf16.mxu0 %v959_v52 }
  0x2e   :  { %899 = vmatprep.subr.bf16.mxu1 %v960_v53 }
  0x30   :  { %878 = vmatpush3.bf16.msra.mxu0 %v961_v54 }
  0x31   :  { %900 = vmatpush3.bf16.msra.mxu1 %v962_v55  ;;  %879 = vmatprep.subr.bf16.mxu0 %v963_v56 }
  0x32   :  { %901 = vmatprep.subr.bf16.mxu1 %v964_v57 }
  0x34   :  { %880 = vmatpush3.bf16.msra.mxu0 %v965_v58 }
  0x35   :  { %902 = vmatpush3.bf16.msra.mxu1 %v966_v59  ;;  %881 = vmatprep.subr.bf16.mxu0 %v967_v60 }
  0x36   :  { %903 = vmatprep.subr.bf16.mxu1 %v968_v61 }
  0x38   :  { %882 = vmatpush3.bf16.msra.mxu0 %v969_v62 }
  0x39   :  { %904 = vmatpush3.bf16.msra.mxu1 %v970_v63  ;;  %883 = vmatprep.subr.bf16.mxu0 %v971_v0 }
  0x3a   :  { %905 = vmatprep.subr.bf16.mxu1 %v972_v1 }
  0x3c   :  { %884 = vmatpush3.bf16.msra.mxu0 %v973_v2 }
  0x3d   :  { %906 = vmatpush3.bf16.msra.mxu1 %v974_v3  ;;  %885 = vmatprep.subr.bf16.mxu0 %v975_v4 }
  0x3e   :  { %907 = vmatprep.subr.bf16.mxu1 %v976_v5 }
  0x40   :  { %886 = vmatpush3.bf16.msra.mxu0 %v977_v6 }
  0x41   :  { %908 = vmatpush3.bf16.msra.mxu1 %v978_v7 }
  0x43   :  { %697 = vmatmul.mubr.bf16.vlgmr.msra.gmra.mxu0 %v759_v10 }
  0x44   :  { %738 = vmatmul.mubr.bf16.vlgmr.msra.gmra.mxu1 %v761_v14 }
  0xe3   :  { %v843_v16 = vpop.f32.mrf.mxu0 }
  0xe4   :  { %v865_v17 = vpop.f32.mrf.mxu1 }
  0xe5   :  { %v844_v18 = vpop.f32.mrf.mxu0 }
  0xe6   :  { %v866_v19 = vpop.f32.mrf.mxu1  ;;  %v845_v21 = vadd.f32 %v844_v18, %v843_v16 }
  0xe7   :  { %v846_v20 = vpop.f32.mrf.mxu0  ;;  %v867_v26 = vadd.f32 %v866_v19, %v865_v17 }
  0xe8   :  { %v868_v22 = vpop.f32.mrf.mxu1  ;;  %v617_v25 = vadd.f32 %v845_v21, %v754_v23 }
  0xe9   :  { %v847_v24 = vpop.f32.mrf.mxu0 }
  0xea   :  { %v848_v27 = vadd.f32 %v847_v24, %v846_v20  ;;  %v869_v28 = vpop.f32.mrf.mxu1  ;;  %v658_v32 = vadd.f32 %v867_v26, %v617_v25 }
  0xeb   :  { %v870_v37 = vadd.f32 %v869_v28, %v868_v22 }
  0xec   :  { %v620_v33 = vadd.f32 %v848_v27, %v754_v23 }
  0xee   :  { %v661_v42 = vadd.f32 %v870_v37, %v620_v33 }
 0x103   :  { %v887_v29 = vpop.f32.mrf.mxu0 }
 0x104   :  { %v909_v30 = vpop.f32.mrf.mxu1 }
 0x105   :  { %v888_v31 = vpop.f32.mrf.mxu0 }
 0x106   :  { %v889_v34 = vadd.f32 %v888_v31, %v887_v29  ;;  %v910_v35 = vpop.f32.mrf.mxu1 }
 0x107   :  { %v890_v36 = vpop.f32.mrf.mxu0  ;;  %v911_v39 = vadd.f32 %v910_v35, %v909_v30 }
 0x108   :  { %v699_v38 = vadd.f32 %v889_v34, %v658_v32  ;;  %v912_v40 = vpop.f32.mrf.mxu1 }
 0x109   :  { %v891_v41 = vpop.f32.mrf.mxu0 }
 0x10a   :  { %v740_v43 = vadd.f32 %v911_v39, %v699_v38  ;;  %v892_v44 = vadd.f32 %v891_v41, %v890_v36  ;;  %v913_v45 = vpop.f32.mrf.mxu1 }
 0x10b   :  { %v914_v48 = vadd.f32 %v913_v45, %v912_v40 }
 0x10c   :  { %v746_v46 = vmax.f32 %v740_v43, 0.0  ;;  %v702_v47 = vadd.f32 %v892_v44, %v661_v42 }
 0x10e   :  { %748 = vst [vmem:[%s1227_s3] sm:$0xff] %v746_v46  ;;  %v743_v49 = vadd.f32 %v914_v48, %v702_v47 }
 0x110   :  { %v747_v50 = vmax.f32 %v743_v49, 0.0 }
 0x112   :  { %749 = vst [vmem:[%s1227_s3 + $0x8] sm:$0xff] %v747_v50 }

// kernel: simple_conv_forward.24
= control target key start
LH: loop header
LB: loop body
LE: loop exit
PB: predicated region body
PF: predicated region fallthrough
CT: control target
= control target key end

     0   :  { %s279_s1 = inlined_call_operand.vmem [shape: bf16[128,128], index: 1, kind: input, shape index: {}]   ;;  %s280_s0 = inlined_call_operand.vmem [shape: bf16[32,128], index: 0, kind: input, shape index: {}]   ;;  %s281_s2 = inlined_call_operand.vmem [shape: f32[1,128], index: 2, kind: input, shape index: {}]   ;;  %s282_s3 = inlined_call_operand.vmem [shape: f32[32,128], index: 3, kind: output, shape index: {}]  }
   0x1   :  { %v204_v0 = vld [vmem:[%s279_s1 + $0x38] sm:$0xff]   ;;  %v205_v1 = vld [vmem:[%s279_s1 + $0x30] sm:$0xff]   ;;  %v206_v2 = vld [vmem:[%s279_s1 + $0x28] sm:$0xff]  }
   0x2   :  { %184 = vmatprep.subr.bf16.mxu0 %v204_v0  ;;  %v207_v3 = vld [vmem:[%s279_s1 + $0x20] sm:$0xff]   ;;  %v208_v5 = vld [vmem:[%s279_s1 + $0x18] sm:$0xff]   ;;  %v209_v6 = vld [vmem:[%s279_s1 + $0x10] sm:$0xff]  }
   0x3   :  { %185 = vmatpush3.bf16.msra.mxu0 %v204_v0  ;;  %v212_v4 = vld [vmem:[%s280_s0] sm:$0xff]   ;;  %v210_v7 = vld [vmem:[%s279_s1 + $0x8] sm:$0xff]  }
   0x4   :  { %186 = vmatprep.subr.bf16.mxu0 %v205_v1  ;;  %200 = vmatprep.mubr.bf16.mxu0 %v212_v4  ;;  %v211_v8 = vld [vmem:[%s279_s1] sm:$0xff]   ;;  %v213_v9 = vld [vmem:[%s280_s0 + $0x8] sm:$0xff]  }
   0x5   :  { %v163_v10 = vld [vmem:[%s281_s2] ss:$0 sm:$0xff] }
   0x7   :  { %187 = vmatpush3.bf16.msra.mxu0 %v205_v1 }
   0x8   :  { %188 = vmatprep.subr.bf16.mxu0 %v206_v2 }
   0xb   :  { %189 = vmatpush3.bf16.msra.mxu0 %v206_v2 }
   0xc   :  { %190 = vmatprep.subr.bf16.mxu0 %v207_v3 }
   0xf   :  { %191 = vmatpush3.bf16.msra.mxu0 %v207_v3 }
  0x10   :  { %192 = vmatprep.subr.bf16.mxu0 %v208_v5 }
  0x13   :  { %193 = vmatpush3.bf16.msra.mxu0 %v208_v5 }
  0x14   :  { %194 = vmatprep.subr.bf16.mxu0 %v209_v6 }
  0x17   :  { %195 = vmatpush3.bf16.msra.mxu0 %v209_v6 }
  0x18   :  { %196 = vmatprep.subr.bf16.mxu0 %v210_v7 }
  0x1b   :  { %197 = vmatpush3.bf16.msra.mxu0 %v210_v7 }
  0x1c   :  { %198 = vmatprep.subr.bf16.mxu0 %v211_v8 }
  0x1f   :  { %199 = vmatpush3.bf16.msra.mxu0 %v211_v8 }
  0x22   :  { %201 = vmatmul.mubr.bf16.vlgmr.msra.gmra.mxu0 %v213_v9 }
  0xe2   :  { %v202_v11 = vpop.f32.mrf.mxu0 }
  0xe3   :  { %v145_v12 = vadd.f32 %v202_v11, %v163_v10 }
  0xe4   :  { %v136_v13 = vpop.f32.mrf.mxu0 }
  0xe5   :  { %v153_v14 = vmax.f32 %v145_v12, 0.0  ;;  %v137_v15 = vadd.f32 %v163_v10, %v136_v13 }
  0xe6   :  { %v203_v16 = vpop.f32.mrf.mxu0 }
  0xe7   :  { %157 = vst [vmem:[%s282_s3 + $0x10] sm:$0xff] %v153_v14  ;;  %v151_v17 = vmax.f32 %v137_v15, 0.0  ;;  %v148_v18 = vadd.f32 %v203_v16, %v163_v10 }
  0xe8   :  { %v139_v19 = vpop.f32.mrf.mxu0 }
  0xe9   :  { %155 = vst [vmem:[%s282_s3] sm:$0xff] %v151_v17  ;;  %v154_v20 = vmax.f32 %v148_v18, 0.0  ;;  %v140_v21 = vadd.f32 %v163_v10, %v139_v19 }
  0xeb   :  { %158 = vst [vmem:[%s282_s3 + $0x18] sm:$0xff] %v154_v20  ;;  %v152_v22 = vmax.f32 %v140_v21, 0.0 }
  0xed   :  { %156 = vst [vmem:[%s282_s3 + $0x8] sm:$0xff] %v152_v22 }

// kernel: simple_conv_forward.25
= control target key start
LH: loop header
LB: loop body
LE: loop exit
PB: predicated region body
PF: predicated region fallthrough
CT: control target
= control target key end

     0   :  { %s417_s1 = inlined_call_operand.vmem [shape: bf16[256,128], index: 1, kind: input, shape index: {}]   ;;  %s418_s0 = inlined_call_operand.vmem [shape: bf16[32,256], index: 0, kind: input, shape index: {}]   ;;  %s419_s2 = inlined_call_operand.vmem [shape: f32[1,128], index: 2, kind: input, shape index: {}]   ;;  %s420_s3 = inlined_call_operand.vmem [shape: f32[32,128], index: 3, kind: output, shape index: {}]  }
   0x1   :  { %v300_v0 = vld [vmem:[%s417_s1 + $0x78] sm:$0xff]   ;;  %v302_v2 = vld [vmem:[%s417_s1 + $0x70] sm:$0xff]   ;;  %v304_v4 = vld [vmem:[%s417_s1 + $0x68] sm:$0xff]  }
   0x2   :  { %v301_v1 = vld [vmem:[%s417_s1 + $0x38] sm:$0xff]   ;;  %256 = vmatprep.subr.bf16.mxu0 %v300_v0  ;;  %284 = vmatprep.subr.bf16.mxu1 %v300_v0  ;;  %v303_v3 = vld [vmem:[%s417_s1 + $0x30] sm:$0xff]   ;;  %v305_v5 = vld [vmem:[%s417_s1 + $0x28] sm:$0xff]  }
   0x3   :  { %257 = vmatpush3.bf16.msra.mxu0 %v301_v1  ;;  %292 = vmatpush3.bf16.msra.mxu1 %v301_v1  ;;  %v306_v6 = vld [vmem:[%s417_s1 + $0x60] sm:$0xff]   ;;  %v308_v8 = vld [vmem:[%s417_s1 + $0x58] sm:$0xff]   ;;  %v310_v10 = vld [vmem:[%s417_s1 + $0x50] sm:$0xff]  }
   0x4   :  { %258 = vmatprep.subr.bf16.mxu0 %v302_v2  ;;  %285 = vmatprep.subr.bf16.mxu1 %v302_v2  ;;  %v307_v7 = vld [vmem:[%s417_s1 + $0x20] sm:$0xff]   ;;  %v309_v9 = vld [vmem:[%s417_s1 + $0x18] sm:$0xff]   ;;  %v311_v13 = vld [vmem:[%s417_s1 + $0x10] sm:$0xff]  }
   0x5   :  { %v318_v11 = vld [vmem:[%s418_s0 + $0x4] ss:$8 sps:$4 sm:$0xff]   ;;  %v321_v12 = vld [vmem:[%s418_s0 + $0x14] ss:$8 sps:$4 sm:$0xff]   ;;  %v316_v18 = vld [vmem:[%s418_s0] ss:$8 sps:$4 sm:$0xff]  }
   0x6   :  { %v312_v14 = vld [vmem:[%s417_s1 + $0x48] sm:$0xff]   ;;  %206 = vmatprep.mubr.bf16.mxu0 %v318_v11  ;;  %214 = vmatprep.mubr.bf16.mxu1 %v321_v12  ;;  %v314_v16 = vld [vmem:[%s417_s1 + $0x40] sm:$0xff]   ;;  %v319_v19 = vld [vmem:[%s418_s0 + $0x10] ss:$8 sps:$4 sm:$0xff]  }
   0x7   :  { %259 = vmatpush3.bf16.msra.mxu0 %v303_v3  ;;  %293 = vmatpush3.bf16.msra.mxu1 %v303_v3  ;;  %v313_v15 = vld [vmem:[%s417_s1 + $0x8] sm:$0xff]   ;;  %v315_v17 = vld [vmem:[%s417_s1] sm:$0xff]  }
   0x8   :  { %260 = vmatprep.subr.bf16.mxu0 %v304_v4  ;;  %286 = vmatprep.subr.bf16.mxu1 %v304_v4  ;;  %v235_v22 = vld [vmem:[%s419_s2] ss:$0 sm:$0xff] }
   0xb   :  { %261 = vmatpush3.bf16.msra.mxu0 %v305_v5  ;;  %294 = vmatpush3.bf16.msra.mxu1 %v305_v5 }
   0xc   :  { %262 = vmatprep.subr.bf16.mxu0 %v306_v6  ;;  %287 = vmatprep.subr.bf16.mxu1 %v306_v6 }
   0xf   :  { %263 = vmatpush3.bf16.msra.mxu0 %v307_v7  ;;  %295 = vmatpush3.bf16.msra.mxu1 %v307_v7 }
  0x10   :  { %264 = vmatprep.subr.bf16.mxu0 %v308_v8  ;;  %288 = vmatprep.subr.bf16.mxu1 %v308_v8 }
  0x13   :  { %265 = vmatpush3.bf16.msra.mxu0 %v309_v9  ;;  %296 = vmatpush3.bf16.msra.mxu1 %v309_v9 }
  0x14   :  { %266 = vmatprep.subr.bf16.mxu0 %v310_v10  ;;  %289 = vmatprep.subr.bf16.mxu1 %v310_v10 }
  0x17   :  { %267 = vmatpush3.bf16.msra.mxu0 %v311_v13  ;;  %297 = vmatpush3.bf16.msra.mxu1 %v311_v13 }
  0x18   :  { %268 = vmatprep.subr.bf16.mxu0 %v312_v14  ;;  %290 = vmatprep.subr.bf16.mxu1 %v312_v14 }
  0x1b   :  { %269 = vmatpush3.bf16.msra.mxu0 %v313_v15  ;;  %298 = vmatpush3.bf16.msra.mxu1 %v313_v15 }
  0x1c   :  { %270 = vmatprep.subr.bf16.mxu0 %v314_v16  ;;  %291 = vmatprep.subr.bf16.mxu1 %v314_v16 }
  0x1f   :  { %271 = vmatpush3.bf16.msra.mxu0 %v315_v17  ;;  %299 = vmatpush3.bf16.msra.mxu1 %v315_v17 }
  0x22   :  { %207 = vmatmul.mubr.bf16.vlgmr.msra.gmra.mxu0 %v316_v18  ;;  %215 = vmatmul.mubr.bf16.vlgmr.msra.gmra.mxu1 %v319_v19 }
  0xe2   :  { %v272_v20 = vpop.f32.mrf.mxu0  ;;  %v278_v21 = vpop.f32.mrf.mxu1 }
  0xe4   :  { %v273_v23 = vpop.f32.mrf.mxu0  ;;  %v279_v24 = vpop.f32.mrf.mxu1 }
  0xe5   :  { %v274_v25 = vadd.f32 %v273_v23, %v272_v20  ;;  %v280_v26 = vadd.f32 %v279_v24, %v278_v21 }
  0xe6   :  { %v275_v27 = vpop.f32.mrf.mxu0  ;;  %v281_v28 = vpop.f32.mrf.mxu1 }
  0xe7   :  { %v209_v29 = vadd.f32 %v274_v25, %v235_v22  ;;  %v217_v30 = vadd.f32 %v280_v26, %v235_v22 }
  0xe8   :  { %v276_v31 = vpop.f32.mrf.mxu0  ;;  %v282_v32 = vpop.f32.mrf.mxu1 }
  0xe9   :  { %v223_v33 = vmax.f32 %v209_v29, 0.0  ;;  %v225_v34 = vmax.f32 %v217_v30, 0.0  ;;  %v277_v35 = vadd.f32 %v276_v31, %v275_v27  ;;  %v283_v36 = vadd.f32 %v282_v32, %v281_v28 }
  0xeb   :  { %227 = vst [vmem:[%s420_s3] sm:$0xff] %v223_v33  ;;  %229 = vst [vmem:[%s420_s3 + $0x10] sm:$0xff] %v225_v34  ;;  %v212_v37 = vadd.f32 %v277_v35, %v235_v22  ;;  %v220_v38 = vadd.f32 %v283_v36, %v235_v22 }
  0xed   :  { %v224_v39 = vmax.f32 %v212_v37, 0.0  ;;  %v226_v40 = vmax.f32 %v220_v38, 0.0 }
  0xef   :  { %228 = vst [vmem:[%s420_s3 + $0x8] sm:$0xff] %v224_v39  ;;  %230 = vst [vmem:[%s420_s3 + $0x18] sm:$0xff] %v226_v40 }

// kernel: simple_conv_forward.27
= control target key start
LH: loop header
LB: loop body
LE: loop exit
PB: predicated region body
PF: predicated region fallthrough
CT: control target
= control target key end

     0   :  { %s732_s1 = inlined_call_operand.vmem [shape: bf16[512,128], index: 1, kind: input, shape index: {}]   ;;  %s733_s0 = inlined_call_operand.vmem [shape: bf16[32,512], index: 0, kind: input, shape index: {}]   ;;  %s734_s2 = inlined_call_operand.vmem [shape: f32[1,128], index: 2, kind: input, shape index: {}]   ;;  %s735_s3 = inlined_call_operand.vmem [shape: f32[32,128], index: 3, kind: output, shape index: {}]  }
   0x1   :  { %v533_v0 = vld [vmem:[%s732_s1 + $0x78] sm:$0xff]   ;;  %v537_v4 = vld [vmem:[%s732_s1 + $0x70] sm:$0xff]   ;;  %v541_v8 = vld [vmem:[%s732_s1 + $0x68] sm:$0xff]  }
   0x2   :  { %v534_v1 = vld [vmem:[%s732_s1 + $0xf8] sm:$0xff]   ;;  %477 = vmatprep.subr.bf16.mxu0 %v533_v0  ;;  %v538_v5 = vld [vmem:[%s732_s1 + $0xf0] sm:$0xff]   ;;  %v542_v9 = vld [vmem:[%s732_s1 + $0xe8] sm:$0xff]  }
   0x3   :  { %v535_v2 = vld [vmem:[%s732_s1 + $0x38] sm:$0xff]   ;;  %505 = vmatprep.subr.bf16.mxu1 %v534_v1  ;;  %v539_v6 = vld [vmem:[%s732_s1 + $0x30] sm:$0xff]   ;;  %v543_v10 = vld [vmem:[%s732_s1 + $0x28] sm:$0xff]  }
   0x4   :  { %v536_v3 = vld [vmem:[%s732_s1 + $0xb8] sm:$0xff]   ;;  %478 = vmatpush3.bf16.msra.mxu0 %v535_v2  ;;  %v540_v7 = vld [vmem:[%s732_s1 + $0xb0] sm:$0xff]   ;;  %v544_v11 = vld [vmem:[%s732_s1 + $0xa8] sm:$0xff]  }
   0x5   :  { %506 = vmatpush3.bf16.msra.mxu1 %v536_v3  ;;  %479 = vmatprep.subr.bf16.mxu0 %v537_v4  ;;  %v545_v12 = vld [vmem:[%s732_s1 + $0x60] sm:$0xff]   ;;  %v549_v16 = vld [vmem:[%s732_s1 + $0x58] sm:$0xff]   ;;  %v553_v20 = vld [vmem:[%s732_s1 + $0x50] sm:$0xff]  }
   0x6   :  { %507 = vmatprep.subr.bf16.mxu1 %v538_v5  ;;  %v546_v13 = vld [vmem:[%s732_s1 + $0xe0] sm:$0xff]   ;;  %v550_v17 = vld [vmem:[%s732_s1 + $0xd8] sm:$0xff]   ;;  %v554_v21 = vld [vmem:[%s732_s1 + $0xd0] sm:$0xff]  }
   0x7   :  { %v547_v14 = vld [vmem:[%s732_s1 + $0x20] sm:$0xff]   ;;  %v551_v18 = vld [vmem:[%s732_s1 + $0x18] sm:$0xff]   ;;  %v555_v22 = vld [vmem:[%s732_s1 + $0x10] sm:$0xff]  }
   0x8   :  { %480 = vmatpush3.bf16.msra.mxu0 %v539_v6  ;;  %v548_v15 = vld [vmem:[%s732_s1 + $0xa0] sm:$0xff]   ;;  %v552_v19 = vld [vmem:[%s732_s1 + $0x98] sm:$0xff]   ;;  %v556_v23 = vld [vmem:[%s732_s1 + $0x90] sm:$0xff]  }
   0x9   :  { %508 = vmatpush3.bf16.msra.mxu1 %v540_v7  ;;  %481 = vmatprep.subr.bf16.mxu0 %v541_v8  ;;  %v557_v24 = vld [vmem:[%s732_s1 + $0x48] sm:$0xff]   ;;  %v561_v28 = vld [vmem:[%s732_s1 + $0x40] sm:$0xff]  }
   0xa   :  { %509 = vmatprep.subr.bf16.mxu1 %v542_v9  ;;  %v558_v25 = vld [vmem:[%s732_s1 + $0xc8] sm:$0xff]   ;;  %v562_v29 = vld [vmem:[%s732_s1 + $0xc0] sm:$0xff]  }
   0xb   :  { %v559_v26 = vld [vmem:[%s732_s1 + $0x8] sm:$0xff]   ;;  %v563_v30 = vld [vmem:[%s732_s1] sm:$0xff]  }
   0xc   :  { %482 = vmatpush3.bf16.msra.mxu0 %v543_v10  ;;  %v560_v27 = vld [vmem:[%s732_s1 + $0x88] sm:$0xff]   ;;  %v564_v31 = vld [vmem:[%s732_s1 + $0x80] sm:$0xff]  }
   0xd   :  { %510 = vmatpush3.bf16.msra.mxu1 %v544_v11  ;;  %483 = vmatprep.subr.bf16.mxu0 %v545_v12  ;;  %v565_v32 = vld [vmem:[%s733_s0] ss:$16 sps:$4 sm:$0xff]   ;;  %v567_v33 = vld [vmem:[%s733_s0 + $0x4] ss:$16 sps:$4 sm:$0xff]   ;;  %v568_v34 = vld [vmem:[%s733_s0 + $0x8] ss:$16 sps:$4 sm:$0xff]  }
   0xe   :  { %511 = vmatprep.subr.bf16.mxu1 %v546_v13  ;;  %v570_v35 = vld [vmem:[%s733_s0 + $0xc] ss:$16 sps:$4 sm:$0xff]   ;;  %358 = vmatprep.mubr.bf16.mxu0 %v567_v33  ;;  %v571_v36 = vld [vmem:[%s733_s0 + $0x24] ss:$16 sps:$4 sm:$0xff]   ;;  %v575_v38 = vld [vmem:[%s733_s0 + $0x20] ss:$16 sps:$4 sm:$0xff]  }
   0xf   :  { %407 = vmatprep.mubr.bf16.mxu1 %v570_v35  ;;  %v573_v37 = vld [vmem:[%s733_s0 + $0x2c] ss:$16 sps:$4 sm:$0xff]   ;;  %v576_v39 = vld [vmem:[%s733_s0 + $0x28] ss:$16 sps:$4 sm:$0xff]   ;;  %v436_v42 = vld [vmem:[%s734_s2] ss:$0 sm:$0xff] }
  0x10   :  { %484 = vmatpush3.bf16.msra.mxu0 %v547_v14 }
  0x11   :  { %512 = vmatpush3.bf16.msra.mxu1 %v548_v15  ;;  %485 = vmatprep.subr.bf16.mxu0 %v549_v16 }
  0x12   :  { %513 = vmatprep.subr.bf16.mxu1 %v550_v17 }
  0x14   :  { %486 = vmatpush3.bf16.msra.mxu0 %v551_v18 }
  0x15   :  { %514 = vmatpush3.bf16.msra.mxu1 %v552_v19  ;;  %487 = vmatprep.subr.bf16.mxu0 %v553_v20 }
  0x16   :  { %515 = vmatprep.subr.bf16.mxu1 %v554_v21 }
  0x18   :  { %488 = vmatpush3.bf16.msra.mxu0 %v555_v22 }
  0x19   :  { %516 = vmatpush3.bf16.msra.mxu1 %v556_v23  ;;  %489 = vmatprep.subr.bf16.mxu0 %v557_v24 }
  0x1a   :  { %517 = vmatprep.subr.bf16.mxu1 %v558_v25 }
  0x1c   :  { %490 = vmatpush3.bf16.msra.mxu0 %v559_v26 }
  0x1d   :  { %518 = vmatpush3.bf16.msra.mxu1 %v560_v27  ;;  %491 = vmatprep.subr.bf16.mxu0 %v561_v28 }
  0x1e   :  { %519 = vmatprep.subr.bf16.mxu1 %v562_v29 }
  0x20   :  { %492 = vmatpush3.bf16.msra.mxu0 %v563_v30 }
  0x21   :  { %520 = vmatpush3.bf16.msra.mxu1 %v564_v31 }
  0x23   :  { %359 = vmatmul.mubr.bf16.vlgmr.msra.gmra.mxu0 %v565_v32 }
  0x24   :  { %408 = vmatmul.mubr.bf16.vlgmr.msra.gmra.mxu1 %v568_v34  ;;  %366 = vmatprep.mubr.bf16.mxu0 %v571_v36 }
  0x25   :  { %415 = vmatprep.mubr.bf16.mxu1 %v573_v37 }
  0x2b   :  { %367 = vmatmul.mubr.bf16.gmra.mxu0 %v575_v38 }
  0x2c   :  { %416 = vmatmul.mubr.bf16.gmra.mxu1 %v576_v39 }
  0xe3   :  { %v493_v40 = vpop.f32.mrf.mxu0 }
  0xe4   :  { %v521_v41 = vpop.f32.mrf.mxu1 }
  0xe5   :  { %v494_v43 = vpop.f32.mrf.mxu0 }
  0xe6   :  { %v495_v44 = vadd.f32 %v494_v43, %v493_v40  ;;  %v522_v45 = vpop.f32.mrf.mxu1 }
  0xe7   :  { %v496_v46 = vpop.f32.mrf.mxu0  ;;  %v523_v48 = vadd.f32 %v522_v45, %v521_v41 }
  0xe8   :  { %v361_v47 = vadd.f32 %v495_v44, %v436_v42  ;;  %v524_v49 = vpop.f32.mrf.mxu1 }
  0xe9   :  { %v497_v50 = vpop.f32.mrf.mxu0 }
  0xea   :  { %v410_v51 = vadd.f32 %v523_v48, %v361_v47  ;;  %v498_v52 = vadd.f32 %v497_v50, %v496_v46  ;;  %v525_v53 = vpop.f32.mrf.mxu1 }
  0xeb   :  { %v499_v54 = vpop.f32.mrf.mxu0  ;;  %v526_v57 = vadd.f32 %v525_v53, %v524_v49 }
  0xec   :  { %v424_v55 = vmax.f32 %v410_v51, 0.0  ;;  %v364_v56 = vadd.f32 %v498_v52, %v436_v42  ;;  %v527_v58 = vpop.f32.mrf.mxu1 }
  0xed   :  { %v500_v59 = vpop.f32.mrf.mxu0 }
  0xee   :  { %428 = vst [vmem:[%s735_s3] sm:$0xff] %v424_v55  ;;  %v413_v60 = vadd.f32 %v526_v57, %v364_v56  ;;  %v501_v61 = vadd.f32 %v500_v59, %v499_v54  ;;  %v528_v62 = vpop.f32.mrf.mxu1 }
  0xef   :  { %v502_v63 = vpop.f32.mrf.mxu0  ;;  %v529_v2 = vadd.f32 %v528_v62, %v527_v58 }
  0xf0   :  { %v425_v0 = vmax.f32 %v413_v60, 0.0  ;;  %v369_v1 = vadd.f32 %v501_v61, %v436_v42  ;;  %v530_v3 = vpop.f32.mrf.mxu1 }
  0xf1   :  { %v503_v4 = vpop.f32.mrf.mxu0 }
  0xf2   :  { %429 = vst [vmem:[%s735_s3 + $0x8] sm:$0xff] %v425_v0  ;;  %v418_v5 = vadd.f32 %v529_v2, %v369_v1  ;;  %v504_v6 = vadd.f32 %v503_v4, %v502_v63  ;;  %v531_v7 = vpop.f32.mrf.mxu1 }
  0xf3   :  { %v532_v10 = vadd.f32 %v531_v7, %v530_v3 }
  0xf4   :  { %v426_v8 = vmax.f32 %v418_v5, 0.0  ;;  %v372_v9 = vadd.f32 %v504_v6, %v436_v42 }
  0xf6   :  { %430 = vst [vmem:[%s735_s3 + $0x10] sm:$0xff] %v426_v8  ;;  %v421_v11 = vadd.f32 %v532_v10, %v372_v9 }
  0xf8   :  { %v427_v12 = vmax.f32 %v421_v11, 0.0 }
  0xfa   :  { %431 = vst [vmem:[%s735_s3 + $0x18] sm:$0xff] %v427_v12 }

// kernel: simple_conv_forward.29
= control target key start
LH: loop header
LB: loop body
LE: loop exit
PB: predicated region body
PF: predicated region fallthrough
CT: control target
= control target key end

     0   :  { %s659_s1 = inlined_call_operand.vmem [shape: bf16[128,128], index: 1, kind: input, shape index: {}]   ;;  %s660_s0 = inlined_call_operand.vmem [shape: bf16[128,128], index: 0, kind: input, shape index: {}]   ;;  %s661_s2 = inlined_call_operand.vmem [shape: f32[1,128], index: 2, kind: input, shape index: {}]   ;;  %s662_s3 = inlined_call_operand.vmem [shape: f32[128,128], index: 3, kind: output, shape index: {}]  }
   0x1   :  { %v460_v0 = vld [vmem:[%s659_s1 + $0x38] sm:$0xff]   ;;  %v461_v1 = vld [vmem:[%s659_s1 + $0x30] sm:$0xff]   ;;  %v462_v2 = vld [vmem:[%s659_s1 + $0x28] sm:$0xff]  }
   0x2   :  { %412 = vmatprep.subr.bf16.mxu0 %v460_v0  ;;  %444 = vmatprep.subr.bf16.mxu1 %v460_v0  ;;  %v463_v3 = vld [vmem:[%s659_s1 + $0x20] sm:$0xff]   ;;  %v464_v6 = vld [vmem:[%s659_s1 + $0x18] sm:$0xff]   ;;  %v465_v7 = vld [vmem:[%s659_s1 + $0x10] sm:$0xff]  }
   0x3   :  { %413 = vmatpush3.bf16.msra.mxu0 %v460_v0  ;;  %452 = vmatpush3.bf16.msra.mxu1 %v460_v0  ;;  %v468_v4 = vld [vmem:[%s660_s0] sm:$0xff]   ;;  %v466_v8 = vld [vmem:[%s659_s1 + $0x8] sm:$0xff]   ;;  %v472_v12 = vld [vmem:[%s660_s0 + $0x10] sm:$0xff]  }
   0x4   :  { %414 = vmatprep.subr.bf16.mxu0 %v461_v1  ;;  %445 = vmatprep.subr.bf16.mxu1 %v461_v1  ;;  %v469_v5 = vld [vmem:[%s660_s0 + $0x20] sm:$0xff]   ;;  %v470_v10 = vld [vmem:[%s660_s0 + $0x8] sm:$0xff]   ;;  %v473_v13 = vld [vmem:[%s660_s0 + $0x30] sm:$0xff]  }
   0x5   :  { %428 = vmatprep.mubr.bf16.mxu0 %v468_v4  ;;  %436 = vmatprep.mubr.bf16.mxu1 %v469_v5  ;;  %v467_v9 = vld [vmem:[%s659_s1] sm:$0xff]   ;;  %v471_v11 = vld [vmem:[%s660_s0 + $0x28] sm:$0xff]   ;;  %v474_v14 = vld [vmem:[%s660_s0 + $0x18] sm:$0xff]  }
   0x6   :  { %v475_v15 = vld [vmem:[%s660_s0 + $0x38] sm:$0xff]   ;;  %v363_v16 = vld [vmem:[%s661_s2] ss:$0 sm:$0xff] }
   0x7   :  { %415 = vmatpush3.bf16.msra.mxu0 %v461_v1  ;;  %453 = vmatpush3.bf16.msra.mxu1 %v461_v1 }
   0x8   :  { %416 = vmatprep.subr.bf16.mxu0 %v462_v2  ;;  %446 = vmatprep.subr.bf16.mxu1 %v462_v2 }
   0xb   :  { %417 = vmatpush3.bf16.msra.mxu0 %v462_v2  ;;  %454 = vmatpush3.bf16.msra.mxu1 %v462_v2 }
   0xc   :  { %418 = vmatprep.subr.bf16.mxu0 %v463_v3  ;;  %447 = vmatprep.subr.bf16.mxu1 %v463_v3 }
   0xf   :  { %419 = vmatpush3.bf16.msra.mxu0 %v463_v3  ;;  %455 = vmatpush3.bf16.msra.mxu1 %v463_v3 }
  0x10   :  { %420 = vmatprep.subr.bf16.mxu0 %v464_v6  ;;  %448 = vmatprep.subr.bf16.mxu1 %v464_v6 }
  0x13   :  { %421 = vmatpush3.bf16.msra.mxu0 %v464_v6  ;;  %456 = vmatpush3.bf16.msra.mxu1 %v464_v6 }
  0x14   :  { %422 = vmatprep.subr.bf16.mxu0 %v465_v7  ;;  %449 = vmatprep.subr.bf16.mxu1 %v465_v7 }
  0x17   :  { %423 = vmatpush3.bf16.msra.mxu0 %v465_v7  ;;  %457 = vmatpush3.bf16.msra.mxu1 %v465_v7 }
  0x18   :  { %424 = vmatprep.subr.bf16.mxu0 %v466_v8  ;;  %450 = vmatprep.subr.bf16.mxu1 %v466_v8 }
  0x1b   :  { %425 = vmatpush3.bf16.msra.mxu0 %v466_v8  ;;  %458 = vmatpush3.bf16.msra.mxu1 %v466_v8 }
  0x1c   :  { %426 = vmatprep.subr.bf16.mxu0 %v467_v9  ;;  %451 = vmatprep.subr.bf16.mxu1 %v467_v9 }
  0x1f   :  { %427 = vmatpush3.bf16.msra.mxu0 %v467_v9  ;;  %459 = vmatpush3.bf16.msra.mxu1 %v467_v9 }
  0x22   :  { %429 = vmatmul.mubr.bf16.vlgmr.msra.gmra.mxu0 %v470_v10  ;;  %437 = vmatmul.mubr.bf16.vlgmr.msra.gmra.mxu1 %v471_v11 }
  0x23   :  { %432 = vmatprep.mubr.bf16.mxu0 %v472_v12  ;;  %440 = vmatprep.mubr.bf16.mxu1 %v473_v13 }
  0x2a   :  { %433 = vmatmul.mubr.bf16.gmra.mxu0 %v474_v14  ;;  %441 = vmatmul.mubr.bf16.gmra.mxu1 %v475_v15 }
  0xe2   :  { %v430_v17 = vpop.f32.mrf.mxu0  ;;  %v438_v18 = vpop.f32.mrf.mxu1 }
  0xe3   :  { %v193_v19 = vadd.f32 %v430_v17, %v363_v16  ;;  %v225_v20 = vadd.f32 %v438_v18, %v363_v16 }
  0xe4   :  { %v184_v21 = vpop.f32.mrf.mxu0  ;;  %v216_v22 = vpop.f32.mrf.mxu1 }
  0xe5   :  { %v382_v23 = vmul.f32 -1.442695, %v193_v19  ;;  %v390_v24 = vmul.f32 -1.442695, %v225_v20  ;;  %v185_v25 = vadd.f32 %v363_v16, %v184_v21  ;;  %v217_v26 = vadd.f32 %v363_v16, %v216_v22 }
  0xe6   :  { %v431_v27 = vpop.f32.mrf.mxu0  ;;  %v439_v28 = vpop.f32.mrf.mxu1 }
  0xe7   :  { %476 = vpow2.f32 %v382_v23  ;;  %v380_v29 = vmul.f32 -1.442695, %v185_v25  ;;  %v388_v30 = vmul.f32 -1.442695, %v217_v26  ;;  %v196_v31 = vadd.f32 %v431_v27, %v363_v16 }
  0xe8   :  { %478 = vpow2.f32 %v390_v24  ;;  %v228_v32 = vadd.f32 %v439_v28, %v363_v16  ;;  %v187_v33 = vpop.f32.mrf.mxu0  ;;  %v219_v34 = vpop.f32.mrf.mxu1 }
  0xe9   :  { %480 = vpow2.f32 %v380_v29  ;;  %v383_v35 = vmul.f32 -1.442695, %v196_v31  ;;  %v188_v36 = vadd.f32 %v363_v16, %v187_v33  ;;  %v220_v37 = vadd.f32 %v363_v16, %v219_v34 }
  0xea   :  { %482 = vpow2.f32 %v388_v30  ;;  %v391_v38 = vmul.f32 -1.442695, %v228_v32  ;;  %v434_v39 = vpop.f32.mrf.mxu0  ;;  %v442_v40 = vpop.f32.mrf.mxu1 }
  0xeb   :  { %484 = vpow2.f32 %v383_v35  ;;  %v381_v41 = vmul.f32 -1.442695, %v188_v36  ;;  %v389_v42 = vmul.f32 -1.442695, %v220_v37  ;;  %v209_v43 = vadd.f32 %v434_v39, %v363_v16 }
  0xec   :  { %486 = vpow2.f32 %v391_v38  ;;  %v241_v44 = vadd.f32 %v442_v40, %v363_v16  ;;  %v200_v45 = vpop.f32.mrf.mxu0  ;;  %v232_v46 = vpop.f32.mrf.mxu1 }
  0xed   :  { %488 = vpow2.f32 %v381_v41  ;;  %v386_v47 = vmul.f32 -1.442695, %v209_v43  ;;  %v201_v48 = vadd.f32 %v363_v16, %v200_v45  ;;  %v233_v49 = vadd.f32 %v363_v16, %v232_v46 }
  0xee   :  { %490 = vpow2.f32 %v389_v42  ;;  %v394_v50 = vmul.f32 -1.442695, %v241_v44  ;;  %v435_v51 = vpop.f32.mrf.mxu0  ;;  %v443_v52 = vpop.f32.mrf.mxu1 }
  0xef   :  { %492 = vpow2.f32 %v386_v47  ;;  %v384_v53 = vmul.f32 -1.442695, %v201_v48  ;;  %v392_v54 = vmul.f32 -1.442695, %v233_v49  ;;  %v212_v55 = vadd.f32 %v435_v51, %v363_v16 }
  0xf0   :  { %494 = vpow2.f32 %v394_v50  ;;  %v244_v56 = vadd.f32 %v443_v52, %v363_v16  ;;  %v203_v57 = vpop.f32.mrf.mxu0  ;;  %v235_v58 = vpop.f32.mrf.mxu1 }
  0xf1   :  { %496 = vpow2.f32 %v384_v53  ;;  %v387_v59 = vmul.f32 -1.442695, %v212_v55  ;;  %v204_v60 = vadd.f32 %v363_v16, %v203_v57  ;;  %v236_v61 = vadd.f32 %v363_v16, %v235_v58 }
  0xf2   :  { %498 = vpow2.f32 %v392_v54  ;;  %v395_v62 = vmul.f32 -1.442695, %v244_v56 }
  0xf3   :  { %500 = vpow2.f32 %v387_v59  ;;  %v385_v63 = vmul.f32 -1.442695, %v204_v60  ;;  %v393_v0 = vmul.f32 -1.442695, %v236_v61 }
  0xf4   :  { %v477_v1 = vpop.eup %476  ;;  %502 = vpow2.f32 %v395_v62 }
  0xf5   :  { %v479_v2 = vpop.eup %478  ;;  %v297_v3 = vadd.f32 1.0, %v477_v1  ;;  %504 = vpow2.f32 %v385_v63 }
  0xf6   :  { %v481_v4 = vpop.eup %480  ;;  %v305_v5 = vadd.f32 1.0, %v479_v2  ;;  %506 = vpow2.f32 %v393_v0 }
  0xf7   :  { %v483_v6 = vpop.eup %482  ;;  %508 = vrcp.f32 %v297_v3  ;;  %v295_v7 = vadd.f32 1.0, %v481_v4 }
  0xf8   :  { %v485_v8 = vpop.eup %484  ;;  %510 = vrcp.f32 %v305_v5  ;;  %v303_v9 = vadd.f32 1.0, %v483_v6 }
  0xf9   :  { %v487_v10 = vpop.eup %486  ;;  %512 = vrcp.f32 %v295_v7  ;;  %v298_v11 = vadd.f32 1.0, %v485_v8 }
  0xfa   :  { %v489_v12 = vpop.eup %488  ;;  %514 = vrcp.f32 %v303_v9  ;;  %v306_v13 = vadd.f32 1.0, %v487_v10 }
  0xfb   :  { %v491_v14 = vpop.eup %490  ;;  %516 = vrcp.f32 %v298_v11  ;;  %v296_v15 = vadd.f32 1.0, %v489_v12 }
  0xfc   :  { %v493_v16 = vpop.eup %492  ;;  %518 = vrcp.f32 %v306_v13  ;;  %v304_v17 = vadd.f32 1.0, %v491_v14 }
  0xfd   :  { %v495_v18 = vpop.eup %494  ;;  %520 = vrcp.f32 %v296_v15  ;;  %v301_v19 = vadd.f32 1.0, %v493_v16 }
  0xfe   :  { %v497_v20 = vpop.eup %496  ;;  %522 = vrcp.f32 %v304_v17  ;;  %v309_v21 = vadd.f32 1.0, %v495_v18 }
  0xff   :  { %v499_v22 = vpop.eup %498  ;;  %524 = vrcp.f32 %v301_v19  ;;  %v299_v23 = vadd.f32 1.0, %v497_v20 }
 0x100   :  { %v501_v24 = vpop.eup %500  ;;  %526 = vrcp.f32 %v309_v21  ;;  %v307_v25 = vadd.f32 1.0, %v499_v22 }
 0x101   :  { %v503_v26 = vpop.eup %502  ;;  %528 = vrcp.f32 %v299_v23  ;;  %v302_v27 = vadd.f32 1.0, %v501_v24 }
 0x102   :  { %v505_v28 = vpop.eup %504  ;;  %530 = vrcp.f32 %v307_v25  ;;  %v310_v29 = vadd.f32 1.0, %v503_v26 }
 0x103   :  { %v507_v30 = vpop.eup %506  ;;  %532 = vrcp.f32 %v302_v27  ;;  %v300_v31 = vadd.f32 1.0, %v505_v28 }
 0x104   :  { %v509_v32 = vpop.eup %508  ;;  %534 = vrcp.f32 %v310_v29  ;;  %v308_v33 = vadd.f32 1.0, %v507_v30 }
 0x105   :  { %v511_v34 = vpop.eup %510  ;;  %345 = vst [vmem:[%s662_s3 + $0x10] sm:$0xff] %v509_v32  ;;  %536 = vrcp.f32 %v300_v31 }
 0x106   :  { %v513_v35 = vpop.eup %512  ;;  %353 = vst [vmem:[%s662_s3 + $0x50] sm:$0xff] %v511_v34  ;;  %538 = vrcp.f32 %v308_v33 }
 0x107   :  { %v515_v36 = vpop.eup %514  ;;  %343 = vst [vmem:[%s662_s3] sm:$0xff] %v513_v35 }
 0x108   :  { %v517_v37 = vpop.eup %516  ;;  %351 = vst [vmem:[%s662_s3 + $0x40] sm:$0xff] %v515_v36 }
 0x109   :  { %v519_v38 = vpop.eup %518  ;;  %346 = vst [vmem:[%s662_s3 + $0x18] sm:$0xff] %v517_v37 }
 0x10a   :  { %v521_v39 = vpop.eup %520  ;;  %354 = vst [vmem:[%s662_s3 + $0x58] sm:$0xff] %v519_v38 }
 0x10b   :  { %v523_v40 = vpop.eup %522  ;;  %344 = vst [vmem:[%s662_s3 + $0x8] sm:$0xff] %v521_v39 }
 0x10c   :  { %v525_v41 = vpop.eup %524  ;;  %352 = vst [vmem:[%s662_s3 + $0x48] sm:$0xff] %v523_v40 }
 0x10d   :  { %v527_v42 = vpop.eup %526  ;;  %349 = vst [vmem:[%s662_s3 + $0x30] sm:$0xff] %v525_v41 }
 0x10e   :  { %v529_v43 = vpop.eup %528  ;;  %357 = vst [vmem:[%s662_s3 + $0x70] sm:$0xff] %v527_v42 }
 0x10f   :  { %v531_v44 = vpop.eup %530  ;;  %347 = vst [vmem:[%s662_s3 + $0x20] sm:$0xff] %v529_v43 }
 0x110   :  { %v533_v45 = vpop.eup %532  ;;  %355 = vst [vmem:[%s662_s3 + $0x60] sm:$0xff] %v531_v44 }
 0x111   :  { %v535_v46 = vpop.eup %534  ;;  %350 = vst [vmem:[%s662_s3 + $0x38] sm:$0xff] %v533_v45 }
 0x112   :  { %v537_v47 = vpop.eup %536  ;;  %358 = vst [vmem:[%s662_s3 + $0x78] sm:$0xff] %v535_v46 }
 0x113   :  { %v539_v48 = vpop.eup %538  ;;  %348 = vst [vmem:[%s662_s3 + $0x28] sm:$0xff] %v537_v47 }
 0x114   :  { %356 = vst [vmem:[%s662_s3 + $0x68] sm:$0xff] %v539_v48 }

// kernel: simple_conv_forward.28
= control target key start
LH: loop header
LB: loop body
LE: loop exit
PB: predicated region body
PF: predicated region fallthrough
CT: control target
= control target key end

     0   :  { %vm110_vm0 = vcmask 523264   ;;  %s620_s1 = inlined_call_operand.vmem [shape: bf16[64,128], index: 1, kind: input, shape index: {}]   ;;  %s621_s0 = inlined_call_operand.vmem [shape: bf16[128,64], index: 0, kind: input, shape index: {}]   ;;  %s622_s2 = inlined_call_operand.vmem [shape: f32[1,128], index: 2, kind: input, shape index: {}]   ;;  %s623_s3 = inlined_call_operand.vmem [shape: f32[128,128], index: 3, kind: output, shape index: {}]  }
   0x1   :  { %v429_v0 = vld [vmem:[%s620_s1 + $0x18] sm:$0xff]   ;;  %v430_v1 = vld [vmem:[%s620_s1 + $0x10] sm:$0xff]   ;;  %v431_v2 = vld [vmem:[%s620_s1 + $0x8] sm:$0xff]  }
   0x2   :  { %397 = vmatprep.subr.bf16.mxu0 %v429_v0  ;;  %421 = vmatprep.subr.bf16.mxu1 %v429_v0  ;;  %v433_v3 = vld [vmem:[%s621_s0] sm:$0xff]   ;;  %v435_v6 = vld [vmem:[%s621_s0 + $0x8] sm:$0xff]   ;;  %v437_v8 = vld [vmem:[%s621_s0 + $0x10] sm:$0xff]  }
   0x3   :  { %398 = vmatpush3.bf16.msra.mxu0 %v429_v0  ;;  %425 = vmatpush3.bf16.msra.mxu1 %v429_v0  ;;  %v434_v4 = vld [vmem:[%s621_s0 + $0x20] sm:$0xff]   ;;  %v436_v7 = vld [vmem:[%s621_s0 + $0x28] sm:$0xff]   ;;  %v438_v9 = vld [vmem:[%s621_s0 + $0x30] sm:$0xff]  }
   0x4   :  { %399 = vmatprep.subr.bf16.mxu0 %v430_v1  ;;  %422 = vmatprep.subr.bf16.mxu1 %v430_v1  ;;  %v432_v5 = vld [vmem:[%s620_s1] sm:$0xff]   ;;  %v439_v10 = vld [vmem:[%s621_s0 + $0x18] sm:$0xff]  }
   0x5   :  { %405 = vmatprep.mubr.msk.bf16.mxu0 %vm110_vm0, %v433_v3  ;;  %413 = vmatprep.mubr.msk.bf16.mxu1 %vm110_vm0, %v434_v4  ;;  %v440_v11 = vld [vmem:[%s621_s0 + $0x38] sm:$0xff]   ;;  %v348_v12 = vld [vmem:[%s622_s2] ss:$0 sm:$0xff] }
   0x7   :  { %400 = vmatpush3.bf16.msra.mxu0 %v430_v1  ;;  %426 = vmatpush3.bf16.msra.mxu1 %v430_v1 }
   0x8   :  { %401 = vmatprep.subr.bf16.mxu0 %v431_v2  ;;  %423 = vmatprep.subr.bf16.mxu1 %v431_v2 }
   0xb   :  { %402 = vmatpush3.bf16.msra.mxu0 %v431_v2  ;;  %427 = vmatpush3.bf16.msra.mxu1 %v431_v2 }
   0xc   :  { %403 = vmatprep.subr.bf16.mxu0 %v432_v5  ;;  %424 = vmatprep.subr.bf16.mxu1 %v432_v5 }
   0xf   :  { %404 = vmatpush3.bf16.msra.mxu0 %v432_v5  ;;  %428 = vmatpush3.bf16.msra.mxu1 %v432_v5 }
  0x12   :  { %406 = vmatmul.mubr.msk.bf16.vlgmr.msra.gmra.mxu0 %vm110_vm0, %v435_v6  ;;  %414 = vmatmul.mubr.msk.bf16.vlgmr.msra.gmra.mxu1 %vm110_vm0, %v436_v7 }
  0x13   :  { %409 = vmatprep.mubr.msk.bf16.mxu0 %vm110_vm0, %v437_v8  ;;  %417 = vmatprep.mubr.msk.bf16.mxu1 %vm110_vm0, %v438_v9 }
  0x1a   :  { %410 = vmatmul.mubr.msk.bf16.gmra.mxu0 %vm110_vm0, %v439_v10  ;;  %418 = vmatmul.mubr.msk.bf16.gmra.mxu1 %vm110_vm0, %v440_v11 }
  0xd2   :  { %v407_v13 = vpop.f32.mrf.mxu0  ;;  %v415_v14 = vpop.f32.mrf.mxu1 }
  0xd3   :  { %v178_v15 = vadd.f32 %v407_v13, %v348_v12  ;;  %v210_v16 = vadd.f32 %v415_v14, %v348_v12 }
  0xd4   :  { %v169_v17 = vpop.f32.mrf.mxu0  ;;  %v201_v18 = vpop.f32.mrf.mxu1 }
  0xd5   :  { %v371_v19 = vmul.f32 -1.442695, %v178_v15  ;;  %v379_v20 = vmul.f32 -1.442695, %v210_v16  ;;  %v170_v21 = vadd.f32 %v348_v12, %v169_v17  ;;  %v202_v22 = vadd.f32 %v348_v12, %v201_v18 }
  0xd6   :  { %v408_v23 = vpop.f32.mrf.mxu0  ;;  %v416_v24 = vpop.f32.mrf.mxu1 }
  0xd7   :  { %441 = vpow2.f32 %v371_v19  ;;  %v369_v25 = vmul.f32 -1.442695, %v170_v21  ;;  %v377_v26 = vmul.f32 -1.442695, %v202_v22  ;;  %v181_v27 = vadd.f32 %v408_v23, %v348_v12 }
  0xd8   :  { %443 = vpow2.f32 %v379_v20  ;;  %v213_v28 = vadd.f32 %v416_v24, %v348_v12  ;;  %v172_v29 = vpop.f32.mrf.mxu0  ;;  %v204_v30 = vpop.f32.mrf.mxu1 }
  0xd9   :  { %445 = vpow2.f32 %v369_v25  ;;  %v372_v31 = vmul.f32 -1.442695, %v181_v27  ;;  %v173_v32 = vadd.f32 %v348_v12, %v172_v29  ;;  %v205_v33 = vadd.f32 %v348_v12, %v204_v30 }
  0xda   :  { %447 = vpow2.f32 %v377_v26  ;;  %v380_v34 = vmul.f32 -1.442695, %v213_v28  ;;  %v411_v35 = vpop.f32.mrf.mxu0  ;;  %v419_v36 = vpop.f32.mrf.mxu1 }
  0xdb   :  { %449 = vpow2.f32 %v372_v31  ;;  %v370_v37 = vmul.f32 -1.442695, %v173_v32  ;;  %v378_v38 = vmul.f32 -1.442695, %v205_v33  ;;  %v194_v39 = vadd.f32 %v411_v35, %v348_v12 }
  0xdc   :  { %451 = vpow2.f32 %v380_v34  ;;  %v226_v40 = vadd.f32 %v419_v36, %v348_v12  ;;  %v185_v41 = vpop.f32.mrf.mxu0  ;;  %v217_v42 = vpop.f32.mrf.mxu1 }
  0xdd   :  { %453 = vpow2.f32 %v370_v37  ;;  %v375_v43 = vmul.f32 -1.442695, %v194_v39  ;;  %v186_v44 = vadd.f32 %v348_v12, %v185_v41  ;;  %v218_v45 = vadd.f32 %v348_v12, %v217_v42 }
  0xde   :  { %455 = vpow2.f32 %v378_v38  ;;  %v383_v46 = vmul.f32 -1.442695, %v226_v40  ;;  %v412_v47 = vpop.f32.mrf.mxu0  ;;  %v420_v48 = vpop.f32.mrf.mxu1 }
  0xdf   :  { %457 = vpow2.f32 %v375_v43  ;;  %v373_v49 = vmul.f32 -1.442695, %v186_v44  ;;  %v381_v50 = vmul.f32 -1.442695, %v218_v45  ;;  %v197_v51 = vadd.f32 %v412_v47, %v348_v12 }
  0xe0   :  { %459 = vpow2.f32 %v383_v46  ;;  %v229_v52 = vadd.f32 %v420_v48, %v348_v12  ;;  %v188_v53 = vpop.f32.mrf.mxu0  ;;  %v220_v54 = vpop.f32.mrf.mxu1 }
  0xe1   :  { %461 = vpow2.f32 %v373_v49  ;;  %v376_v55 = vmul.f32 -1.442695, %v197_v51  ;;  %v189_v56 = vadd.f32 %v348_v12, %v188_v53  ;;  %v221_v57 = vadd.f32 %v348_v12, %v220_v54 }
  0xe2   :  { %463 = vpow2.f32 %v381_v50  ;;  %v384_v58 = vmul.f32 -1.442695, %v229_v52 }
  0xe3   :  { %465 = vpow2.f32 %v376_v55  ;;  %v374_v59 = vmul.f32 -1.442695, %v189_v56  ;;  %v382_v60 = vmul.f32 -1.442695, %v221_v57 }
  0xe4   :  { %v442_v61 = vpop.eup %441  ;;  %467 = vpow2.f32 %v384_v58 }
  0xe5   :  { %v444_v62 = vpop.eup %443  ;;  %v282_v63 = vadd.f32 1.0, %v442_v61  ;;  %469 = vpow2.f32 %v374_v59 }
  0xe6   :  { %v446_v0 = vpop.eup %445  ;;  %v290_v1 = vadd.f32 1.0, %v444_v62  ;;  %471 = vpow2.f32 %v382_v60 }
  0xe7   :  { %v448_v2 = vpop.eup %447  ;;  %473 = vrcp.f32 %v282_v63  ;;  %v280_v3 = vadd.f32 1.0, %v446_v0 }
  0xe8   :  { %v450_v4 = vpop.eup %449  ;;  %475 = vrcp.f32 %v290_v1  ;;  %v288_v5 = vadd.f32 1.0, %v448_v2 }
  0xe9   :  { %v452_v6 = vpop.eup %451  ;;  %477 = vrcp.f32 %v280_v3  ;;  %v283_v7 = vadd.f32 1.0, %v450_v4 }
  0xea   :  { %v454_v8 = vpop.eup %453  ;;  %479 = vrcp.f32 %v288_v5  ;;  %v291_v9 = vadd.f32 1.0, %v452_v6 }
  0xeb   :  { %v456_v10 = vpop.eup %455  ;;  %481 = vrcp.f32 %v283_v7  ;;  %v281_v11 = vadd.f32 1.0, %v454_v8 }
  0xec   :  { %v458_v12 = vpop.eup %457  ;;  %483 = vrcp.f32 %v291_v9  ;;  %v289_v13 = vadd.f32 1.0, %v456_v10 }
  0xed   :  { %v460_v14 = vpop.eup %459  ;;  %485 = vrcp.f32 %v281_v11  ;;  %v286_v15 = vadd.f32 1.0, %v458_v12 }
  0xee   :  { %v462_v16 = vpop.eup %461  ;;  %487 = vrcp.f32 %v289_v13  ;;  %v294_v17 = vadd.f32 1.0, %v460_v14 }
  0xef   :  { %v464_v18 = vpop.eup %463  ;;  %489 = vrcp.f32 %v286_v15  ;;  %v284_v19 = vadd.f32 1.0, %v462_v16 }
  0xf0   :  { %v466_v20 = vpop.eup %465  ;;  %491 = vrcp.f32 %v294_v17  ;;  %v292_v21 = vadd.f32 1.0, %v464_v18 }
  0xf1   :  { %v468_v22 = vpop.eup %467  ;;  %493 = vrcp.f32 %v284_v19  ;;  %v287_v23 = vadd.f32 1.0, %v466_v20 }
  0xf2   :  { %v470_v24 = vpop.eup %469  ;;  %495 = vrcp.f32 %v292_v21  ;;  %v295_v25 = vadd.f32 1.0, %v468_v22 }
  0xf3   :  { %v472_v26 = vpop.eup %471  ;;  %497 = vrcp.f32 %v287_v23  ;;  %v285_v27 = vadd.f32 1.0, %v470_v24 }
  0xf4   :  { %v474_v28 = vpop.eup %473  ;;  %499 = vrcp.f32 %v295_v25  ;;  %v293_v29 = vadd.f32 1.0, %v472_v26 }
  0xf5   :  { %v476_v30 = vpop.eup %475  ;;  %330 = vst [vmem:[%s623_s3 + $0x10] sm:$0xff] %v474_v28  ;;  %501 = vrcp.f32 %v285_v27 }
  0xf6   :  { %v478_v31 = vpop.eup %477  ;;  %338 = vst [vmem:[%s623_s3 + $0x50] sm:$0xff] %v476_v30  ;;  %503 = vrcp.f32 %v293_v29 }
  0xf7   :  { %v480_v32 = vpop.eup %479  ;;  %328 = vst [vmem:[%s623_s3] sm:$0xff] %v478_v31 }
  0xf8   :  { %v482_v33 = vpop.eup %481  ;;  %336 = vst [vmem:[%s623_s3 + $0x40] sm:$0xff] %v480_v32 }
  0xf9   :  { %v484_v34 = vpop.eup %483  ;;  %331 = vst [vmem:[%s623_s3 + $0x18] sm:$0xff] %v482_v33 }
  0xfa   :  { %v486_v35 = vpop.eup %485  ;;  %339 = vst [vmem:[%s623_s3 + $0x58] sm:$0xff] %v484_v34 }
  0xfb   :  { %v488_v36 = vpop.eup %487  ;;  %329 = vst [vmem:[%s623_s3 + $0x8] sm:$0xff] %v486_v35 }
  0xfc   :  { %v490_v37 = vpop.eup %489  ;;  %337 = vst [vmem:[%s623_s3 + $0x48] sm:$0xff] %v488_v36 }
  0xfd   :  { %v492_v38 = vpop.eup %491  ;;  %334 = vst [vmem:[%s623_s3 + $0x30] sm:$0xff] %v490_v37 }
  0xfe   :  { %v494_v39 = vpop.eup %493  ;;  %342 = vst [vmem:[%s623_s3 + $0x70] sm:$0xff] %v492_v38 }
  0xff   :  { %v496_v40 = vpop.eup %495  ;;  %332 = vst [vmem:[%s623_s3 + $0x20] sm:$0xff] %v494_v39 }
 0x100   :  { %v498_v41 = vpop.eup %497  ;;  %340 = vst [vmem:[%s623_s3 + $0x60] sm:$0xff] %v496_v40 }
 0x101   :  { %v500_v42 = vpop.eup %499  ;;  %335 = vst [vmem:[%s623_s3 + $0x38] sm:$0xff] %v498_v41 }
 0x102   :  { %v502_v43 = vpop.eup %501  ;;  %343 = vst [vmem:[%s623_s3 + $0x78] sm:$0xff] %v500_v42 }
 0x103   :  { %v504_v44 = vpop.eup %503  ;;  %333 = vst [vmem:[%s623_s3 + $0x28] sm:$0xff] %v502_v43 }
 0x104   :  { %341 = vst [vmem:[%s623_s3 + $0x68] sm:$0xff] %v504_v44 }

// kernel: simple_conv_forward.31
= control target key start
LH: loop header
LB: loop body
LE: loop exit
PB: predicated region body
PF: predicated region fallthrough
CT: control target
= control target key end

     0   :  { %s877_s1 = inlined_call_operand.vmem [shape: bf16[256,128], index: 1, kind: input, shape index: {}]   ;;  %s878_s0 = inlined_call_operand.vmem [shape: bf16[128,256], index: 0, kind: input, shape index: {}]   ;;  %s879_s2 = inlined_call_operand.vmem [shape: f32[1,128], index: 2, kind: input, shape index: {}]   ;;  %s880_s3 = inlined_call_operand.vmem [shape: f32[128,128], index: 3, kind: output, shape index: {}]  }
   0x1   :  { %v588_v0 = vld [vmem:[%s877_s1 + $0x78] sm:$0xff]   ;;  %v590_v2 = vld [vmem:[%s877_s1 + $0x70] sm:$0xff]   ;;  %v592_v4 = vld [vmem:[%s877_s1 + $0x68] sm:$0xff]  }
   0x2   :  { %v589_v1 = vld [vmem:[%s877_s1 + $0x38] sm:$0xff]   ;;  %508 = vmatprep.subr.bf16.mxu0 %v588_v0  ;;  %572 = vmatprep.subr.bf16.mxu1 %v588_v0  ;;  %v591_v3 = vld [vmem:[%s877_s1 + $0x30] sm:$0xff]   ;;  %v593_v5 = vld [vmem:[%s877_s1 + $0x28] sm:$0xff]  }
   0x3   :  { %509 = vmatpush3.bf16.msra.mxu0 %v589_v1  ;;  %580 = vmatpush3.bf16.msra.mxu1 %v589_v1  ;;  %v594_v6 = vld [vmem:[%s877_s1 + $0x60] sm:$0xff]   ;;  %v596_v8 = vld [vmem:[%s877_s1 + $0x58] sm:$0xff]   ;;  %v598_v10 = vld [vmem:[%s877_s1 + $0x50] sm:$0xff]  }
   0x4   :  { %510 = vmatprep.subr.bf16.mxu0 %v590_v2  ;;  %573 = vmatprep.subr.bf16.mxu1 %v590_v2  ;;  %v595_v7 = vld [vmem:[%s877_s1 + $0x20] sm:$0xff]   ;;  %v597_v9 = vld [vmem:[%s877_s1 + $0x18] sm:$0xff]   ;;  %v599_v13 = vld [vmem:[%s877_s1 + $0x10] sm:$0xff]  }
   0x5   :  { %v606_v11 = vld [vmem:[%s878_s0 + $0x4] ss:$8 sps:$4 sm:$0xff]   ;;  %v604_v18 = vld [vmem:[%s878_s0] ss:$8 sps:$4 sm:$0xff]   ;;  %v610_v20 = vld [vmem:[%s878_s0 + $0x14] ss:$8 sps:$4 sm:$0xff]  }
   0x6   :  { %v609_v12 = vld [vmem:[%s878_s0 + $0x44] ss:$8 sps:$4 sm:$0xff]   ;;  %278 = vmatprep.mubr.bf16.mxu0 %v606_v11  ;;  %v607_v19 = vld [vmem:[%s878_s0 + $0x40] ss:$8 sps:$4 sm:$0xff]   ;;  %v612_v21 = vld [vmem:[%s878_s0 + $0x54] ss:$8 sps:$4 sm:$0xff]  }
   0x7   :  { %511 = vmatpush3.bf16.msra.mxu0 %v591_v3  ;;  %581 = vmatpush3.bf16.msra.mxu1 %v591_v3  ;;  %v600_v14 = vld [vmem:[%s877_s1 + $0x48] sm:$0xff]   ;;  %v602_v16 = vld [vmem:[%s877_s1 + $0x40] sm:$0xff]   ;;  %v614_v22 = vld [vmem:[%s878_s0 + $0x10] ss:$8 sps:$4 sm:$0xff]  }
   0x8   :  { %512 = vmatprep.subr.bf16.mxu0 %v592_v4  ;;  %574 = vmatprep.subr.bf16.mxu1 %v592_v4  ;;  %v601_v15 = vld [vmem:[%s877_s1 + $0x8] sm:$0xff]   ;;  %v603_v17 = vld [vmem:[%s877_s1] sm:$0xff]   ;;  %v615_v23 = vld [vmem:[%s878_s0 + $0x50] ss:$8 sps:$4 sm:$0xff]  }
   0x9   :  { %310 = vmatprep.mubr.bf16.mxu1 %v609_v12  ;;  %v616_v24 = vld [vmem:[%s878_s0 + $0x24] ss:$8 sps:$4 sm:$0xff]   ;;  %v620_v26 = vld [vmem:[%s878_s0 + $0x20] ss:$8 sps:$4 sm:$0xff]   ;;  %v622_v28 = vld [vmem:[%s878_s0 + $0x34] ss:$8 sps:$4 sm:$0xff]  }
   0xa   :  { %v618_v25 = vld [vmem:[%s878_s0 + $0x64] ss:$8 sps:$4 sm:$0xff]   ;;  %v621_v27 = vld [vmem:[%s878_s0 + $0x60] ss:$8 sps:$4 sm:$0xff]   ;;  %v624_v29 = vld [vmem:[%s878_s0 + $0x74] ss:$8 sps:$4 sm:$0xff]  }
   0xb   :  { %513 = vmatpush3.bf16.msra.mxu0 %v593_v5  ;;  %582 = vmatpush3.bf16.msra.mxu1 %v593_v5  ;;  %v626_v30 = vld [vmem:[%s878_s0 + $0x30] ss:$8 sps:$4 sm:$0xff]   ;;  %v811_v34 = vld [vmem:[%s879_s2] ss:$0 sm:$0xff] }
   0xc   :  { %514 = vmatprep.subr.bf16.mxu0 %v594_v6  ;;  %575 = vmatprep.subr.bf16.mxu1 %v594_v6  ;;  %v627_v31 = vld [vmem:[%s878_s0 + $0x70] ss:$8 sps:$4 sm:$0xff]  }
   0xf   :  { %515 = vmatpush3.bf16.msra.mxu0 %v595_v7  ;;  %583 = vmatpush3.bf16.msra.mxu1 %v595_v7 }
  0x10   :  { %516 = vmatprep.subr.bf16.mxu0 %v596_v8  ;;  %576 = vmatprep.subr.bf16.mxu1 %v596_v8 }
  0x13   :  { %517 = vmatpush3.bf16.msra.mxu0 %v597_v9  ;;  %584 = vmatpush3.bf16.msra.mxu1 %v597_v9 }
  0x14   :  { %518 = vmatprep.subr.bf16.mxu0 %v598_v10  ;;  %577 = vmatprep.subr.bf16.mxu1 %v598_v10 }
  0x17   :  { %519 = vmatpush3.bf16.msra.mxu0 %v599_v13  ;;  %585 = vmatpush3.bf16.msra.mxu1 %v599_v13 }
  0x18   :  { %520 = vmatprep.subr.bf16.mxu0 %v600_v14  ;;  %578 = vmatprep.subr.bf16.mxu1 %v600_v14 }
  0x1b   :  { %521 = vmatpush3.bf16.msra.mxu0 %v601_v15  ;;  %586 = vmatpush3.bf16.msra.mxu1 %v601_v15 }
  0x1c   :  { %522 = vmatprep.subr.bf16.mxu0 %v602_v16  ;;  %579 = vmatprep.subr.bf16.mxu1 %v602_v16 }
  0x1f   :  { %523 = vmatpush3.bf16.msra.mxu0 %v603_v17  ;;  %587 = vmatpush3.bf16.msra.mxu1 %v603_v17 }
  0x22   :  { %279 = vmatmul.mubr.bf16.vlgmr.msra.gmra.mxu0 %v604_v18  ;;  %311 = vmatmul.mubr.bf16.vlgmr.msra.gmra.mxu1 %v607_v19 }
  0x23   :  { %286 = vmatprep.mubr.bf16.mxu0 %v610_v20  ;;  %318 = vmatprep.mubr.bf16.mxu1 %v612_v21 }
  0x2a   :  { %287 = vmatmul.mubr.bf16.gmra.mxu0 %v614_v22  ;;  %319 = vmatmul.mubr.bf16.gmra.mxu1 %v615_v23 }
  0x2b   :  { %294 = vmatprep.mubr.bf16.mxu0 %v616_v24  ;;  %326 = vmatprep.mubr.bf16.mxu1 %v618_v25 }
  0x32   :  { %295 = vmatmul.mubr.bf16.gmra.mxu0 %v620_v26  ;;  %327 = vmatmul.mubr.bf16.gmra.mxu1 %v621_v27 }
  0x33   :  { %302 = vmatprep.mubr.bf16.mxu0 %v622_v28  ;;  %334 = vmatprep.mubr.bf16.mxu1 %v624_v29 }
  0x3a   :  { %303 = vmatmul.mubr.bf16.gmra.mxu0 %v626_v30  ;;  %335 = vmatmul.mubr.bf16.gmra.mxu1 %v627_v31 }
  0xe2   :  { %v524_v32 = vpop.f32.mrf.mxu0  ;;  %v548_v33 = vpop.f32.mrf.mxu1 }
  0xe4   :  { %v525_v35 = vpop.f32.mrf.mxu0  ;;  %v549_v36 = vpop.f32.mrf.mxu1 }
  0xe5   :  { %v526_v37 = vadd.f32 %v525_v35, %v524_v32  ;;  %v550_v38 = vadd.f32 %v549_v36, %v548_v33 }
  0xe6   :  { %v527_v39 = vpop.f32.mrf.mxu0  ;;  %v551_v40 = vpop.f32.mrf.mxu1 }
  0xe7   :  { %v281_v41 = vadd.f32 %v526_v37, %v811_v34  ;;  %v313_v42 = vadd.f32 %v550_v38, %v811_v34 }
  0xe8   :  { %v528_v43 = vpop.f32.mrf.mxu0  ;;  %v552_v44 = vpop.f32.mrf.mxu1 }
  0xe9   :  { %v492_v45 = vmul.f32 -1.442695, %v281_v41  ;;  %v500_v46 = vmul.f32 -1.442695, %v313_v42  ;;  %v529_v47 = vadd.f32 %v528_v43, %v527_v39  ;;  %v553_v48 = vadd.f32 %v552_v44, %v551_v40 }
  0xea   :  { %v530_v49 = vpop.f32.mrf.mxu0  ;;  %v554_v50 = vpop.f32.mrf.mxu1 }
  0xeb   :  { %628 = vpow2.f32 %v492_v45  ;;  %v284_v51 = vadd.f32 %v529_v47, %v811_v34  ;;  %v316_v52 = vadd.f32 %v553_v48, %v811_v34 }
  0xec   :  { %630 = vpow2.f32 %v500_v46  ;;  %v531_v53 = vpop.f32.mrf.mxu0  ;;  %v555_v54 = vpop.f32.mrf.mxu1 }
  0xed   :  { %v493_v55 = vmul.f32 -1.442695, %v284_v51  ;;  %v501_v56 = vmul.f32 -1.442695, %v316_v52  ;;  %v532_v57 = vadd.f32 %v531_v53, %v530_v49  ;;  %v556_v58 = vadd.f32 %v555_v54, %v554_v50 }
  0xee   :  { %v533_v59 = vpop.f32.mrf.mxu0  ;;  %v557_v60 = vpop.f32.mrf.mxu1 }
  0xef   :  { %632 = vpow2.f32 %v493_v55  ;;  %v289_v61 = vadd.f32 %v532_v57, %v811_v34  ;;  %v321_v62 = vadd.f32 %v556_v58, %v811_v34 }
  0xf0   :  { %634 = vpow2.f32 %v501_v56  ;;  %v534_v63 = vpop.f32.mrf.mxu0  ;;  %v558_v0 = vpop.f32.mrf.mxu1 }
  0xf1   :  { %v494_v1 = vmul.f32 -1.442695, %v289_v61  ;;  %v502_v2 = vmul.f32 -1.442695, %v321_v62  ;;  %v535_v3 = vadd.f32 %v534_v63, %v533_v59  ;;  %v559_v4 = vadd.f32 %v558_v0, %v557_v60 }
  0xf2   :  { %v536_v5 = vpop.f32.mrf.mxu0  ;;  %v560_v6 = vpop.f32.mrf.mxu1 }
  0xf3   :  { %636 = vpow2.f32 %v494_v1  ;;  %v292_v7 = vadd.f32 %v535_v3, %v811_v34  ;;  %v324_v8 = vadd.f32 %v559_v4, %v811_v34 }
  0xf4   :  { %638 = vpow2.f32 %v502_v2  ;;  %v537_v9 = vpop.f32.mrf.mxu0  ;;  %v561_v10 = vpop.f32.mrf.mxu1 }
  0xf5   :  { %v495_v11 = vmul.f32 -1.442695, %v292_v7  ;;  %v503_v12 = vmul.f32 -1.442695, %v324_v8  ;;  %v538_v13 = vadd.f32 %v537_v9, %v536_v5  ;;  %v562_v14 = vadd.f32 %v561_v10, %v560_v6 }
  0xf6   :  { %v539_v15 = vpop.f32.mrf.mxu0  ;;  %v563_v16 = vpop.f32.mrf.mxu1 }
  0xf7   :  { %640 = vpow2.f32 %v495_v11  ;;  %v297_v17 = vadd.f32 %v538_v13, %v811_v34  ;;  %v329_v18 = vadd.f32 %v562_v14, %v811_v34 }
  0xf8   :  { %v629_v19 = vpop.eup %628  ;;  %642 = vpow2.f32 %v503_v12  ;;  %v540_v20 = vpop.f32.mrf.mxu0 }
  0xf9   :  { %v564_v21 = vpop.f32.mrf.mxu1  ;;  %v631_v22 = vpop.eup %630  ;;  %v391_v23 = vadd.f32 1.0, %v629_v19  ;;  %v496_v24 = vmul.f32 -1.442695, %v297_v17  ;;  %v541_v25 = vadd.f32 %v540_v20, %v539_v15  ;;  %v504_v27 = vmul.f32 -1.442695, %v329_v18 }
  0xfa   :  { %v399_v26 = vadd.f32 1.0, %v631_v22  ;;  %v565_v28 = vadd.f32 %v564_v21, %v563_v16  ;;  %v542_v29 = vpop.f32.mrf.mxu0 }
  0xfb   :  { %v566_v30 = vpop.f32.mrf.mxu1  ;;  %644 = vrcp.f32 %v391_v23  ;;  %v300_v31 = vadd.f32 %v541_v25, %v811_v34 }
  0xfc   :  { %v633_v32 = vpop.eup %632  ;;  %646 = vrcp.f32 %v399_v26  ;;  %v332_v33 = vadd.f32 %v565_v28, %v811_v34  ;;  %v543_v35 = vpop.f32.mrf.mxu0 }
  0xfd   :  { %v567_v36 = vpop.f32.mrf.mxu1  ;;  %v635_v37 = vpop.eup %634  ;;  %v392_v38 = vadd.f32 1.0, %v633_v32  ;;  %648 = vpow2.f32 %v496_v24  ;;  %v497_v39 = vmul.f32 -1.442695, %v300_v31  ;;  %v544_v40 = vadd.f32 %v543_v35, %v542_v29 }
  0xfe   :  { %v400_v41 = vadd.f32 1.0, %v635_v37  ;;  %650 = vpow2.f32 %v504_v27  ;;  %v505_v42 = vmul.f32 -1.442695, %v332_v33  ;;  %v568_v43 = vadd.f32 %v567_v36, %v566_v30  ;;  %v545_v44 = vpop.f32.mrf.mxu0 }
  0xff   :  { %v569_v45 = vpop.f32.mrf.mxu1  ;;  %652 = vrcp.f32 %v392_v38  ;;  %v305_v46 = vadd.f32 %v544_v40, %v811_v34 }
 0x100   :  { %v637_v47 = vpop.eup %636  ;;  %654 = vrcp.f32 %v400_v41  ;;  %v337_v48 = vadd.f32 %v568_v43, %v811_v34  ;;  %v546_v49 = vpop.f32.mrf.mxu0 }
 0x101   :  { %v570_v50 = vpop.f32.mrf.mxu1  ;;  %v639_v51 = vpop.eup %638  ;;  %v393_v52 = vadd.f32 1.0, %v637_v47  ;;  %656 = vpow2.f32 %v497_v39  ;;  %v498_v53 = vmul.f32 -1.442695, %v305_v46  ;;  %v547_v54 = vadd.f32 %v546_v49, %v545_v44 }
 0x102   :  { %v401_v55 = vadd.f32 1.0, %v639_v51  ;;  %658 = vpow2.f32 %v505_v42  ;;  %v506_v56 = vmul.f32 -1.442695, %v337_v48  ;;  %v571_v57 = vadd.f32 %v570_v50, %v569_v45 }
 0x103   :  { %660 = vrcp.f32 %v393_v52  ;;  %v308_v58 = vadd.f32 %v547_v54, %v811_v34 }
 0x104   :  { %v641_v59 = vpop.eup %640  ;;  %662 = vrcp.f32 %v401_v55  ;;  %v340_v60 = vadd.f32 %v571_v57, %v811_v34 }
 0x105   :  { %v643_v61 = vpop.eup %642  ;;  %v394_v62 = vadd.f32 1.0, %v641_v59  ;;  %664 = vpow2.f32 %v498_v53  ;;  %v499_v63 = vmul.f32 -1.442695, %v308_v58 }
 0x106   :  { %v402_v0 = vadd.f32 1.0, %v643_v61  ;;  %666 = vpow2.f32 %v506_v56  ;;  %v507_v1 = vmul.f32 -1.442695, %v340_v60 }
 0x107   :  { %668 = vrcp.f32 %v394_v62 }
 0x108   :  { %v645_v2 = vpop.eup %644  ;;  %670 = vrcp.f32 %v402_v0 }
 0x109   :  { %v647_v3 = vpop.eup %646  ;;  %439 = vst [vmem:[%s880_s3] sm:$0xff] %v645_v2  ;;  %672 = vpow2.f32 %v499_v63 }
 0x10a   :  { %v649_v4 = vpop.eup %648  ;;  %447 = vst [vmem:[%s880_s3 + $0x40] sm:$0xff] %v647_v3  ;;  %674 = vpow2.f32 %v507_v1 }
 0x10b   :  { %v651_v34 = vpop.eup %650  ;;  %v395_v5 = vadd.f32 1.0, %v649_v4 }
 0x10c   :  { %v653_v6 = vpop.eup %652  ;;  %v403_v7 = vadd.f32 1.0, %v651_v34 }
 0x10d   :  { %v655_v8 = vpop.eup %654  ;;  %440 = vst [vmem:[%s880_s3 + $0x8] sm:$0xff] %v653_v6  ;;  %676 = vrcp.f32 %v395_v5 }
 0x10e   :  { %v657_v9 = vpop.eup %656  ;;  %448 = vst [vmem:[%s880_s3 + $0x48] sm:$0xff] %v655_v8  ;;  %678 = vrcp.f32 %v403_v7 }
 0x10f   :  { %v659_v10 = vpop.eup %658  ;;  %v396_v11 = vadd.f32 1.0, %v657_v9 }
 0x110   :  { %v661_v12 = vpop.eup %660  ;;  %v404_v13 = vadd.f32 1.0, %v659_v10 }
 0x111   :  { %v663_v14 = vpop.eup %662  ;;  %441 = vst [vmem:[%s880_s3 + $0x10] sm:$0xff] %v661_v12  ;;  %680 = vrcp.f32 %v396_v11 }
 0x112   :  { %v665_v15 = vpop.eup %664  ;;  %449 = vst [vmem:[%s880_s3 + $0x50] sm:$0xff] %v663_v14  ;;  %682 = vrcp.f32 %v404_v13 }
 0x113   :  { %v667_v16 = vpop.eup %666  ;;  %v397_v17 = vadd.f32 1.0, %v665_v15 }
 0x114   :  { %v669_v18 = vpop.eup %668  ;;  %v405_v19 = vadd.f32 1.0, %v667_v16 }
 0x115   :  { %v671_v20 = vpop.eup %670  ;;  %442 = vst [vmem:[%s880_s3 + $0x18] sm:$0xff] %v669_v18  ;;  %684 = vrcp.f32 %v397_v17 }
 0x116   :  { %v673_v21 = vpop.eup %672  ;;  %450 = vst [vmem:[%s880_s3 + $0x58] sm:$0xff] %v671_v20  ;;  %686 = vrcp.f32 %v405_v19 }
 0x117   :  { %v675_v22 = vpop.eup %674  ;;  %v398_v23 = vadd.f32 1.0, %v673_v21 }
 0x118   :  { %v406_v24 = vadd.f32 1.0, %v675_v22 }
 0x119   :  { %688 = vrcp.f32 %v398_v23 }
 0x11a   :  { %v677_v25 = vpop.eup %676  ;;  %690 = vrcp.f32 %v406_v24 }
 0x11b   :  { %v679_v26 = vpop.eup %678  ;;  %443 = vst [vmem:[%s880_s3 + $0x20] sm:$0xff] %v677_v25 }
 0x11c   :  { %451 = vst [vmem:[%s880_s3 + $0x60] sm:$0xff] %v679_v26 }
 0x11e   :  { %v681_v27 = vpop.eup %680 }
 0x11f   :  { %v683_v28 = vpop.eup %682  ;;  %444 = vst [vmem:[%s880_s3 + $0x28] sm:$0xff] %v681_v27 }
 0x120   :  { %452 = vst [vmem:[%s880_s3 + $0x68] sm:$0xff] %v683_v28 }
 0x122   :  { %v685_v29 = vpop.eup %684 }
 0x123   :  { %v687_v30 = vpop.eup %686  ;;  %445 = vst [vmem:[%s880_s3 + $0x30] sm:$0xff] %v685_v29 }
 0x124   :  { %453 = vst [vmem:[%s880_s3 + $0x70] sm:$0xff] %v687_v30 }
 0x126   :  { %v689_v31 = vpop.eup %688 }
 0x127   :  { %v691_v32 = vpop.eup %690  ;;  %446 = vst [vmem:[%s880_s3 + $0x38] sm:$0xff] %v689_v31 }
 0x128   :  { %454 = vst [vmem:[%s880_s3 + $0x78] sm:$0xff] %v691_v32 }

</bundles_post_ra>
